<compile_context>
chip_gen: v7x
topology: tpu7x:2x2x1
jax: 0.10.0
libtpu: 0.0.40
codegen_flags: <defaults>
</compile_context>

<pallas_src>
import functools

import jax
import jax.numpy as jnp
from jax.experimental import pallas as pl
from jax.experimental.pallas import tpu as pltpu

LANE = 128

# Batch-tile cap: comfortable VMEM headroom on v7x (64 MiB/TC), >=2 grid steps
# (two TensorCores) once B >= 512.  Sweep 256/512 on v5e/v6e (128 MiB VMEM).
_BB_CAP = 256


def _round_up(a, m):
    return ((a + m - 1) // m) * m


# ------------------------------ fused kernel -------------------------------- #

def _fused_kernel(x_ref, wqkv_ref, bqkv_ref, w1_ref, b1_ref, w2_ref, b2_ref,
                  w3_ref, b3_ref, o_ref, *, T, kdim, vdim):
    """One batch tile: fused QKV projection -> attention -> flatten -> MLP."""
    Tk = T * kdim
    Tv = T * vdim

    def sigmoid(z):                         # single EUP op, f32 elementwise
        return 0.5 * jnp.tanh(0.5 * z) + 0.5

    # --- fused Q/K/V projection: one lane-dense bf16 matmul (block-diag weights)
    x = x_ref[...]                                                   # (Bb, T*N) bf16
    qkv = jnp.dot(x, wqkv_ref[...],
                  preferred_element_type=jnp.float32) + bqkv_ref[...]  # (Bb, 2Tk+Tv) f32

    q_flat = qkv[:, 0:Tk]                                            # (Bb, T*kdim)
    k_rows = [qkv[:, Tk + i * kdim: Tk + (i + 1) * kdim] for i in range(T)]
    v_rows = [qkv[:, 2 * Tk + j * vdim: 2 * Tk + (j + 1) * vdim] for j in range(T)]

    # --- attention on the VPU (no per-batch tiny MXU matmuls).
    # scores[b, i, j] = <k[b, i, :], q[b, j, :]>, softmax over j, r = A @ V.
    r_parts = []
    for i in range(T):
        # one lane-dense multiply gives all j products for output row i
        k_rep = jnp.concatenate([k_rows[i]] * T, axis=-1)            # (Bb, T*kdim)
        prod = q_flat * k_rep
        s_i = jnp.concatenate(
            [jnp.sum(prod[:, j * kdim:(j + 1) * kdim], axis=-1, keepdims=True)
             for j in range(T)], axis=-1)                            # (Bb, T)
        # softmax over j (module uses plain nn.Softmax, no 1/sqrt(kdim) scale)
        s_i = s_i - jnp.max(s_i, axis=-1, keepdims=True)
        e_i = jnp.exp(s_i)
        a_i = e_i * pl.reciprocal(jnp.sum(e_i, axis=-1, keepdims=True),
                                  approx=True)
        # r[b, i, :] = sum_j a[b, i, j] * v[b, j, :]
        r_i = a_i[:, 0:1] * v_rows[0]
        for j in range(1, T):
            r_i = r_i + a_i[:, j:j + 1] * v_rows[j]
        r_parts.append(r_i)

    # flatten (i-major, v-minor, == torch.reshape order) into a lane-dense slab
    r = jnp.concatenate(r_parts, axis=-1)                            # (Bb, T*vdim)

    # --- 3-layer MLP, 128-lane-padded weights, bf16 operands / f32 accumulation
    h1 = sigmoid(jnp.dot(r.astype(w1_ref.dtype), w1_ref[...],
                         preferred_element_type=jnp.float32) + b1_ref[...])
    h2 = sigmoid(jnp.dot(h1.astype(w2_ref.dtype), w2_ref[...],
                         preferred_element_type=jnp.float32) + b2_ref[...])
    o_ref[...] = jnp.dot(h2.astype(w3_ref.dtype), w3_ref[...],
                         preferred_element_type=jnp.float32) + b3_ref[...]


# ------------------------------- wrapper ------------------------------------ #

def _pick_batch_tile(batch, cap=_BB_CAP):
    """Multiple-of-8 batch tile, <= cap, with padding waste bounded to ~12.5%."""
    b8 = _round_up(max(batch, 1), 8)
    if b8 <= cap:
        return b8
    for bb in range(cap, 0, -8):
        if (_round_up(b8, bb) - b8) * 8 <= b8:
            return bb
    return 8


def _full_spec(arr):
    zeros = (0,) * arr.ndim
    return pl.BlockSpec(arr.shape, lambda i, _z=zeros: _z)


@functools.partial(jax.jit, static_argnames=("out_dim",))
def time_series_transformer_forward(x, kp, *, out_dim):
    """x: (B, tdim, ndim) float32.  kp: output of prepare_params().  -> (B, out_dim)."""
    B, T, N = x.shape
    Tv = kp["w1"].shape[0]                      # tdim * vdim
    Tk = (kp["w_qkv"].shape[1] - Tv) // 2       # tdim * kdim
    kdim, vdim = Tk // T, Tv // T
    out_pad = kp["w3"].shape[1]

    Bb = _pick_batch_tile(B)
    B_pad = _round_up(B, Bb)
    nb = B_pad // Bb

    # lane-dense, bf16 input slab (halves the x DMA)
    x2 = x.reshape(B, T * N).astype(jnp.bfloat16)
    if B_pad != B:
        x2 = jnp.pad(x2, ((0, B_pad - B), (0, 0)))

    weights = (kp["w_qkv"], kp["b_qkv"], kp["w1"], kp["b1"],
               kp["w2"], kp["b2"], kp["w3"], kp["b3"])
    kernel = functools.partial(_fused_kernel, T=T, kdim=kdim, vdim=vdim)

    out = pl.pallas_call(
        kernel,
        grid=(nb,),
        in_specs=[pl.BlockSpec((Bb, T * N), lambda i: (i, 0))]
                + [_full_spec(w) for w in weights],
        out_specs=pl.BlockSpec((Bb, out_pad), lambda i: (i, 0)),
        out_shape=jax.ShapeDtypeStruct((B_pad, out_pad), jnp.float32),
        compiler_params=pltpu.CompilerParams(
            dimension_semantics=("parallel",),
            vmem_limit_bytes=48 * 1024 * 1024),
    )(x2, *weights)
    return out[:B, :out_dim]


# --------------------------- parameter construction ------------------------- #

def init_linear(key, in_dim, out_dim):
    # torch.nn.Linear default init: U(-1/sqrt(in), 1/sqrt(in)).
    kw, kb = jax.random.split(key)
    bound = 1.0 / float(in_dim) ** 0.5
    W = jax.random.uniform(kw, (out_dim, in_dim), jnp.float32, -bound, bound)
    b = jax.random.uniform(kb, (out_dim,), jnp.float32, -bound, bound)
    return W, b


def make_params(key, ndim, tdim, kdim, vdim, fdim, odim):
    ks = jax.random.split(key, 6)
    Wq, bq = init_linear(ks[0], ndim, kdim)
    Wk, bk = init_linear(ks[1], ndim, kdim)
    Wv, bv = init_linear(ks[2], ndim, vdim)
    W1, b1 = init_linear(ks[3], tdim * vdim, fdim)
    W2, b2 = init_linear(ks[4], fdim, fdim)
    W3, b3 = init_linear(ks[5], fdim, odim * ndim)
    return dict(Wq=Wq, bq=bq, Wk=Wk, bk=bk, Wv=Wv, bv=bv,
                W1=W1, b1=b1, W2=W2, b2=b2, W3=W3, b3=b3)


def prepare_params(params):
    """One-time repack: block-diagonal fused QKV weight for the (B, T*N) layout,
    bf16 matmul weights, fdim / out_dim zero-padded to a 128-lane multiple."""
    kdim = params["Wq"].shape[0]
    vdim = params["Wv"].shape[0]
    fdim = params["W1"].shape[0]
    tdim = params["W1"].shape[1] // vdim
    out_dim = params["W3"].shape[0]
    f_pad = _round_up(fdim, LANE)
    out_pad = _round_up(out_dim, LANE)
    eye = jnp.eye(tdim, dtype=jnp.float32)

    def bd(W):                     # torch (out,in) -> block-diag (T*in, T*out)
        return jnp.kron(eye, W.T)

    w_qkv = jnp.concatenate(
        [bd(params["Wq"]), bd(params["Wk"]), bd(params["Wv"])], axis=1)
    b_qkv = jnp.concatenate([jnp.tile(params["bq"], tdim),
                             jnp.tile(params["bk"], tdim),
                             jnp.tile(params["bv"], tdim)])[None, :]

    # Zero-padded W1 columns make h1's padded lanes sigmoid(0)=0.5; the matching
    # zero-padded ROWS of W2/W3 cancel those contributions exactly.
    w1 = jnp.pad(params["W1"].T, ((0, 0), (0, f_pad - fdim)))
    w2 = jnp.pad(params["W2"].T, ((0, f_pad - fdim), (0, f_pad - fdim)))
    w3 = jnp.pad(params["W3"].T, ((0, f_pad - fdim), (0, out_pad - out_dim)))
    b1 = jnp.pad(params["b1"], (0, f_pad - fdim))[None, :]
    b2 = jnp.pad(params["b2"], (0, f_pad - fdim))[None, :]
    b3 = jnp.pad(params["b3"], (0, out_pad - out_dim))[None, :]

    bf16 = jnp.bfloat16
    return dict(w_qkv=w_qkv.astype(bf16), b_qkv=b_qkv,
                w1=w1.astype(bf16), b1=b1,
                w2=w2.astype(bf16), b2=b2,
                w3=w3.astype(bf16), b3=b3)


# ------------------------------- reference ---------------------------------- #

def reference_forward(x, params):
    def lin(z, W, b):
        return z @ W.T + b
    q = lin(x, params["Wq"], params["bq"])
    k = lin(x, params["Wk"], params["bk"])
    v = lin(x, params["Wv"], params["bv"])
    a = jax.nn.softmax(jnp.einsum('bik,bjk->bij', k, q), axis=-1)
    r = jnp.einsum('bij,bjk->bik', a, v).reshape(x.shape[0], -1)
    h1 = jax.nn.sigmoid(lin(r, params["W1"], params["b1"]))
    h2 = jax.nn.sigmoid(lin(h1, params["W2"], params["b2"]))
    return lin(h2, params["W3"], params["b3"])


# --------------------------------- main -------------------------------------- #

if __name__ == "__main__":
    ndim, tdim, kdim, vdim, fdim, odim = 16, 8, 16, 16, 32, 4
    B = 2

    root = jax.random.PRNGKey(0)
    k_params, k_x = jax.random.split(root)
    params = make_params(k_params, ndim, tdim, kdim, vdim, fdim, odim)
    kparams = prepare_params(params)
    x = jax.random.normal(k_x, (B, tdim, ndim), jnp.float32)

    out = time_series_transformer_forward(x, kparams, out_dim=odim * ndim)
    out = jax.block_until_ready(out)

    ref = reference_forward(x, params)
    assert out.shape == (B, odim * ndim)
    # bf16 matmul operands (f32 accumulation) vs. a pure-f32 reference -> use a
    # correspondingly relaxed tolerance.
    assert jnp.allclose(out, ref, atol=3e-2, rtol=3e-2), float(
        jnp.max(jnp.abs(out - ref)))

    print("KERNEL_OK")
</pallas_src>

<mosaic_0001>
module attributes {stable_mosaic.version = 11 : i64} {
  func.func @_fused_kernel(%arg0: i32, %arg1: memref<8x128xbf16, #tpu.memory_space<vmem>>, %arg2: memref<128x384xbf16, #tpu.memory_space<vmem>>, %arg3: memref<1x384xf32, #tpu.memory_space<vmem>>, %arg4: memref<128x128xbf16, #tpu.memory_space<vmem>>, %arg5: memref<1x128xf32, #tpu.memory_space<vmem>>, %arg6: memref<128x128xbf16, #tpu.memory_space<vmem>>, %arg7: memref<1x128xf32, #tpu.memory_space<vmem>>, %arg8: memref<128x128xbf16, #tpu.memory_space<vmem>>, %arg9: memref<1x128xf32, #tpu.memory_space<vmem>>, %arg10: memref<8x128xf32, #tpu.memory_space<vmem>>) attributes {dimension_semantics = [#tpu.dimension_semantics<parallel>], iteration_bounds = array<i64: 1>, scalar_prefetch = 0 : i64, scratch_operands = 0 : i64, tpu.core_type = #tpu.core_type<tc>, window_params = [{transform_indices = @transform_0, window_bounds = array<i64: 8, 128>}, {pipeline_mode = #tpu.pipeline_mode<synchronous>, transform_indices = @transform_1, window_bounds = array<i64: 128, 384>}, {pipeline_mode = #tpu.pipeline_mode<synchronous>, transform_indices = @transform_2, window_bounds = array<i64: 1, 384>}, {pipeline_mode = #tpu.pipeline_mode<synchronous>, transform_indices = @transform_3, window_bounds = array<i64: 128, 128>}, {pipeline_mode = #tpu.pipeline_mode<synchronous>, transform_indices = @transform_4, window_bounds = array<i64: 1, 128>}, {pipeline_mode = #tpu.pipeline_mode<synchronous>, transform_indices = @transform_5, window_bounds = array<i64: 128, 128>}, {pipeline_mode = #tpu.pipeline_mode<synchronous>, transform_indices = @transform_6, window_bounds = array<i64: 1, 128>}, {pipeline_mode = #tpu.pipeline_mode<synchronous>, transform_indices = @transform_7, window_bounds = array<i64: 128, 128>}, {pipeline_mode = #tpu.pipeline_mode<synchronous>, transform_indices = @transform_8, window_bounds = array<i64: 1, 128>}, {transform_indices = @transform_9, window_bounds = array<i64: 8, 128>}]} {
    %c0 = arith.constant 0 : index
    %c0_0 = arith.constant 0 : index
    %0 = vector.load %arg1[%c0, %c0_0] : memref<8x128xbf16, #tpu.memory_space<vmem>>, vector<8x128xbf16>
    %c0_1 = arith.constant 0 : index
    %c0_2 = arith.constant 0 : index
    %1 = vector.load %arg2[%c0_1, %c0_2] : memref<128x384xbf16, #tpu.memory_space<vmem>>, vector<128x384xbf16>
    %cst = arith.constant dense<0.000000e+00> : vector<8x384xf32>
    %2 = tpu.matmul %0, %1, %cst {dimension_numbers = #tpu.dot_dimension_numbers<[1], [0], [0], [1], [0, 0, 1, 1], [], []>} : vector<8x128xbf16>, vector<128x384xbf16>, vector<8x384xf32> -> vector<8x384xf32>
    %c0_3 = arith.constant 0 : index
    %c0_4 = arith.constant 0 : index
    %3 = vector.load %arg3[%c0_3, %c0_4] : memref<1x384xf32, #tpu.memory_space<vmem>>, vector<1x384xf32>
    %4 = vector.broadcast %3 : vector<1x384xf32> to vector<8x384xf32>
    %5 = arith.addf %2, %4 : vector<8x384xf32>
    %6 = vector.extract_strided_slice %5 {offsets = [0, 0], sizes = [8, 128], strides = [1, 1]} : vector<8x384xf32> to vector<8x128xf32>
    %7 = vector.extract_strided_slice %5 {offsets = [0, 128], sizes = [8, 16], strides = [1, 1]} : vector<8x384xf32> to vector<8x16xf32>
    %8 = vector.extract_strided_slice %5 {offsets = [0, 144], sizes = [8, 16], strides = [1, 1]} : vector<8x384xf32> to vector<8x16xf32>
    %9 = vector.extract_strided_slice %5 {offsets = [0, 160], sizes = [8, 16], strides = [1, 1]} : vector<8x384xf32> to vector<8x16xf32>
    %10 = vector.extract_strided_slice %5 {offsets = [0, 176], sizes = [8, 16], strides = [1, 1]} : vector<8x384xf32> to vector<8x16xf32>
    %11 = vector.extract_strided_slice %5 {offsets = [0, 192], sizes = [8, 16], strides = [1, 1]} : vector<8x384xf32> to vector<8x16xf32>
    %12 = vector.extract_strided_slice %5 {offsets = [0, 208], sizes = [8, 16], strides = [1, 1]} : vector<8x384xf32> to vector<8x16xf32>
    %13 = vector.extract_strided_slice %5 {offsets = [0, 224], sizes = [8, 16], strides = [1, 1]} : vector<8x384xf32> to vector<8x16xf32>
    %14 = vector.extract_strided_slice %5 {offsets = [0, 240], sizes = [8, 16], strides = [1, 1]} : vector<8x384xf32> to vector<8x16xf32>
    %15 = vector.extract_strided_slice %5 {offsets = [0, 256], sizes = [8, 16], strides = [1, 1]} : vector<8x384xf32> to vector<8x16xf32>
    %16 = vector.extract_strided_slice %5 {offsets = [0, 272], sizes = [8, 16], strides = [1, 1]} : vector<8x384xf32> to vector<8x16xf32>
    %17 = vector.extract_strided_slice %5 {offsets = [0, 288], sizes = [8, 16], strides = [1, 1]} : vector<8x384xf32> to vector<8x16xf32>
    %18 = vector.extract_strided_slice %5 {offsets = [0, 304], sizes = [8, 16], strides = [1, 1]} : vector<8x384xf32> to vector<8x16xf32>
    %19 = vector.extract_strided_slice %5 {offsets = [0, 320], sizes = [8, 16], strides = [1, 1]} : vector<8x384xf32> to vector<8x16xf32>
    %20 = vector.extract_strided_slice %5 {offsets = [0, 336], sizes = [8, 16], strides = [1, 1]} : vector<8x384xf32> to vector<8x16xf32>
    %21 = vector.extract_strided_slice %5 {offsets = [0, 352], sizes = [8, 16], strides = [1, 1]} : vector<8x384xf32> to vector<8x16xf32>
    %22 = vector.extract_strided_slice %5 {offsets = [0, 368], sizes = [8, 16], strides = [1, 1]} : vector<8x384xf32> to vector<8x16xf32>
    %23 = tpu.concatenate %7, %7, %7, %7, %7, %7, %7, %7 in 1 : vector<8x16xf32>, vector<8x16xf32>, vector<8x16xf32>, vector<8x16xf32>, vector<8x16xf32>, vector<8x16xf32>, vector<8x16xf32>, vector<8x16xf32> -> vector<8x128xf32>
    %24 = arith.mulf %6, %23 : vector<8x128xf32>
    %25 = vector.extract_strided_slice %24 {offsets = [0, 0], sizes = [8, 16], strides = [1, 1]} : vector<8x128xf32> to vector<8x16xf32>
    %cst_5 = arith.constant dense<0.000000e+00> : vector<8xf32>
    %26 = vector.multi_reduction <add>, %25, %cst_5 [1] : vector<8x16xf32> to vector<8xf32>
    %27 = vector.shape_cast %26 : vector<8xf32> to vector<8x1xf32>
    %28 = vector.extract_strided_slice %24 {offsets = [0, 16], sizes = [8, 16], strides = [1, 1]} : vector<8x128xf32> to vector<8x16xf32>
    %cst_6 = arith.constant dense<0.000000e+00> : vector<8xf32>
    %29 = vector.multi_reduction <add>, %28, %cst_6 [1] : vector<8x16xf32> to vector<8xf32>
    %30 = vector.shape_cast %29 : vector<8xf32> to vector<8x1xf32>
    %31 = vector.extract_strided_slice %24 {offsets = [0, 32], sizes = [8, 16], strides = [1, 1]} : vector<8x128xf32> to vector<8x16xf32>
    %cst_7 = arith.constant dense<0.000000e+00> : vector<8xf32>
    %32 = vector.multi_reduction <add>, %31, %cst_7 [1] : vector<8x16xf32> to vector<8xf32>
    %33 = vector.shape_cast %32 : vector<8xf32> to vector<8x1xf32>
    %34 = vector.extract_strided_slice %24 {offsets = [0, 48], sizes = [8, 16], strides = [1, 1]} : vector<8x128xf32> to vector<8x16xf32>
    %cst_8 = arith.constant dense<0.000000e+00> : vector<8xf32>
    %35 = vector.multi_reduction <add>, %34, %cst_8 [1] : vector<8x16xf32> to vector<8xf32>
    %36 = vector.shape_cast %35 : vector<8xf32> to vector<8x1xf32>
    %37 = vector.extract_strided_slice %24 {offsets = [0, 64], sizes = [8, 16], strides = [1, 1]} : vector<8x128xf32> to vector<8x16xf32>
    %cst_9 = arith.constant dense<0.000000e+00> : vector<8xf32>
    %38 = vector.multi_reduction <add>, %37, %cst_9 [1] : vector<8x16xf32> to vector<8xf32>
    %39 = vector.shape_cast %38 : vector<8xf32> to vector<8x1xf32>
    %40 = vector.extract_strided_slice %24 {offsets = [0, 80], sizes = [8, 16], strides = [1, 1]} : vector<8x128xf32> to vector<8x16xf32>
    %cst_10 = arith.constant dense<0.000000e+00> : vector<8xf32>
    %41 = vector.multi_reduction <add>, %40, %cst_10 [1] : vector<8x16xf32> to vector<8xf32>
    %42 = vector.shape_cast %41 : vector<8xf32> to vector<8x1xf32>
    %43 = vector.extract_strided_slice %24 {offsets = [0, 96], sizes = [8, 16], strides = [1, 1]} : vector<8x128xf32> to vector<8x16xf32>
    %cst_11 = arith.constant dense<0.000000e+00> : vector<8xf32>
    %44 = vector.multi_reduction <add>, %43, %cst_11 [1] : vector<8x16xf32> to vector<8xf32>
    %45 = vector.shape_cast %44 : vector<8xf32> to vector<8x1xf32>
    %46 = vector.extract_strided_slice %24 {offsets = [0, 112], sizes = [8, 16], strides = [1, 1]} : vector<8x128xf32> to vector<8x16xf32>
    %cst_12 = arith.constant dense<0.000000e+00> : vector<8xf32>
    %47 = vector.multi_reduction <add>, %46, %cst_12 [1] : vector<8x16xf32> to vector<8xf32>
    %48 = vector.shape_cast %47 : vector<8xf32> to vector<8x1xf32>
    %49 = tpu.concatenate %27, %30, %33, %36, %39, %42, %45, %48 in 1 : vector<8x1xf32>, vector<8x1xf32>, vector<8x1xf32>, vector<8x1xf32>, vector<8x1xf32>, vector<8x1xf32>, vector<8x1xf32>, vector<8x1xf32> -> vector<8x8xf32>
    %cst_13 = arith.constant dense<0xFF800000> : vector<8xf32>
    %50 = vector.multi_reduction <maximumf>, %49, %cst_13 [1] : vector<8x8xf32> to vector<8xf32>
    %51 = vector.shape_cast %50 : vector<8xf32> to vector<8x1xf32>
    %52 = vector.broadcast %51 : vector<8x1xf32> to vector<8x8xf32>
    %53 = arith.subf %49, %52 : vector<8x8xf32>
    %54 = math.exp %53 : vector<8x8xf32>
    %cst_14 = arith.constant dense<0.000000e+00> : vector<8xf32>
    %55 = vector.multi_reduction <add>, %54, %cst_14 [1] : vector<8x8xf32> to vector<8xf32>
    %56 = vector.shape_cast %55 : vector<8xf32> to vector<8x1xf32>
    %57 = tpu.reciprocal %56 {approx = true} : vector<8x1xf32> -> vector<8x1xf32>
    %58 = vector.broadcast %57 : vector<8x1xf32> to vector<8x8xf32>
    %59 = arith.mulf %54, %58 : vector<8x8xf32>
    %60 = vector.extract_strided_slice %59 {offsets = [0, 0], sizes = [8, 1], strides = [1, 1]} : vector<8x8xf32> to vector<8x1xf32>
    %61 = vector.broadcast %60 : vector<8x1xf32> to vector<8x16xf32>
    %62 = arith.mulf %61, %15 : vector<8x16xf32>
    %63 = vector.extract_strided_slice %59 {offsets = [0, 1], sizes = [8, 1], strides = [1, 1]} : vector<8x8xf32> to vector<8x1xf32>
    %64 = vector.broadcast %63 : vector<8x1xf32> to vector<8x16xf32>
    %65 = arith.mulf %64, %16 : vector<8x16xf32>
    %66 = arith.addf %62, %65 : vector<8x16xf32>
    %67 = vector.extract_strided_slice %59 {offsets = [0, 2], sizes = [8, 1], strides = [1, 1]} : vector<8x8xf32> to vector<8x1xf32>
    %68 = vector.broadcast %67 : vector<8x1xf32> to vector<8x16xf32>
    %69 = arith.mulf %68, %17 : vector<8x16xf32>
    %70 = arith.addf %66, %69 : vector<8x16xf32>
    %71 = vector.extract_strided_slice %59 {offsets = [0, 3], sizes = [8, 1], strides = [1, 1]} : vector<8x8xf32> to vector<8x1xf32>
    %72 = vector.broadcast %71 : vector<8x1xf32> to vector<8x16xf32>
    %73 = arith.mulf %72, %18 : vector<8x16xf32>
    %74 = arith.addf %70, %73 : vector<8x16xf32>
    %75 = vector.extract_strided_slice %59 {offsets = [0, 4], sizes = [8, 1], strides = [1, 1]} : vector<8x8xf32> to vector<8x1xf32>
    %76 = vector.broadcast %75 : vector<8x1xf32> to vector<8x16xf32>
    %77 = arith.mulf %76, %19 : vector<8x16xf32>
    %78 = arith.addf %74, %77 : vector<8x16xf32>
    %79 = vector.extract_strided_slice %59 {offsets = [0, 5], sizes = [8, 1], strides = [1, 1]} : vector<8x8xf32> to vector<8x1xf32>
    %80 = vector.broadcast %79 : vector<8x1xf32> to vector<8x16xf32>
    %81 = arith.mulf %80, %20 : vector<8x16xf32>
    %82 = arith.addf %78, %81 : vector<8x16xf32>
    %83 = vector.extract_strided_slice %59 {offsets = [0, 6], sizes = [8, 1], strides = [1, 1]} : vector<8x8xf32> to vector<8x1xf32>
    %84 = vector.broadcast %83 : vector<8x1xf32> to vector<8x16xf32>
    %85 = arith.mulf %84, %21 : vector<8x16xf32>
    %86 = arith.addf %82, %85 : vector<8x16xf32>
    %87 = vector.extract_strided_slice %59 {offsets = [0, 7], sizes = [8, 1], strides = [1, 1]} : vector<8x8xf32> to vector<8x1xf32>
    %88 = vector.broadcast %87 : vector<8x1xf32> to vector<8x16xf32>
    %89 = arith.mulf %88, %22 : vector<8x16xf32>
    %90 = arith.addf %86, %89 : vector<8x16xf32>
    %91 = tpu.concatenate %8, %8, %8, %8, %8, %8, %8, %8 in 1 : vector<8x16xf32>, vector<8x16xf32>, vector<8x16xf32>, vector<8x16xf32>, vector<8x16xf32>, vector<8x16xf32>, vector<8x16xf32>, vector<8x16xf32> -> vector<8x128xf32>
    %92 = arith.mulf %6, %91 : vector<8x128xf32>
    %93 = vector.extract_strided_slice %92 {offsets = [0, 0], sizes = [8, 16], strides = [1, 1]} : vector<8x128xf32> to vector<8x16xf32>
    %cst_15 = arith.constant dense<0.000000e+00> : vector<8xf32>
    %94 = vector.multi_reduction <add>, %93, %cst_15 [1] : vector<8x16xf32> to vector<8xf32>
    %95 = vector.shape_cast %94 : vector<8xf32> to vector<8x1xf32>
    %96 = vector.extract_strided_slice %92 {offsets = [0, 16], sizes = [8, 16], strides = [1, 1]} : vector<8x128xf32> to vector<8x16xf32>
    %cst_16 = arith.constant dense<0.000000e+00> : vector<8xf32>
    %97 = vector.multi_reduction <add>, %96, %cst_16 [1] : vector<8x16xf32> to vector<8xf32>
    %98 = vector.shape_cast %97 : vector<8xf32> to vector<8x1xf32>
    %99 = vector.extract_strided_slice %92 {offsets = [0, 32], sizes = [8, 16], strides = [1, 1]} : vector<8x128xf32> to vector<8x16xf32>
    %cst_17 = arith.constant dense<0.000000e+00> : vector<8xf32>
    %100 = vector.multi_reduction <add>, %99, %cst_17 [1] : vector<8x16xf32> to vector<8xf32>
    %101 = vector.shape_cast %100 : vector<8xf32> to vector<8x1xf32>
    %102 = vector.extract_strided_slice %92 {offsets = [0, 48], sizes = [8, 16], strides = [1, 1]} : vector<8x128xf32> to vector<8x16xf32>
    %cst_18 = arith.constant dense<0.000000e+00> : vector<8xf32>
    %103 = vector.multi_reduction <add>, %102, %cst_18 [1] : vector<8x16xf32> to vector<8xf32>
    %104 = vector.shape_cast %103 : vector<8xf32> to vector<8x1xf32>
    %105 = vector.extract_strided_slice %92 {offsets = [0, 64], sizes = [8, 16], strides = [1, 1]} : vector<8x128xf32> to vector<8x16xf32>
    %cst_19 = arith.constant dense<0.000000e+00> : vector<8xf32>
    %106 = vector.multi_reduction <add>, %105, %cst_19 [1] : vector<8x16xf32> to vector<8xf32>
    %107 = vector.shape_cast %106 : vector<8xf32> to vector<8x1xf32>
    %108 = vector.extract_strided_slice %92 {offsets = [0, 80], sizes = [8, 16], strides = [1, 1]} : vector<8x128xf32> to vector<8x16xf32>
    %cst_20 = arith.constant dense<0.000000e+00> : vector<8xf32>
    %109 = vector.multi_reduction <add>, %108, %cst_20 [1] : vector<8x16xf32> to vector<8xf32>
    %110 = vector.shape_cast %109 : vector<8xf32> to vector<8x1xf32>
    %111 = vector.extract_strided_slice %92 {offsets = [0, 96], sizes = [8, 16], strides = [1, 1]} : vector<8x128xf32> to vector<8x16xf32>
    %cst_21 = arith.constant dense<0.000000e+00> : vector<8xf32>
    %112 = vector.multi_reduction <add>, %111, %cst_21 [1] : vector<8x16xf32> to vector<8xf32>
    %113 = vector.shape_cast %112 : vector<8xf32> to vector<8x1xf32>
    %114 = vector.extract_strided_slice %92 {offsets = [0, 112], sizes = [8, 16], strides = [1, 1]} : vector<8x128xf32> to vector<8x16xf32>
    %cst_22 = arith.constant dense<0.000000e+00> : vector<8xf32>
    %115 = vector.multi_reduction <add>, %114, %cst_22 [1] : vector<8x16xf32> to vector<8xf32>
    %116 = vector.shape_cast %115 : vector<8xf32> to vector<8x1xf32>
    %117 = tpu.concatenate %95, %98, %101, %104, %107, %110, %113, %116 in 1 : vector<8x1xf32>, vector<8x1xf32>, vector<8x1xf32>, vector<8x1xf32>, vector<8x1xf32>, vector<8x1xf32>, vector<8x1xf32>, vector<8x1xf32> -> vector<8x8xf32>
    %cst_23 = arith.constant dense<0xFF800000> : vector<8xf32>
    %118 = vector.multi_reduction <maximumf>, %117, %cst_23 [1] : vector<8x8xf32> to vector<8xf32>
    %119 = vector.shape_cast %118 : vector<8xf32> to vector<8x1xf32>
    %120 = vector.broadcast %119 : vector<8x1xf32> to vector<8x8xf32>
    %121 = arith.subf %117, %120 : vector<8x8xf32>
    %122 = math.exp %121 : vector<8x8xf32>
    %cst_24 = arith.constant dense<0.000000e+00> : vector<8xf32>
    %123 = vector.multi_reduction <add>, %122, %cst_24 [1] : vector<8x8xf32> to vector<8xf32>
    %124 = vector.shape_cast %123 : vector<8xf32> to vector<8x1xf32>
    %125 = tpu.reciprocal %124 {approx = true} : vector<8x1xf32> -> vector<8x1xf32>
    %126 = vector.broadcast %125 : vector<8x1xf32> to vector<8x8xf32>
    %127 = arith.mulf %122, %126 : vector<8x8xf32>
    %128 = vector.extract_strided_slice %127 {offsets = [0, 0], sizes = [8, 1], strides = [1, 1]} : vector<8x8xf32> to vector<8x1xf32>
    %129 = vector.broadcast %128 : vector<8x1xf32> to vector<8x16xf32>
    %130 = arith.mulf %129, %15 : vector<8x16xf32>
    %131 = vector.extract_strided_slice %127 {offsets = [0, 1], sizes = [8, 1], strides = [1, 1]} : vector<8x8xf32> to vector<8x1xf32>
    %132 = vector.broadcast %131 : vector<8x1xf32> to vector<8x16xf32>
    %133 = arith.mulf %132, %16 : vector<8x16xf32>
    %134 = arith.addf %130, %133 : vector<8x16xf32>
    %135 = vector.extract_strided_slice %127 {offsets = [0, 2], sizes = [8, 1], strides = [1, 1]} : vector<8x8xf32> to vector<8x1xf32>
    %136 = vector.broadcast %135 : vector<8x1xf32> to vector<8x16xf32>
    %137 = arith.mulf %136, %17 : vector<8x16xf32>
    %138 = arith.addf %134, %137 : vector<8x16xf32>
    %139 = vector.extract_strided_slice %127 {offsets = [0, 3], sizes = [8, 1], strides = [1, 1]} : vector<8x8xf32> to vector<8x1xf32>
    %140 = vector.broadcast %139 : vector<8x1xf32> to vector<8x16xf32>
    %141 = arith.mulf %140, %18 : vector<8x16xf32>
    %142 = arith.addf %138, %141 : vector<8x16xf32>
    %143 = vector.extract_strided_slice %127 {offsets = [0, 4], sizes = [8, 1], strides = [1, 1]} : vector<8x8xf32> to vector<8x1xf32>
    %144 = vector.broadcast %143 : vector<8x1xf32> to vector<8x16xf32>
    %145 = arith.mulf %144, %19 : vector<8x16xf32>
    %146 = arith.addf %142, %145 : vector<8x16xf32>
    %147 = vector.extract_strided_slice %127 {offsets = [0, 5], sizes = [8, 1], strides = [1, 1]} : vector<8x8xf32> to vector<8x1xf32>
    %148 = vector.broadcast %147 : vector<8x1xf32> to vector<8x16xf32>
    %149 = arith.mulf %148, %20 : vector<8x16xf32>
    %150 = arith.addf %146, %149 : vector<8x16xf32>
    %151 = vector.extract_strided_slice %127 {offsets = [0, 6], sizes = [8, 1], strides = [1, 1]} : vector<8x8xf32> to vector<8x1xf32>
    %152 = vector.broadcast %151 : vector<8x1xf32> to vector<8x16xf32>
    %153 = arith.mulf %152, %21 : vector<8x16xf32>
    %154 = arith.addf %150, %153 : vector<8x16xf32>
    %155 = vector.extract_strided_slice %127 {offsets = [0, 7], sizes = [8, 1], strides = [1, 1]} : vector<8x8xf32> to vector<8x1xf32>
    %156 = vector.broadcast %155 : vector<8x1xf32> to vector<8x16xf32>
    %157 = arith.mulf %156, %22 : vector<8x16xf32>
    %158 = arith.addf %154, %157 : vector<8x16xf32>
    %159 = tpu.concatenate %9, %9, %9, %9, %9, %9, %9, %9 in 1 : vector<8x16xf32>, vector<8x16xf32>, vector<8x16xf32>, vector<8x16xf32>, vector<8x16xf32>, vector<8x16xf32>, vector<8x16xf32>, vector<8x16xf32> -> vector<8x128xf32>
    %160 = arith.mulf %6, %159 : vector<8x128xf32>
    %161 = vector.extract_strided_slice %160 {offsets = [0, 0], sizes = [8, 16], strides = [1, 1]} : vector<8x128xf32> to vector<8x16xf32>
    %cst_25 = arith.constant dense<0.000000e+00> : vector<8xf32>
    %162 = vector.multi_reduction <add>, %161, %cst_25 [1] : vector<8x16xf32> to vector<8xf32>
    %163 = vector.shape_cast %162 : vector<8xf32> to vector<8x1xf32>
    %164 = vector.extract_strided_slice %160 {offsets = [0, 16], sizes = [8, 16], strides = [1, 1]} : vector<8x128xf32> to vector<8x16xf32>
    %cst_26 = arith.constant dense<0.000000e+00> : vector<8xf32>
    %165 = vector.multi_reduction <add>, %164, %cst_26 [1] : vector<8x16xf32> to vector<8xf32>
    %166 = vector.shape_cast %165 : vector<8xf32> to vector<8x1xf32>
    %167 = vector.extract_strided_slice %160 {offsets = [0, 32], sizes = [8, 16], strides = [1, 1]} : vector<8x128xf32> to vector<8x16xf32>
    %cst_27 = arith.constant dense<0.000000e+00> : vector<8xf32>
    %168 = vector.multi_reduction <add>, %167, %cst_27 [1] : vector<8x16xf32> to vector<8xf32>
    %169 = vector.shape_cast %168 : vector<8xf32> to vector<8x1xf32>
    %170 = vector.extract_strided_slice %160 {offsets = [0, 48], sizes = [8, 16], strides = [1, 1]} : vector<8x128xf32> to vector<8x16xf32>
    %cst_28 = arith.constant dense<0.000000e+00> : vector<8xf32>
    %171 = vector.multi_reduction <add>, %170, %cst_28 [1] : vector<8x16xf32> to vector<8xf32>
    %172 = vector.shape_cast %171 : vector<8xf32> to vector<8x1xf32>
    %173 = vector.extract_strided_slice %160 {offsets = [0, 64], sizes = [8, 16], strides = [1, 1]} : vector<8x128xf32> to vector<8x16xf32>
    %cst_29 = arith.constant dense<0.000000e+00> : vector<8xf32>
    %174 = vector.multi_reduction <add>, %173, %cst_29 [1] : vector<8x16xf32> to vector<8xf32>
    %175 = vector.shape_cast %174 : vector<8xf32> to vector<8x1xf32>
    %176 = vector.extract_strided_slice %160 {offsets = [0, 80], sizes = [8, 16], strides = [1, 1]} : vector<8x128xf32> to vector<8x16xf32>
    %cst_30 = arith.constant dense<0.000000e+00> : vector<8xf32>
    %177 = vector.multi_reduction <add>, %176, %cst_30 [1] : vector<8x16xf32> to vector<8xf32>
    %178 = vector.shape_cast %177 : vector<8xf32> to vector<8x1xf32>
    %179 = vector.extract_strided_slice %160 {offsets = [0, 96], sizes = [8, 16], strides = [1, 1]} : vector<8x128xf32> to vector<8x16xf32>
    %cst_31 = arith.constant dense<0.000000e+00> : vector<8xf32>
    %180 = vector.multi_reduction <add>, %179, %cst_31 [1] : vector<8x16xf32> to vector<8xf32>
    %181 = vector.shape_cast %180 : vector<8xf32> to vector<8x1xf32>
    %182 = vector.extract_strided_slice %160 {offsets = [0, 112], sizes = [8, 16], strides = [1, 1]} : vector<8x128xf32> to vector<8x16xf32>
    %cst_32 = arith.constant dense<0.000000e+00> : vector<8xf32>
    %183 = vector.multi_reduction <add>, %182, %cst_32 [1] : vector<8x16xf32> to vector<8xf32>
    %184 = vector.shape_cast %183 : vector<8xf32> to vector<8x1xf32>
    %185 = tpu.concatenate %163, %166, %169, %172, %175, %178, %181, %184 in 1 : vector<8x1xf32>, vector<8x1xf32>, vector<8x1xf32>, vector<8x1xf32>, vector<8x1xf32>, vector<8x1xf32>, vector<8x1xf32>, vector<8x1xf32> -> vector<8x8xf32>
    %cst_33 = arith.constant dense<0xFF800000> : vector<8xf32>
    %186 = vector.multi_reduction <maximumf>, %185, %cst_33 [1] : vector<8x8xf32> to vector<8xf32>
    %187 = vector.shape_cast %186 : vector<8xf32> to vector<8x1xf32>
    %188 = vector.broadcast %187 : vector<8x1xf32> to vector<8x8xf32>
    %189 = arith.subf %185, %188 : vector<8x8xf32>
    %190 = math.exp %189 : vector<8x8xf32>
    %cst_34 = arith.constant dense<0.000000e+00> : vector<8xf32>
    %191 = vector.multi_reduction <add>, %190, %cst_34 [1] : vector<8x8xf32> to vector<8xf32>
    %192 = vector.shape_cast %191 : vector<8xf32> to vector<8x1xf32>
    %193 = tpu.reciprocal %192 {approx = true} : vector<8x1xf32> -> vector<8x1xf32>
    %194 = vector.broadcast %193 : vector<8x1xf32> to vector<8x8xf32>
    %195 = arith.mulf %190, %194 : vector<8x8xf32>
    %196 = vector.extract_strided_slice %195 {offsets = [0, 0], sizes = [8, 1], strides = [1, 1]} : vector<8x8xf32> to vector<8x1xf32>
    %197 = vector.broadcast %196 : vector<8x1xf32> to vector<8x16xf32>
    %198 = arith.mulf %197, %15 : vector<8x16xf32>
    %199 = vector.extract_strided_slice %195 {offsets = [0, 1], sizes = [8, 1], strides = [1, 1]} : vector<8x8xf32> to vector<8x1xf32>
    %200 = vector.broadcast %199 : vector<8x1xf32> to vector<8x16xf32>
    %201 = arith.mulf %200, %16 : vector<8x16xf32>
    %202 = arith.addf %198, %201 : vector<8x16xf32>
    %203 = vector.extract_strided_slice %195 {offsets = [0, 2], sizes = [8, 1], strides = [1, 1]} : vector<8x8xf32> to vector<8x1xf32>
    %204 = vector.broadcast %203 : vector<8x1xf32> to vector<8x16xf32>
    %205 = arith.mulf %204, %17 : vector<8x16xf32>
    %206 = arith.addf %202, %205 : vector<8x16xf32>
    %207 = vector.extract_strided_slice %195 {offsets = [0, 3], sizes = [8, 1], strides = [1, 1]} : vector<8x8xf32> to vector<8x1xf32>
    %208 = vector.broadcast %207 : vector<8x1xf32> to vector<8x16xf32>
    %209 = arith.mulf %208, %18 : vector<8x16xf32>
    %210 = arith.addf %206, %209 : vector<8x16xf32>
    %211 = vector.extract_strided_slice %195 {offsets = [0, 4], sizes = [8, 1], strides = [1, 1]} : vector<8x8xf32> to vector<8x1xf32>
    %212 = vector.broadcast %211 : vector<8x1xf32> to vector<8x16xf32>
    %213 = arith.mulf %212, %19 : vector<8x16xf32>
    %214 = arith.addf %210, %213 : vector<8x16xf32>
    %215 = vector.extract_strided_slice %195 {offsets = [0, 5], sizes = [8, 1], strides = [1, 1]} : vector<8x8xf32> to vector<8x1xf32>
    %216 = vector.broadcast %215 : vector<8x1xf32> to vector<8x16xf32>
    %217 = arith.mulf %216, %20 : vector<8x16xf32>
    %218 = arith.addf %214, %217 : vector<8x16xf32>
    %219 = vector.extract_strided_slice %195 {offsets = [0, 6], sizes = [8, 1], strides = [1, 1]} : vector<8x8xf32> to vector<8x1xf32>
    %220 = vector.broadcast %219 : vector<8x1xf32> to vector<8x16xf32>
    %221 = arith.mulf %220, %21 : vector<8x16xf32>
    %222 = arith.addf %218, %221 : vector<8x16xf32>
    %223 = vector.extract_strided_slice %195 {offsets = [0, 7], sizes = [8, 1], strides = [1, 1]} : vector<8x8xf32> to vector<8x1xf32>
    %224 = vector.broadcast %223 : vector<8x1xf32> to vector<8x16xf32>
    %225 = arith.mulf %224, %22 : vector<8x16xf32>
    %226 = arith.addf %222, %225 : vector<8x16xf32>
    %227 = tpu.concatenate %10, %10, %10, %10, %10, %10, %10, %10 in 1 : vector<8x16xf32>, vector<8x16xf32>, vector<8x16xf32>, vector<8x16xf32>, vector<8x16xf32>, vector<8x16xf32>, vector<8x16xf32>, vector<8x16xf32> -> vector<8x128xf32>
    %228 = arith.mulf %6, %227 : vector<8x128xf32>
    %229 = vector.extract_strided_slice %228 {offsets = [0, 0], sizes = [8, 16], strides = [1, 1]} : vector<8x128xf32> to vector<8x16xf32>
    %cst_35 = arith.constant dense<0.000000e+00> : vector<8xf32>
    %230 = vector.multi_reduction <add>, %229, %cst_35 [1] : vector<8x16xf32> to vector<8xf32>
    %231 = vector.shape_cast %230 : vector<8xf32> to vector<8x1xf32>
    %232 = vector.extract_strided_slice %228 {offsets = [0, 16], sizes = [8, 16], strides = [1, 1]} : vector<8x128xf32> to vector<8x16xf32>
    %cst_36 = arith.constant dense<0.000000e+00> : vector<8xf32>
    %233 = vector.multi_reduction <add>, %232, %cst_36 [1] : vector<8x16xf32> to vector<8xf32>
    %234 = vector.shape_cast %233 : vector<8xf32> to vector<8x1xf32>
    %235 = vector.extract_strided_slice %228 {offsets = [0, 32], sizes = [8, 16], strides = [1, 1]} : vector<8x128xf32> to vector<8x16xf32>
    %cst_37 = arith.constant dense<0.000000e+00> : vector<8xf32>
    %236 = vector.multi_reduction <add>, %235, %cst_37 [1] : vector<8x16xf32> to vector<8xf32>
    %237 = vector.shape_cast %236 : vector<8xf32> to vector<8x1xf32>
    %238 = vector.extract_strided_slice %228 {offsets = [0, 48], sizes = [8, 16], strides = [1, 1]} : vector<8x128xf32> to vector<8x16xf32>
    %cst_38 = arith.constant dense<0.000000e+00> : vector<8xf32>
    %239 = vector.multi_reduction <add>, %238, %cst_38 [1] : vector<8x16xf32> to vector<8xf32>
    %240 = vector.shape_cast %239 : vector<8xf32> to vector<8x1xf32>
    %241 = vector.extract_strided_slice %228 {offsets = [0, 64], sizes = [8, 16], strides = [1, 1]} : vector<8x128xf32> to vector<8x16xf32>
    %cst_39 = arith.constant dense<0.000000e+00> : vector<8xf32>
    %242 = vector.multi_reduction <add>, %241, %cst_39 [1] : vector<8x16xf32> to vector<8xf32>
    %243 = vector.shape_cast %242 : vector<8xf32> to vector<8x1xf32>
    %244 = vector.extract_strided_slice %228 {offsets = [0, 80], sizes = [8, 16], strides = [1, 1]} : vector<8x128xf32> to vector<8x16xf32>
    %cst_40 = arith.constant dense<0.000000e+00> : vector<8xf32>
    %245 = vector.multi_reduction <add>, %244, %cst_40 [1] : vector<8x16xf32> to vector<8xf32>
    %246 = vector.shape_cast %245 : vector<8xf32> to vector<8x1xf32>
    %247 = vector.extract_strided_slice %228 {offsets = [0, 96], sizes = [8, 16], strides = [1, 1]} : vector<8x128xf32> to vector<8x16xf32>
    %cst_41 = arith.constant dense<0.000000e+00> : vector<8xf32>
    %248 = vector.multi_reduction <add>, %247, %cst_41 [1] : vector<8x16xf32> to vector<8xf32>
    %249 = vector.shape_cast %248 : vector<8xf32> to vector<8x1xf32>
    %250 = vector.extract_strided_slice %228 {offsets = [0, 112], sizes = [8, 16], strides = [1, 1]} : vector<8x128xf32> to vector<8x16xf32>
    %cst_42 = arith.constant dense<0.000000e+00> : vector<8xf32>
    %251 = vector.multi_reduction <add>, %250, %cst_42 [1] : vector<8x16xf32> to vector<8xf32>
    %252 = vector.shape_cast %251 : vector<8xf32> to vector<8x1xf32>
    %253 = tpu.concatenate %231, %234, %237, %240, %243, %246, %249, %252 in 1 : vector<8x1xf32>, vector<8x1xf32>, vector<8x1xf32>, vector<8x1xf32>, vector<8x1xf32>, vector<8x1xf32>, vector<8x1xf32>, vector<8x1xf32> -> vector<8x8xf32>
    %cst_43 = arith.constant dense<0xFF800000> : vector<8xf32>
    %254 = vector.multi_reduction <maximumf>, %253, %cst_43 [1] : vector<8x8xf32> to vector<8xf32>
    %255 = vector.shape_cast %254 : vector<8xf32> to vector<8x1xf32>
    %256 = vector.broadcast %255 : vector<8x1xf32> to vector<8x8xf32>
    %257 = arith.subf %253, %256 : vector<8x8xf32>
    %258 = math.exp %257 : vector<8x8xf32>
    %cst_44 = arith.constant dense<0.000000e+00> : vector<8xf32>
    %259 = vector.multi_reduction <add>, %258, %cst_44 [1] : vector<8x8xf32> to vector<8xf32>
    %260 = vector.shape_cast %259 : vector<8xf32> to vector<8x1xf32>
    %261 = tpu.reciprocal %260 {approx = true} : vector<8x1xf32> -> vector<8x1xf32>
    %262 = vector.broadcast %261 : vector<8x1xf32> to vector<8x8xf32>
    %263 = arith.mulf %258, %262 : vector<8x8xf32>
    %264 = vector.extract_strided_slice %263 {offsets = [0, 0], sizes = [8, 1], strides = [1, 1]} : vector<8x8xf32> to vector<8x1xf32>
    %265 = vector.broadcast %264 : vector<8x1xf32> to vector<8x16xf32>
    %266 = arith.mulf %265, %15 : vector<8x16xf32>
    %267 = vector.extract_strided_slice %263 {offsets = [0, 1], sizes = [8, 1], strides = [1, 1]} : vector<8x8xf32> to vector<8x1xf32>
    %268 = vector.broadcast %267 : vector<8x1xf32> to vector<8x16xf32>
    %269 = arith.mulf %268, %16 : vector<8x16xf32>
    %270 = arith.addf %266, %269 : vector<8x16xf32>
    %271 = vector.extract_strided_slice %263 {offsets = [0, 2], sizes = [8, 1], strides = [1, 1]} : vector<8x8xf32> to vector<8x1xf32>
    %272 = vector.broadcast %271 : vector<8x1xf32> to vector<8x16xf32>
    %273 = arith.mulf %272, %17 : vector<8x16xf32>
    %274 = arith.addf %270, %273 : vector<8x16xf32>
    %275 = vector.extract_strided_slice %263 {offsets = [0, 3], sizes = [8, 1], strides = [1, 1]} : vector<8x8xf32> to vector<8x1xf32>
    %276 = vector.broadcast %275 : vector<8x1xf32> to vector<8x16xf32>
    %277 = arith.mulf %276, %18 : vector<8x16xf32>
    %278 = arith.addf %274, %277 : vector<8x16xf32>
    %279 = vector.extract_strided_slice %263 {offsets = [0, 4], sizes = [8, 1], strides = [1, 1]} : vector<8x8xf32> to vector<8x1xf32>
    %280 = vector.broadcast %279 : vector<8x1xf32> to vector<8x16xf32>
    %281 = arith.mulf %280, %19 : vector<8x16xf32>
    %282 = arith.addf %278, %281 : vector<8x16xf32>
    %283 = vector.extract_strided_slice %263 {offsets = [0, 5], sizes = [8, 1], strides = [1, 1]} : vector<8x8xf32> to vector<8x1xf32>
    %284 = vector.broadcast %283 : vector<8x1xf32> to vector<8x16xf32>
    %285 = arith.mulf %284, %20 : vector<8x16xf32>
    %286 = arith.addf %282, %285 : vector<8x16xf32>
    %287 = vector.extract_strided_slice %263 {offsets = [0, 6], sizes = [8, 1], strides = [1, 1]} : vector<8x8xf32> to vector<8x1xf32>
    %288 = vector.broadcast %287 : vector<8x1xf32> to vector<8x16xf32>
    %289 = arith.mulf %288, %21 : vector<8x16xf32>
    %290 = arith.addf %286, %289 : vector<8x16xf32>
    %291 = vector.extract_strided_slice %263 {offsets = [0, 7], sizes = [8, 1], strides = [1, 1]} : vector<8x8xf32> to vector<8x1xf32>
    %292 = vector.broadcast %291 : vector<8x1xf32> to vector<8x16xf32>
    %293 = arith.mulf %292, %22 : vector<8x16xf32>
    %294 = arith.addf %290, %293 : vector<8x16xf32>
    %295 = tpu.concatenate %11, %11, %11, %11, %11, %11, %11, %11 in 1 : vector<8x16xf32>, vector<8x16xf32>, vector<8x16xf32>, vector<8x16xf32>, vector<8x16xf32>, vector<8x16xf32>, vector<8x16xf32>, vector<8x16xf32> -> vector<8x128xf32>
    %296 = arith.mulf %6, %295 : vector<8x128xf32>
    %297 = vector.extract_strided_slice %296 {offsets = [0, 0], sizes = [8, 16], strides = [1, 1]} : vector<8x128xf32> to vector<8x16xf32>
    %cst_45 = arith.constant dense<0.000000e+00> : vector<8xf32>
    %298 = vector.multi_reduction <add>, %297, %cst_45 [1] : vector<8x16xf32> to vector<8xf32>
    %299 = vector.shape_cast %298 : vector<8xf32> to vector<8x1xf32>
    %300 = vector.extract_strided_slice %296 {offsets = [0, 16], sizes = [8, 16], strides = [1, 1]} : vector<8x128xf32> to vector<8x16xf32>
    %cst_46 = arith.constant dense<0.000000e+00> : vector<8xf32>
    %301 = vector.multi_reduction <add>, %300, %cst_46 [1] : vector<8x16xf32> to vector<8xf32>
    %302 = vector.shape_cast %301 : vector<8xf32> to vector<8x1xf32>
    %303 = vector.extract_strided_slice %296 {offsets = [0, 32], sizes = [8, 16], strides = [1, 1]} : vector<8x128xf32> to vector<8x16xf32>
    %cst_47 = arith.constant dense<0.000000e+00> : vector<8xf32>
    %304 = vector.multi_reduction <add>, %303, %cst_47 [1] : vector<8x16xf32> to vector<8xf32>
    %305 = vector.shape_cast %304 : vector<8xf32> to vector<8x1xf32>
    %306 = vector.extract_strided_slice %296 {offsets = [0, 48], sizes = [8, 16], strides = [1, 1]} : vector<8x128xf32> to vector<8x16xf32>
    %cst_48 = arith.constant dense<0.000000e+00> : vector<8xf32>
    %307 = vector.multi_reduction <add>, %306, %cst_48 [1] : vector<8x16xf32> to vector<8xf32>
    %308 = vector.shape_cast %307 : vector<8xf32> to vector<8x1xf32>
    %309 = vector.extract_strided_slice %296 {offsets = [0, 64], sizes = [8, 16], strides = [1, 1]} : vector<8x128xf32> to vector<8x16xf32>
    %cst_49 = arith.constant dense<0.000000e+00> : vector<8xf32>
    %310 = vector.multi_reduction <add>, %309, %cst_49 [1] : vector<8x16xf32> to vector<8xf32>
    %311 = vector.shape_cast %310 : vector<8xf32> to vector<8x1xf32>
    %312 = vector.extract_strided_slice %296 {offsets = [0, 80], sizes = [8, 16], strides = [1, 1]} : vector<8x128xf32> to vector<8x16xf32>
    %cst_50 = arith.constant dense<0.000000e+00> : vector<8xf32>
    %313 = vector.multi_reduction <add>, %312, %cst_50 [1] : vector<8x16xf32> to vector<8xf32>
    %314 = vector.shape_cast %313 : vector<8xf32> to vector<8x1xf32>
    %315 = vector.extract_strided_slice %296 {offsets = [0, 96], sizes = [8, 16], strides = [1, 1]} : vector<8x128xf32> to vector<8x16xf32>
    %cst_51 = arith.constant dense<0.000000e+00> : vector<8xf32>
    %316 = vector.multi_reduction <add>, %315, %cst_51 [1] : vector<8x16xf32> to vector<8xf32>
    %317 = vector.shape_cast %316 : vector<8xf32> to vector<8x1xf32>
    %318 = vector.extract_strided_slice %296 {offsets = [0, 112], sizes = [8, 16], strides = [1, 1]} : vector<8x128xf32> to vector<8x16xf32>
    %cst_52 = arith.constant dense<0.000000e+00> : vector<8xf32>
    %319 = vector.multi_reduction <add>, %318, %cst_52 [1] : vector<8x16xf32> to vector<8xf32>
    %320 = vector.shape_cast %319 : vector<8xf32> to vector<8x1xf32>
    %321 = tpu.concatenate %299, %302, %305, %308, %311, %314, %317, %320 in 1 : vector<8x1xf32>, vector<8x1xf32>, vector<8x1xf32>, vector<8x1xf32>, vector<8x1xf32>, vector<8x1xf32>, vector<8x1xf32>, vector<8x1xf32> -> vector<8x8xf32>
    %cst_53 = arith.constant dense<0xFF800000> : vector<8xf32>
    %322 = vector.multi_reduction <maximumf>, %321, %cst_53 [1] : vector<8x8xf32> to vector<8xf32>
    %323 = vector.shape_cast %322 : vector<8xf32> to vector<8x1xf32>
    %324 = vector.broadcast %323 : vector<8x1xf32> to vector<8x8xf32>
    %325 = arith.subf %321, %324 : vector<8x8xf32>
    %326 = math.exp %325 : vector<8x8xf32>
    %cst_54 = arith.constant dense<0.000000e+00> : vector<8xf32>
    %327 = vector.multi_reduction <add>, %326, %cst_54 [1] : vector<8x8xf32> to vector<8xf32>
    %328 = vector.shape_cast %327 : vector<8xf32> to vector<8x1xf32>
    %329 = tpu.reciprocal %328 {approx = true} : vector<8x1xf32> -> vector<8x1xf32>
    %330 = vector.broadcast %329 : vector<8x1xf32> to vector<8x8xf32>
    %331 = arith.mulf %326, %330 : vector<8x8xf32>
    %332 = vector.extract_strided_slice %331 {offsets = [0, 0], sizes = [8, 1], strides = [1, 1]} : vector<8x8xf32> to vector<8x1xf32>
    %333 = vector.broadcast %332 : vector<8x1xf32> to vector<8x16xf32>
    %334 = arith.mulf %333, %15 : vector<8x16xf32>
    %335 = vector.extract_strided_slice %331 {offsets = [0, 1], sizes = [8, 1], strides = [1, 1]} : vector<8x8xf32> to vector<8x1xf32>
    %336 = vector.broadcast %335 : vector<8x1xf32> to vector<8x16xf32>
    %337 = arith.mulf %336, %16 : vector<8x16xf32>
    %338 = arith.addf %334, %337 : vector<8x16xf32>
    %339 = vector.extract_strided_slice %331 {offsets = [0, 2], sizes = [8, 1], strides = [1, 1]} : vector<8x8xf32> to vector<8x1xf32>
    %340 = vector.broadcast %339 : vector<8x1xf32> to vector<8x16xf32>
    %341 = arith.mulf %340, %17 : vector<8x16xf32>
    %342 = arith.addf %338, %341 : vector<8x16xf32>
    %343 = vector.extract_strided_slice %331 {offsets = [0, 3], sizes = [8, 1], strides = [1, 1]} : vector<8x8xf32> to vector<8x1xf32>
    %344 = vector.broadcast %343 : vector<8x1xf32> to vector<8x16xf32>
    %345 = arith.mulf %344, %18 : vector<8x16xf32>
    %346 = arith.addf %342, %345 : vector<8x16xf32>
    %347 = vector.extract_strided_slice %331 {offsets = [0, 4], sizes = [8, 1], strides = [1, 1]} : vector<8x8xf32> to vector<8x1xf32>
    %348 = vector.broadcast %347 : vector<8x1xf32> to vector<8x16xf32>
    %349 = arith.mulf %348, %19 : vector<8x16xf32>
    %350 = arith.addf %346, %349 : vector<8x16xf32>
    %351 = vector.extract_strided_slice %331 {offsets = [0, 5], sizes = [8, 1], strides = [1, 1]} : vector<8x8xf32> to vector<8x1xf32>
    %352 = vector.broadcast %351 : vector<8x1xf32> to vector<8x16xf32>
    %353 = arith.mulf %352, %20 : vector<8x16xf32>
    %354 = arith.addf %350, %353 : vector<8x16xf32>
    %355 = vector.extract_strided_slice %331 {offsets = [0, 6], sizes = [8, 1], strides = [1, 1]} : vector<8x8xf32> to vector<8x1xf32>
    %356 = vector.broadcast %355 : vector<8x1xf32> to vector<8x16xf32>
    %357 = arith.mulf %356, %21 : vector<8x16xf32>
    %358 = arith.addf %354, %357 : vector<8x16xf32>
    %359 = vector.extract_strided_slice %331 {offsets = [0, 7], sizes = [8, 1], strides = [1, 1]} : vector<8x8xf32> to vector<8x1xf32>
    %360 = vector.broadcast %359 : vector<8x1xf32> to vector<8x16xf32>
    %361 = arith.mulf %360, %22 : vector<8x16xf32>
    %362 = arith.addf %358, %361 : vector<8x16xf32>
    %363 = tpu.concatenate %12, %12, %12, %12, %12, %12, %12, %12 in 1 : vector<8x16xf32>, vector<8x16xf32>, vector<8x16xf32>, vector<8x16xf32>, vector<8x16xf32>, vector<8x16xf32>, vector<8x16xf32>, vector<8x16xf32> -> vector<8x128xf32>
    %364 = arith.mulf %6, %363 : vector<8x128xf32>
    %365 = vector.extract_strided_slice %364 {offsets = [0, 0], sizes = [8, 16], strides = [1, 1]} : vector<8x128xf32> to vector<8x16xf32>
    %cst_55 = arith.constant dense<0.000000e+00> : vector<8xf32>
    %366 = vector.multi_reduction <add>, %365, %cst_55 [1] : vector<8x16xf32> to vector<8xf32>
    %367 = vector.shape_cast %366 : vector<8xf32> to vector<8x1xf32>
    %368 = vector.extract_strided_slice %364 {offsets = [0, 16], sizes = [8, 16], strides = [1, 1]} : vector<8x128xf32> to vector<8x16xf32>
    %cst_56 = arith.constant dense<0.000000e+00> : vector<8xf32>
    %369 = vector.multi_reduction <add>, %368, %cst_56 [1] : vector<8x16xf32> to vector<8xf32>
    %370 = vector.shape_cast %369 : vector<8xf32> to vector<8x1xf32>
    %371 = vector.extract_strided_slice %364 {offsets = [0, 32], sizes = [8, 16], strides = [1, 1]} : vector<8x128xf32> to vector<8x16xf32>
    %cst_57 = arith.constant dense<0.000000e+00> : vector<8xf32>
    %372 = vector.multi_reduction <add>, %371, %cst_57 [1] : vector<8x16xf32> to vector<8xf32>
    %373 = vector.shape_cast %372 : vector<8xf32> to vector<8x1xf32>
    %374 = vector.extract_strided_slice %364 {offsets = [0, 48], sizes = [8, 16], strides = [1, 1]} : vector<8x128xf32> to vector<8x16xf32>
    %cst_58 = arith.constant dense<0.000000e+00> : vector<8xf32>
    %375 = vector.multi_reduction <add>, %374, %cst_58 [1] : vector<8x16xf32> to vector<8xf32>
    %376 = vector.shape_cast %375 : vector<8xf32> to vector<8x1xf32>
    %377 = vector.extract_strided_slice %364 {offsets = [0, 64], sizes = [8, 16], strides = [1, 1]} : vector<8x128xf32> to vector<8x16xf32>
    %cst_59 = arith.constant dense<0.000000e+00> : vector<8xf32>
    %378 = vector.multi_reduction <add>, %377, %cst_59 [1] : vector<8x16xf32> to vector<8xf32>
    %379 = vector.shape_cast %378 : vector<8xf32> to vector<8x1xf32>
    %380 = vector.extract_strided_slice %364 {offsets = [0, 80], sizes = [8, 16], strides = [1, 1]} : vector<8x128xf32> to vector<8x16xf32>
    %cst_60 = arith.constant dense<0.000000e+00> : vector<8xf32>
    %381 = vector.multi_reduction <add>, %380, %cst_60 [1] : vector<8x16xf32> to vector<8xf32>
    %382 = vector.shape_cast %381 : vector<8xf32> to vector<8x1xf32>
    %383 = vector.extract_strided_slice %364 {offsets = [0, 96], sizes = [8, 16], strides = [1, 1]} : vector<8x128xf32> to vector<8x16xf32>
    %cst_61 = arith.constant dense<0.000000e+00> : vector<8xf32>
    %384 = vector.multi_reduction <add>, %383, %cst_61 [1] : vector<8x16xf32> to vector<8xf32>
    %385 = vector.shape_cast %384 : vector<8xf32> to vector<8x1xf32>
    %386 = vector.extract_strided_slice %364 {offsets = [0, 112], sizes = [8, 16], strides = [1, 1]} : vector<8x128xf32> to vector<8x16xf32>
    %cst_62 = arith.constant dense<0.000000e+00> : vector<8xf32>
    %387 = vector.multi_reduction <add>, %386, %cst_62 [1] : vector<8x16xf32> to vector<8xf32>
    %388 = vector.shape_cast %387 : vector<8xf32> to vector<8x1xf32>
    %389 = tpu.concatenate %367, %370, %373, %376, %379, %382, %385, %388 in 1 : vector<8x1xf32>, vector<8x1xf32>, vector<8x1xf32>, vector<8x1xf32>, vector<8x1xf32>, vector<8x1xf32>, vector<8x1xf32>, vector<8x1xf32> -> vector<8x8xf32>
    %cst_63 = arith.constant dense<0xFF800000> : vector<8xf32>
    %390 = vector.multi_reduction <maximumf>, %389, %cst_63 [1] : vector<8x8xf32> to vector<8xf32>
    %391 = vector.shape_cast %390 : vector<8xf32> to vector<8x1xf32>
    %392 = vector.broadcast %391 : vector<8x1xf32> to vector<8x8xf32>
    %393 = arith.subf %389, %392 : vector<8x8xf32>
    %394 = math.exp %393 : vector<8x8xf32>
    %cst_64 = arith.constant dense<0.000000e+00> : vector<8xf32>
    %395 = vector.multi_reduction <add>, %394, %cst_64 [1] : vector<8x8xf32> to vector<8xf32>
    %396 = vector.shape_cast %395 : vector<8xf32> to vector<8x1xf32>
    %397 = tpu.reciprocal %396 {approx = true} : vector<8x1xf32> -> vector<8x1xf32>
    %398 = vector.broadcast %397 : vector<8x1xf32> to vector<8x8xf32>
    %399 = arith.mulf %394, %398 : vector<8x8xf32>
    %400 = vector.extract_strided_slice %399 {offsets = [0, 0], sizes = [8, 1], strides = [1, 1]} : vector<8x8xf32> to vector<8x1xf32>
    %401 = vector.broadcast %400 : vector<8x1xf32> to vector<8x16xf32>
    %402 = arith.mulf %401, %15 : vector<8x16xf32>
    %403 = vector.extract_strided_slice %399 {offsets = [0, 1], sizes = [8, 1], strides = [1, 1]} : vector<8x8xf32> to vector<8x1xf32>
    %404 = vector.broadcast %403 : vector<8x1xf32> to vector<8x16xf32>
    %405 = arith.mulf %404, %16 : vector<8x16xf32>
    %406 = arith.addf %402, %405 : vector<8x16xf32>
    %407 = vector.extract_strided_slice %399 {offsets = [0, 2], sizes = [8, 1], strides = [1, 1]} : vector<8x8xf32> to vector<8x1xf32>
    %408 = vector.broadcast %407 : vector<8x1xf32> to vector<8x16xf32>
    %409 = arith.mulf %408, %17 : vector<8x16xf32>
    %410 = arith.addf %406, %409 : vector<8x16xf32>
    %411 = vector.extract_strided_slice %399 {offsets = [0, 3], sizes = [8, 1], strides = [1, 1]} : vector<8x8xf32> to vector<8x1xf32>
    %412 = vector.broadcast %411 : vector<8x1xf32> to vector<8x16xf32>
    %413 = arith.mulf %412, %18 : vector<8x16xf32>
    %414 = arith.addf %410, %413 : vector<8x16xf32>
    %415 = vector.extract_strided_slice %399 {offsets = [0, 4], sizes = [8, 1], strides = [1, 1]} : vector<8x8xf32> to vector<8x1xf32>
    %416 = vector.broadcast %415 : vector<8x1xf32> to vector<8x16xf32>
    %417 = arith.mulf %416, %19 : vector<8x16xf32>
    %418 = arith.addf %414, %417 : vector<8x16xf32>
    %419 = vector.extract_strided_slice %399 {offsets = [0, 5], sizes = [8, 1], strides = [1, 1]} : vector<8x8xf32> to vector<8x1xf32>
    %420 = vector.broadcast %419 : vector<8x1xf32> to vector<8x16xf32>
    %421 = arith.mulf %420, %20 : vector<8x16xf32>
    %422 = arith.addf %418, %421 : vector<8x16xf32>
    %423 = vector.extract_strided_slice %399 {offsets = [0, 6], sizes = [8, 1], strides = [1, 1]} : vector<8x8xf32> to vector<8x1xf32>
    %424 = vector.broadcast %423 : vector<8x1xf32> to vector<8x16xf32>
    %425 = arith.mulf %424, %21 : vector<8x16xf32>
    %426 = arith.addf %422, %425 : vector<8x16xf32>
    %427 = vector.extract_strided_slice %399 {offsets = [0, 7], sizes = [8, 1], strides = [1, 1]} : vector<8x8xf32> to vector<8x1xf32>
    %428 = vector.broadcast %427 : vector<8x1xf32> to vector<8x16xf32>
    %429 = arith.mulf %428, %22 : vector<8x16xf32>
    %430 = arith.addf %426, %429 : vector<8x16xf32>
    %431 = tpu.concatenate %13, %13, %13, %13, %13, %13, %13, %13 in 1 : vector<8x16xf32>, vector<8x16xf32>, vector<8x16xf32>, vector<8x16xf32>, vector<8x16xf32>, vector<8x16xf32>, vector<8x16xf32>, vector<8x16xf32> -> vector<8x128xf32>
    %432 = arith.mulf %6, %431 : vector<8x128xf32>
    %433 = vector.extract_strided_slice %432 {offsets = [0, 0], sizes = [8, 16], strides = [1, 1]} : vector<8x128xf32> to vector<8x16xf32>
    %cst_65 = arith.constant dense<0.000000e+00> : vector<8xf32>
    %434 = vector.multi_reduction <add>, %433, %cst_65 [1] : vector<8x16xf32> to vector<8xf32>
    %435 = vector.shape_cast %434 : vector<8xf32> to vector<8x1xf32>
    %436 = vector.extract_strided_slice %432 {offsets = [0, 16], sizes = [8, 16], strides = [1, 1]} : vector<8x128xf32> to vector<8x16xf32>
    %cst_66 = arith.constant dense<0.000000e+00> : vector<8xf32>
    %437 = vector.multi_reduction <add>, %436, %cst_66 [1] : vector<8x16xf32> to vector<8xf32>
    %438 = vector.shape_cast %437 : vector<8xf32> to vector<8x1xf32>
    %439 = vector.extract_strided_slice %432 {offsets = [0, 32], sizes = [8, 16], strides = [1, 1]} : vector<8x128xf32> to vector<8x16xf32>
    %cst_67 = arith.constant dense<0.000000e+00> : vector<8xf32>
    %440 = vector.multi_reduction <add>, %439, %cst_67 [1] : vector<8x16xf32> to vector<8xf32>
    %441 = vector.shape_cast %440 : vector<8xf32> to vector<8x1xf32>
    %442 = vector.extract_strided_slice %432 {offsets = [0, 48], sizes = [8, 16], strides = [1, 1]} : vector<8x128xf32> to vector<8x16xf32>
    %cst_68 = arith.constant dense<0.000000e+00> : vector<8xf32>
    %443 = vector.multi_reduction <add>, %442, %cst_68 [1] : vector<8x16xf32> to vector<8xf32>
    %444 = vector.shape_cast %443 : vector<8xf32> to vector<8x1xf32>
    %445 = vector.extract_strided_slice %432 {offsets = [0, 64], sizes = [8, 16], strides = [1, 1]} : vector<8x128xf32> to vector<8x16xf32>
    %cst_69 = arith.constant dense<0.000000e+00> : vector<8xf32>
    %446 = vector.multi_reduction <add>, %445, %cst_69 [1] : vector<8x16xf32> to vector<8xf32>
    %447 = vector.shape_cast %446 : vector<8xf32> to vector<8x1xf32>
    %448 = vector.extract_strided_slice %432 {offsets = [0, 80], sizes = [8, 16], strides = [1, 1]} : vector<8x128xf32> to vector<8x16xf32>
    %cst_70 = arith.constant dense<0.000000e+00> : vector<8xf32>
    %449 = vector.multi_reduction <add>, %448, %cst_70 [1] : vector<8x16xf32> to vector<8xf32>
    %450 = vector.shape_cast %449 : vector<8xf32> to vector<8x1xf32>
    %451 = vector.extract_strided_slice %432 {offsets = [0, 96], sizes = [8, 16], strides = [1, 1]} : vector<8x128xf32> to vector<8x16xf32>
    %cst_71 = arith.constant dense<0.000000e+00> : vector<8xf32>
    %452 = vector.multi_reduction <add>, %451, %cst_71 [1] : vector<8x16xf32> to vector<8xf32>
    %453 = vector.shape_cast %452 : vector<8xf32> to vector<8x1xf32>
    %454 = vector.extract_strided_slice %432 {offsets = [0, 112], sizes = [8, 16], strides = [1, 1]} : vector<8x128xf32> to vector<8x16xf32>
    %cst_72 = arith.constant dense<0.000000e+00> : vector<8xf32>
    %455 = vector.multi_reduction <add>, %454, %cst_72 [1] : vector<8x16xf32> to vector<8xf32>
    %456 = vector.shape_cast %455 : vector<8xf32> to vector<8x1xf32>
    %457 = tpu.concatenate %435, %438, %441, %444, %447, %450, %453, %456 in 1 : vector<8x1xf32>, vector<8x1xf32>, vector<8x1xf32>, vector<8x1xf32>, vector<8x1xf32>, vector<8x1xf32>, vector<8x1xf32>, vector<8x1xf32> -> vector<8x8xf32>
    %cst_73 = arith.constant dense<0xFF800000> : vector<8xf32>
    %458 = vector.multi_reduction <maximumf>, %457, %cst_73 [1] : vector<8x8xf32> to vector<8xf32>
    %459 = vector.shape_cast %458 : vector<8xf32> to vector<8x1xf32>
    %460 = vector.broadcast %459 : vector<8x1xf32> to vector<8x8xf32>
    %461 = arith.subf %457, %460 : vector<8x8xf32>
    %462 = math.exp %461 : vector<8x8xf32>
    %cst_74 = arith.constant dense<0.000000e+00> : vector<8xf32>
    %463 = vector.multi_reduction <add>, %462, %cst_74 [1] : vector<8x8xf32> to vector<8xf32>
    %464 = vector.shape_cast %463 : vector<8xf32> to vector<8x1xf32>
    %465 = tpu.reciprocal %464 {approx = true} : vector<8x1xf32> -> vector<8x1xf32>
    %466 = vector.broadcast %465 : vector<8x1xf32> to vector<8x8xf32>
    %467 = arith.mulf %462, %466 : vector<8x8xf32>
    %468 = vector.extract_strided_slice %467 {offsets = [0, 0], sizes = [8, 1], strides = [1, 1]} : vector<8x8xf32> to vector<8x1xf32>
    %469 = vector.broadcast %468 : vector<8x1xf32> to vector<8x16xf32>
    %470 = arith.mulf %469, %15 : vector<8x16xf32>
    %471 = vector.extract_strided_slice %467 {offsets = [0, 1], sizes = [8, 1], strides = [1, 1]} : vector<8x8xf32> to vector<8x1xf32>
    %472 = vector.broadcast %471 : vector<8x1xf32> to vector<8x16xf32>
    %473 = arith.mulf %472, %16 : vector<8x16xf32>
    %474 = arith.addf %470, %473 : vector<8x16xf32>
    %475 = vector.extract_strided_slice %467 {offsets = [0, 2], sizes = [8, 1], strides = [1, 1]} : vector<8x8xf32> to vector<8x1xf32>
    %476 = vector.broadcast %475 : vector<8x1xf32> to vector<8x16xf32>
    %477 = arith.mulf %476, %17 : vector<8x16xf32>
    %478 = arith.addf %474, %477 : vector<8x16xf32>
    %479 = vector.extract_strided_slice %467 {offsets = [0, 3], sizes = [8, 1], strides = [1, 1]} : vector<8x8xf32> to vector<8x1xf32>
    %480 = vector.broadcast %479 : vector<8x1xf32> to vector<8x16xf32>
    %481 = arith.mulf %480, %18 : vector<8x16xf32>
    %482 = arith.addf %478, %481 : vector<8x16xf32>
    %483 = vector.extract_strided_slice %467 {offsets = [0, 4], sizes = [8, 1], strides = [1, 1]} : vector<8x8xf32> to vector<8x1xf32>
    %484 = vector.broadcast %483 : vector<8x1xf32> to vector<8x16xf32>
    %485 = arith.mulf %484, %19 : vector<8x16xf32>
    %486 = arith.addf %482, %485 : vector<8x16xf32>
    %487 = vector.extract_strided_slice %467 {offsets = [0, 5], sizes = [8, 1], strides = [1, 1]} : vector<8x8xf32> to vector<8x1xf32>
    %488 = vector.broadcast %487 : vector<8x1xf32> to vector<8x16xf32>
    %489 = arith.mulf %488, %20 : vector<8x16xf32>
    %490 = arith.addf %486, %489 : vector<8x16xf32>
    %491 = vector.extract_strided_slice %467 {offsets = [0, 6], sizes = [8, 1], strides = [1, 1]} : vector<8x8xf32> to vector<8x1xf32>
    %492 = vector.broadcast %491 : vector<8x1xf32> to vector<8x16xf32>
    %493 = arith.mulf %492, %21 : vector<8x16xf32>
    %494 = arith.addf %490, %493 : vector<8x16xf32>
    %495 = vector.extract_strided_slice %467 {offsets = [0, 7], sizes = [8, 1], strides = [1, 1]} : vector<8x8xf32> to vector<8x1xf32>
    %496 = vector.broadcast %495 : vector<8x1xf32> to vector<8x16xf32>
    %497 = arith.mulf %496, %22 : vector<8x16xf32>
    %498 = arith.addf %494, %497 : vector<8x16xf32>
    %499 = tpu.concatenate %14, %14, %14, %14, %14, %14, %14, %14 in 1 : vector<8x16xf32>, vector<8x16xf32>, vector<8x16xf32>, vector<8x16xf32>, vector<8x16xf32>, vector<8x16xf32>, vector<8x16xf32>, vector<8x16xf32> -> vector<8x128xf32>
    %500 = arith.mulf %6, %499 : vector<8x128xf32>
    %501 = vector.extract_strided_slice %500 {offsets = [0, 0], sizes = [8, 16], strides = [1, 1]} : vector<8x128xf32> to vector<8x16xf32>
    %cst_75 = arith.constant dense<0.000000e+00> : vector<8xf32>
    %502 = vector.multi_reduction <add>, %501, %cst_75 [1] : vector<8x16xf32> to vector<8xf32>
    %503 = vector.shape_cast %502 : vector<8xf32> to vector<8x1xf32>
    %504 = vector.extract_strided_slice %500 {offsets = [0, 16], sizes = [8, 16], strides = [1, 1]} : vector<8x128xf32> to vector<8x16xf32>
    %cst_76 = arith.constant dense<0.000000e+00> : vector<8xf32>
    %505 = vector.multi_reduction <add>, %504, %cst_76 [1] : vector<8x16xf32> to vector<8xf32>
    %506 = vector.shape_cast %505 : vector<8xf32> to vector<8x1xf32>
    %507 = vector.extract_strided_slice %500 {offsets = [0, 32], sizes = [8, 16], strides = [1, 1]} : vector<8x128xf32> to vector<8x16xf32>
    %cst_77 = arith.constant dense<0.000000e+00> : vector<8xf32>
    %508 = vector.multi_reduction <add>, %507, %cst_77 [1] : vector<8x16xf32> to vector<8xf32>
    %509 = vector.shape_cast %508 : vector<8xf32> to vector<8x1xf32>
    %510 = vector.extract_strided_slice %500 {offsets = [0, 48], sizes = [8, 16], strides = [1, 1]} : vector<8x128xf32> to vector<8x16xf32>
    %cst_78 = arith.constant dense<0.000000e+00> : vector<8xf32>
    %511 = vector.multi_reduction <add>, %510, %cst_78 [1] : vector<8x16xf32> to vector<8xf32>
    %512 = vector.shape_cast %511 : vector<8xf32> to vector<8x1xf32>
    %513 = vector.extract_strided_slice %500 {offsets = [0, 64], sizes = [8, 16], strides = [1, 1]} : vector<8x128xf32> to vector<8x16xf32>
    %cst_79 = arith.constant dense<0.000000e+00> : vector<8xf32>
    %514 = vector.multi_reduction <add>, %513, %cst_79 [1] : vector<8x16xf32> to vector<8xf32>
    %515 = vector.shape_cast %514 : vector<8xf32> to vector<8x1xf32>
    %516 = vector.extract_strided_slice %500 {offsets = [0, 80], sizes = [8, 16], strides = [1, 1]} : vector<8x128xf32> to vector<8x16xf32>
    %cst_80 = arith.constant dense<0.000000e+00> : vector<8xf32>
    %517 = vector.multi_reduction <add>, %516, %cst_80 [1] : vector<8x16xf32> to vector<8xf32>
    %518 = vector.shape_cast %517 : vector<8xf32> to vector<8x1xf32>
    %519 = vector.extract_strided_slice %500 {offsets = [0, 96], sizes = [8, 16], strides = [1, 1]} : vector<8x128xf32> to vector<8x16xf32>
    %cst_81 = arith.constant dense<0.000000e+00> : vector<8xf32>
    %520 = vector.multi_reduction <add>, %519, %cst_81 [1] : vector<8x16xf32> to vector<8xf32>
    %521 = vector.shape_cast %520 : vector<8xf32> to vector<8x1xf32>
    %522 = vector.extract_strided_slice %500 {offsets = [0, 112], sizes = [8, 16], strides = [1, 1]} : vector<8x128xf32> to vector<8x16xf32>
    %cst_82 = arith.constant dense<0.000000e+00> : vector<8xf32>
    %523 = vector.multi_reduction <add>, %522, %cst_82 [1] : vector<8x16xf32> to vector<8xf32>
    %524 = vector.shape_cast %523 : vector<8xf32> to vector<8x1xf32>
    %525 = tpu.concatenate %503, %506, %509, %512, %515, %518, %521, %524 in 1 : vector<8x1xf32>, vector<8x1xf32>, vector<8x1xf32>, vector<8x1xf32>, vector<8x1xf32>, vector<8x1xf32>, vector<8x1xf32>, vector<8x1xf32> -> vector<8x8xf32>
    %cst_83 = arith.constant dense<0xFF800000> : vector<8xf32>
    %526 = vector.multi_reduction <maximumf>, %525, %cst_83 [1] : vector<8x8xf32> to vector<8xf32>
    %527 = vector.shape_cast %526 : vector<8xf32> to vector<8x1xf32>
    %528 = vector.broadcast %527 : vector<8x1xf32> to vector<8x8xf32>
    %529 = arith.subf %525, %528 : vector<8x8xf32>
    %530 = math.exp %529 : vector<8x8xf32>
    %cst_84 = arith.constant dense<0.000000e+00> : vector<8xf32>
    %531 = vector.multi_reduction <add>, %530, %cst_84 [1] : vector<8x8xf32> to vector<8xf32>
    %532 = vector.shape_cast %531 : vector<8xf32> to vector<8x1xf32>
    %533 = tpu.reciprocal %532 {approx = true} : vector<8x1xf32> -> vector<8x1xf32>
    %534 = vector.broadcast %533 : vector<8x1xf32> to vector<8x8xf32>
    %535 = arith.mulf %530, %534 : vector<8x8xf32>
    %536 = vector.extract_strided_slice %535 {offsets = [0, 0], sizes = [8, 1], strides = [1, 1]} : vector<8x8xf32> to vector<8x1xf32>
    %537 = vector.broadcast %536 : vector<8x1xf32> to vector<8x16xf32>
    %538 = arith.mulf %537, %15 : vector<8x16xf32>
    %539 = vector.extract_strided_slice %535 {offsets = [0, 1], sizes = [8, 1], strides = [1, 1]} : vector<8x8xf32> to vector<8x1xf32>
    %540 = vector.broadcast %539 : vector<8x1xf32> to vector<8x16xf32>
    %541 = arith.mulf %540, %16 : vector<8x16xf32>
    %542 = arith.addf %538, %541 : vector<8x16xf32>
    %543 = vector.extract_strided_slice %535 {offsets = [0, 2], sizes = [8, 1], strides = [1, 1]} : vector<8x8xf32> to vector<8x1xf32>
    %544 = vector.broadcast %543 : vector<8x1xf32> to vector<8x16xf32>
    %545 = arith.mulf %544, %17 : vector<8x16xf32>
    %546 = arith.addf %542, %545 : vector<8x16xf32>
    %547 = vector.extract_strided_slice %535 {offsets = [0, 3], sizes = [8, 1], strides = [1, 1]} : vector<8x8xf32> to vector<8x1xf32>
    %548 = vector.broadcast %547 : vector<8x1xf32> to vector<8x16xf32>
    %549 = arith.mulf %548, %18 : vector<8x16xf32>
    %550 = arith.addf %546, %549 : vector<8x16xf32>
    %551 = vector.extract_strided_slice %535 {offsets = [0, 4], sizes = [8, 1], strides = [1, 1]} : vector<8x8xf32> to vector<8x1xf32>
    %552 = vector.broadcast %551 : vector<8x1xf32> to vector<8x16xf32>
    %553 = arith.mulf %552, %19 : vector<8x16xf32>
    %554 = arith.addf %550, %553 : vector<8x16xf32>
    %555 = vector.extract_strided_slice %535 {offsets = [0, 5], sizes = [8, 1], strides = [1, 1]} : vector<8x8xf32> to vector<8x1xf32>
    %556 = vector.broadcast %555 : vector<8x1xf32> to vector<8x16xf32>
    %557 = arith.mulf %556, %20 : vector<8x16xf32>
    %558 = arith.addf %554, %557 : vector<8x16xf32>
    %559 = vector.extract_strided_slice %535 {offsets = [0, 6], sizes = [8, 1], strides = [1, 1]} : vector<8x8xf32> to vector<8x1xf32>
    %560 = vector.broadcast %559 : vector<8x1xf32> to vector<8x16xf32>
    %561 = arith.mulf %560, %21 : vector<8x16xf32>
    %562 = arith.addf %558, %561 : vector<8x16xf32>
    %563 = vector.extract_strided_slice %535 {offsets = [0, 7], sizes = [8, 1], strides = [1, 1]} : vector<8x8xf32> to vector<8x1xf32>
    %564 = vector.broadcast %563 : vector<8x1xf32> to vector<8x16xf32>
    %565 = arith.mulf %564, %22 : vector<8x16xf32>
    %566 = arith.addf %562, %565 : vector<8x16xf32>
    %567 = tpu.concatenate %90, %158, %226, %294, %362, %430, %498, %566 in 1 : vector<8x16xf32>, vector<8x16xf32>, vector<8x16xf32>, vector<8x16xf32>, vector<8x16xf32>, vector<8x16xf32>, vector<8x16xf32>, vector<8x16xf32> -> vector<8x128xf32>
    %568 = arith.truncf %567 : vector<8x128xf32> to vector<8x128xbf16>
    %c0_85 = arith.constant 0 : index
    %c0_86 = arith.constant 0 : index
    %569 = vector.load %arg4[%c0_85, %c0_86] : memref<128x128xbf16, #tpu.memory_space<vmem>>, vector<128x128xbf16>
    %cst_87 = arith.constant dense<0.000000e+00> : vector<8x128xf32>
    %570 = tpu.matmul %568, %569, %cst_87 {dimension_numbers = #tpu.dot_dimension_numbers<[1], [0], [0], [1], [0, 0, 1, 1], [], []>} : vector<8x128xbf16>, vector<128x128xbf16>, vector<8x128xf32> -> vector<8x128xf32>
    %c0_88 = arith.constant 0 : index
    %c0_89 = arith.constant 0 : index
    %571 = vector.load %arg5[%c0_88, %c0_89] : memref<1x128xf32, #tpu.memory_space<vmem>>, vector<1x128xf32>
    %572 = vector.broadcast %571 : vector<1x128xf32> to vector<8x128xf32>
    %573 = arith.addf %570, %572 : vector<8x128xf32>
    %cst_90 = arith.constant 5.000000e-01 : f32
    %574 = vector.broadcast %cst_90 : f32 to vector<8x128xf32>
    %575 = arith.mulf %574, %573 : vector<8x128xf32>
    %576 = math.tanh %575 : vector<8x128xf32>
    %cst_91 = arith.constant 5.000000e-01 : f32
    %577 = vector.broadcast %cst_91 : f32 to vector<8x128xf32>
    %578 = arith.mulf %577, %576 : vector<8x128xf32>
    %cst_92 = arith.constant 5.000000e-01 : f32
    %579 = vector.broadcast %cst_92 : f32 to vector<8x128xf32>
    %580 = arith.addf %578, %579 : vector<8x128xf32>
    %581 = arith.truncf %580 : vector<8x128xf32> to vector<8x128xbf16>
    %c0_93 = arith.constant 0 : index
    %c0_94 = arith.constant 0 : index
    %582 = vector.load %arg6[%c0_93, %c0_94] : memref<128x128xbf16, #tpu.memory_space<vmem>>, vector<128x128xbf16>
    %cst_95 = arith.constant dense<0.000000e+00> : vector<8x128xf32>
    %583 = tpu.matmul %581, %582, %cst_95 {dimension_numbers = #tpu.dot_dimension_numbers<[1], [0], [0], [1], [0, 0, 1, 1], [], []>} : vector<8x128xbf16>, vector<128x128xbf16>, vector<8x128xf32> -> vector<8x128xf32>
    %c0_96 = arith.constant 0 : index
    %c0_97 = arith.constant 0 : index
    %584 = vector.load %arg7[%c0_96, %c0_97] : memref<1x128xf32, #tpu.memory_space<vmem>>, vector<1x128xf32>
    %585 = vector.broadcast %584 : vector<1x128xf32> to vector<8x128xf32>
    %586 = arith.addf %583, %585 : vector<8x128xf32>
    %cst_98 = arith.constant 5.000000e-01 : f32
    %587 = vector.broadcast %cst_98 : f32 to vector<8x128xf32>
    %588 = arith.mulf %587, %586 : vector<8x128xf32>
    %589 = math.tanh %588 : vector<8x128xf32>
    %cst_99 = arith.constant 5.000000e-01 : f32
    %590 = vector.broadcast %cst_99 : f32 to vector<8x128xf32>
    %591 = arith.mulf %590, %589 : vector<8x128xf32>
    %cst_100 = arith.constant 5.000000e-01 : f32
    %592 = vector.broadcast %cst_100 : f32 to vector<8x128xf32>
    %593 = arith.addf %591, %592 : vector<8x128xf32>
    %594 = arith.truncf %593 : vector<8x128xf32> to vector<8x128xbf16>
    %c0_101 = arith.constant 0 : index
    %c0_102 = arith.constant 0 : index
    %595 = vector.load %arg8[%c0_101, %c0_102] : memref<128x128xbf16, #tpu.memory_space<vmem>>, vector<128x128xbf16>
    %cst_103 = arith.constant dense<0.000000e+00> : vector<8x128xf32>
    %596 = tpu.matmul %594, %595, %cst_103 {dimension_numbers = #tpu.dot_dimension_numbers<[1], [0], [0], [1], [0, 0, 1, 1], [], []>} : vector<8x128xbf16>, vector<128x128xbf16>, vector<8x128xf32> -> vector<8x128xf32>
    %c0_104 = arith.constant 0 : index
    %c0_105 = arith.constant 0 : index
    %597 = vector.load %arg9[%c0_104, %c0_105] : memref<1x128xf32, #tpu.memory_space<vmem>>, vector<1x128xf32>
    %598 = vector.broadcast %597 : vector<1x128xf32> to vector<8x128xf32>
    %599 = arith.addf %596, %598 : vector<8x128xf32>
    %c0_106 = arith.constant 0 : index
    %c0_107 = arith.constant 0 : index
    %600 = vector.load %arg10[%c0_106, %c0_107] : memref<8x128xf32, #tpu.memory_space<vmem>>, vector<8x128xf32>
    tpu.vector_store %arg10[%c0_106, %c0_107], %599 {strides = array<i32>} : memref<8x128xf32, #tpu.memory_space<vmem>>, vector<8x128xf32>,
    return
  }
  func.func @transform_0(%arg0: i32) -> (i32, i32) {
    %c0_i32 = arith.constant 0 : i32
    %c0_i32_0 = arith.constant 0 : i32
    return %arg0, %c0_i32 : i32, i32
  }
  func.func @transform_1(%arg0: i32) -> (i32, i32) {
    %c0_i32 = arith.constant 0 : i32
    %c0_i32_0 = arith.constant 0 : i32
    %c0_i32_1 = arith.constant 0 : i32
    return %c0_i32, %c0_i32_0 : i32, i32
  }
  func.func @transform_2(%arg0: i32) -> (i32, i32) {
    %c0_i32 = arith.constant 0 : i32
    %c0_i32_0 = arith.constant 0 : i32
    %c0_i32_1 = arith.constant 0 : i32
    return %c0_i32, %c0_i32_0 : i32, i32
  }
  func.func @transform_3(%arg0: i32) -> (i32, i32) {
    %c0_i32 = arith.constant 0 : i32
    %c0_i32_0 = arith.constant 0 : i32
    %c0_i32_1 = arith.constant 0 : i32
    return %c0_i32, %c0_i32_0 : i32, i32
  }
  func.func @transform_4(%arg0: i32) -> (i32, i32) {
    %c0_i32 = arith.constant 0 : i32
    %c0_i32_0 = arith.constant 0 : i32
    %c0_i32_1 = arith.constant 0 : i32
    return %c0_i32, %c0_i32_0 : i32, i32
  }
  func.func @transform_5(%arg0: i32) -> (i32, i32) {
    %c0_i32 = arith.constant 0 : i32
    %c0_i32_0 = arith.constant 0 : i32
    %c0_i32_1 = arith.constant 0 : i32
    return %c0_i32, %c0_i32_0 : i32, i32
  }
  func.func @transform_6(%arg0: i32) -> (i32, i32) {
    %c0_i32 = arith.constant 0 : i32
    %c0_i32_0 = arith.constant 0 : i32
    %c0_i32_1 = arith.constant 0 : i32
    return %c0_i32, %c0_i32_0 : i32, i32
  }
  func.func @transform_7(%arg0: i32) -> (i32, i32) {
    %c0_i32 = arith.constant 0 : i32
    %c0_i32_0 = arith.constant 0 : i32
    %c0_i32_1 = arith.constant 0 : i32
    return %c0_i32, %c0_i32_0 : i32, i32
  }
  func.func @transform_8(%arg0: i32) -> (i32, i32) {
    %c0_i32 = arith.constant 0 : i32
    %c0_i32_0 = arith.constant 0 : i32
    %c0_i32_1 = arith.constant 0 : i32
    return %c0_i32, %c0_i32_0 : i32, i32
  }
  func.func @transform_9(%arg0: i32) -> (i32, i32) {
    %c0_i32 = arith.constant 0 : i32
    %c0_i32_0 = arith.constant 0 : i32
    return %arg0, %c0_i32 : i32, i32
  }
}

</mosaic_0001>

<bundles_post_ra>
// kernel: time_series_transformer_forward.1
= control target key start
LH: loop header
LB: loop body
LE: loop exit
PB: predicated region body
PF: predicated region fallthrough
CT: control target
= control target key end

     0   :  { %14 = vsyncpa [#allocation3], 0  ;;  %s3530_s0 = inlined_call_operand.vmem [shape: bf16[8,128], index: 0, kind: input, shape index: {}]   ;;  %s3531_s1 = inlined_call_operand.hbm [shape: bf16[128,384], index: 1, kind: input, shape index: {}]   ;;  %s3532_s2 = inlined_call_operand.hbm [shape: f32[1,384], index: 2, kind: input, shape index: {}]   ;;  %s3533_s3 = inlined_call_operand.hbm [shape: bf16[128,128], index: 3, kind: input, shape index: {}]   ;;  %s3534_s4 = inlined_call_operand.vmem [shape: f32[1,128], index: 4, kind: input, shape index: {}]   ;;  %s3535_s5 = inlined_call_operand.hbm [shape: bf16[128,128], index: 5, kind: input, shape index: {}]   ;;  %s3536_s6 = inlined_call_operand.hbm [shape: f32[1,128], index: 6, kind: input, shape index: {}]   ;;  %s3537_s7 = inlined_call_operand.vmem [shape: bf16[128,128], index: 7, kind: input, shape index: {}]   ;;  %s3538_s8 = inlined_call_operand.hbm [shape: f32[1,128], index: 8, kind: input, shape index: {}]   ;;  %s3539_s9 = inlined_call_operand.vmem [shape: f32[8,128], index: 9, kind: output, shape index: {}]  }
   0x1   :  { %15 = vsyncpa [#allocation5], 0 }
   0x2   :  { %16 = vsyncpa [#allocation8], 0 }
   0x3   :  { %17 = vsyncpa [#allocation11], 0  ;;  %s2455_s30 = smov [#allocation4]   ;;  %s2315_s13 = scalar_lea.hbm %s3532_s2, 48 }
   0x4   :  { %s38_s10 = sshll.u32 %s2455_s30, 4  ;;  %p2316_p0 = scmp.ne.s32.totalorder %s3532_s2, %s2315_s13  ;;  %s39_s10 = int_to_ptr.vmem [resolvable:$true] %s38_s10 }
   0x5   :  { %p2319_p1 = scmp.lt.u32.totalorder %s2315_s13, %s3532_s2 }
   0x7   :  { %p2321_p2 = pnand %p2319_p1, %p2316_p0 }
   0x9   :  { %2324 = shalt.err (!%p2321_p2)
}
   0xa   :  { %s2325_s18 = scalar_lea.vmem %s39_s10, 48  ;;  %s2329_s19 = scalar_lea.vmem %s39_s10, 64 }
   0xb   :  { %p2326_p3 = scmp.ne.s32.totalorder %s39_s10, %s2325_s18  ;;  %p2330_p4 = scmp.lt.s32.totalorder %s39_s10, %s39_s10 }
   0xc   :  { %p2331_p5 = scmp.lt.s32.totalorder %s2329_s19, %s2325_s18 }
   0xe   :  { %p2332_p6 = por %p2331_p5, %p2330_p4 }
  0x10   :  { %p2333_p7 = pnand %p2332_p6, %p2326_p3 }
  0x12   :  { %2336 = shalt.err (!%p2333_p7)
}
  0x13   :  { %41 = dma.hbm_to_vmem [thread:$0]  %s3532_s2, 48, %s39_s10, [#allocation5]  }
  0x14   :  { %s2456_s22 = smov [#allocation7]   ;;  %s2457_s24 = smov [#allocation2]  }
  0x15   :  { %s61_s23 = sshll.u32 %s2456_s22, 4  ;;  %s25_s25 = sshll.u32 %s2457_s24, 4  ;;  %s62_s23 = int_to_ptr.vmem [resolvable:$true] %s61_s23  ;;  %s26_s25 = int_to_ptr.vmem [resolvable:$true] %s25_s25 }
  0x16   :  { %s2337_s28 = scalar_lea.hbm %s3535_s5, 1024 }
  0x17   :  { %p2338_p8 = scmp.ne.s32.totalorder %s3535_s5, %s2337_s28  ;;  %p2341_p9 = scmp.lt.u32.totalorder %s2337_s28, %s3535_s5 }
  0x19   :  { %p2343_p10 = pnand %p2341_p9, %p2338_p8 }
  0x1b   :  { %2346 = shalt.err (!%p2343_p10)
}
  0x1c   :  { %s2347_s2 = scalar_lea.vmem %s62_s23, 1024  ;;  %p2352_p12 = scmp.lt.s32.totalorder %s62_s23, %s62_s23 }
  0x1d   :  { %p2348_p11 = scmp.ne.s32.totalorder %s62_s23, %s2347_s2  ;;  %p2353_p13 = scmp.lt.s32.totalorder %s2347_s2, %s2347_s2 }
  0x1f   :  { %p2354_p0 = por %p2353_p13, %p2352_p12 }
  0x21   :  { %p2355_p1 = pnand %p2354_p0, %p2348_p11 }
  0x23   :  { %2358 = shalt.err (!%p2355_p1)
}
  0x24   :  { %s2458_s10 = smov 64   ;;  %s2459_s13 = smov 4  }
  0x25   :  { %67 = dma.hbm_to_vmem [thread:$0]  %s3535_s5, 1024, %s62_s23, [#allocation8], %s2458_s10, %s2458_s10, %s2459_s13  }
  0x26   :  { %s2359_s18 = scalar_lea.hbm %s3531_s1, 3072 }
  0x27   :  { %p2360_p2 = scmp.ne.s32.totalorder %s3531_s1, %s2359_s18  ;;  %p2363_p3 = scmp.lt.u32.totalorder %s2359_s18, %s3531_s1 }
  0x29   :  { %p2365_p4 = pnand %p2363_p3, %p2360_p2 }
  0x2b   :  { %2368 = shalt.err (!%p2365_p4)
}
  0x2c   :  { %s2369_s24 = scalar_lea.vmem %s26_s25, 3072  ;;  %p2374_p6 = scmp.lt.s32.totalorder %s26_s25, %s26_s25 }
  0x2d   :  { %p2370_p5 = scmp.ne.s32.totalorder %s26_s25, %s2369_s24  ;;  %p2375_p7 = scmp.lt.s32.totalorder %s2369_s24, %s2369_s24 }
  0x2f   :  { %p2376_p8 = por %p2375_p7, %p2374_p6 }
  0x31   :  { %p2377_p9 = pnand %p2376_p8, %p2370_p5 }
  0x33   :  { %2380 = shalt.err (!%p2377_p9)
}
  0x34   :  { %s2460_s5 = smov 192   ;;  %s2461_s23 = smov 12  }
  0x35   :  { %31 = dma.hbm_to_vmem [thread:$0]  %s3531_s1, 3072, %s26_s25, [#allocation3], %s2460_s5, %s2460_s5, %s2461_s23  }
  0x36   :  { %s2462_s28 = smov [#allocation6]   ;;  %s2463_s30 = smov [#allocation9]  }
  0x37   :  { %s47_s29 = sshll.u32 %s2462_s28, 4  ;;  %s74_s11 = sshll.u32 %s2463_s30, 4  ;;  %s48_s29 = int_to_ptr.vmem [resolvable:$true] %s47_s29  ;;  %s75_s11 = int_to_ptr.vmem [resolvable:$true] %s74_s11 }
  0x38   :  { %s2381_s14 = scalar_lea.hbm %s3533_s3, 1024 }
  0x39   :  { %p2382_p10 = scmp.ne.s32.totalorder %s3533_s3, %s2381_s14  ;;  %p2385_p11 = scmp.lt.u32.totalorder %s2381_s14, %s3533_s3 }
  0x3b   :  { %p2387_p12 = pnand %p2385_p11, %p2382_p10 }
  0x3d   :  { %2390 = shalt.err (!%p2387_p12)
}
  0x3e   :  { %s2391_s1 = scalar_lea.vmem %s48_s29, 1024  ;;  %p2396_p0 = scmp.lt.s32.totalorder %s48_s29, %s48_s29 }
  0x3f   :  { %p2392_p13 = scmp.ne.s32.totalorder %s48_s29, %s2391_s1  ;;  %p2397_p1 = scmp.lt.s32.totalorder %s2391_s1, %s2391_s1 }
  0x41   :  { %p2398_p2 = por %p2397_p1, %p2396_p0 }
  0x43   :  { %p2399_p3 = pnand %p2398_p2, %p2392_p13 }
  0x45   :  { %2402 = shalt.err (!%p2399_p3)
}
  0x46   :  { %53 = dma.hbm_to_vmem [thread:$0]  %s3533_s3, 1024, %s48_s29, [#allocation5], %s2458_s10, %s2458_s10, %s2459_s13  }
  0x47   :  { %s2403_s22 = scalar_lea.hbm %s3536_s6, 16 }
  0x48   :  { %p2404_p4 = scmp.ne.s32.totalorder %s3536_s6, %s2403_s22  ;;  %p2407_p5 = scmp.lt.u32.totalorder %s2403_s22, %s3536_s6 }
  0x4a   :  { %p2409_p6 = pnand %p2407_p5, %p2404_p4 }
  0x4c   :  { %2412 = shalt.err (!%p2409_p6)
}
  0x4d   :  { %s2413_s27 = scalar_lea.vmem %s75_s11, 16  ;;  %s2417_s28 = scalar_lea.vmem %s75_s11, 32 }
  0x4e   :  { %p2414_p7 = scmp.ne.s32.totalorder %s75_s11, %s2413_s27  ;;  %p2418_p8 = scmp.lt.s32.totalorder %s75_s11, %s75_s11 }
  0x4f   :  { %p2419_p9 = scmp.lt.s32.totalorder %s2417_s28, %s2413_s27 }
  0x51   :  { %p2420_p10 = por %p2419_p9, %p2418_p8 }
  0x53   :  { %p2421_p11 = pnand %p2420_p10, %p2414_p7 }
  0x55   :  { %2424 = shalt.err (!%p2421_p11)
}
  0x56   :  { %77 = dma.hbm_to_vmem [thread:$0]  %s3536_s6, 16, %s75_s11, [#allocation8]  }
  0x57   :  { %s2464_s29 = smov [#allocation10]   ;;  %s2425_s14 = scalar_lea.hbm %s3538_s8, 16 }
  0x58   :  { %s86_s30 = sshll.u32 %s2464_s29, 4  ;;  %p2426_p12 = scmp.ne.s32.totalorder %s3538_s8, %s2425_s14  ;;  %s87_s30 = int_to_ptr.vmem [resolvable:$true] %s86_s30 }
  0x59   :  { %p2429_p13 = scmp.lt.u32.totalorder %s2425_s14, %s3538_s8 }
  0x5b   :  { %p2431_p0 = pnand %p2429_p13, %p2426_p12 }
  0x5d   :  { %2434 = shalt.err (!%p2431_p0)
}
  0x5e   :  { %s2435_s1 = scalar_lea.vmem %s87_s30, 16  ;;  %s2439_s6 = scalar_lea.vmem %s87_s30, 32 }
  0x5f   :  { %p2436_p1 = scmp.ne.s32.totalorder %s87_s30, %s2435_s1  ;;  %p2440_p2 = scmp.lt.s32.totalorder %s87_s30, %s87_s30 }
  0x60   :  { %p2441_p3 = scmp.lt.s32.totalorder %s2439_s6, %s2435_s1 }
  0x62   :  { %p2442_p4 = por %p2441_p3, %p2440_p2 }
  0x64   :  { %p2443_p5 = pnand %p2442_p4, %p2436_p1 }
  0x66   :  { %2446 = shalt.err (!%p2443_p5)
}
  0x67   :  { %89 = dma.hbm_to_vmem [thread:$0]  %s3538_s8, 16, %s87_s30, [#allocation11]  }
  0x68   :  { %2447 = dma.done.wait [#allocation3], 3072  }
  0x69   :  { %2448 = vsyncadd [#allocation3], 4294964224 }
  0x6a   :  { %2449 = dma.done.wait [#allocation5], 1072  }
  0x6b   :  { %2450 = vsyncadd [#allocation5], 4294966224 }
  0x6c   :  { %2451 = dma.done.wait [#allocation8], 1040  }
  0x6d   :  { %2452 = vsyncadd [#allocation8], 4294966256 }
  0x6e   :  { %2453 = dma.done.wait [#allocation11], 16  }
  0x6f   :  { %2454 = vsyncadd [#allocation11], 4294967280  ;;  %v2465_v0 = vmov 0   ;;  %v2222_v1 = vld [vmem:[#allocation2 + $0x4] ss:$12 sps:$4 sm:$0xff]   ;;  %v144_v18 = vlaneseq  ;;  %s2466_s20 = smov 48  }
  0x70   :  { %319 = vmatprep.mubr.bf16.mxu0 %v2465_v0  ;;  %2170 = vset.pattern.permute.xlu1 %v2465_v0  ;;  %v2224_v2 = vld [vmem:[#allocation2] ss:$12 sps:$4 sm:$0xff]   ;;  %v2225_v3 = vld [vmem:[#allocation2 + $0x1c] ss:$12 sps:$4 sm:$0xff]   ;;  %v2227_v4 = vld [vmem:[#allocation2 + $0x18] ss:$12 sps:$4 sm:$0xff]  }
  0x71   :  { %287 = vmatprep.subr.bf16.mxu0 %v2222_v1  ;;  %v2228_v5 = vld [vmem:[#allocation2 + $0x34] ss:$12 sps:$4 sm:$0xff]   ;;  %v2230_v6 = vld [vmem:[#allocation2 + $0x30] ss:$12 sps:$4 sm:$0xff]   ;;  %v2231_v7 = vld [vmem:[#allocation2 + $0x4c] ss:$12 sps:$4 sm:$0xff]  }
  0x72   :  { %288 = vmatpush1.bf16.msra.mxu0 %v2224_v2  ;;  %v2233_v8 = vld [vmem:[#allocation2 + $0x48] ss:$12 sps:$4 sm:$0xff]   ;;  %v2234_v9 = vld [vmem:[#allocation2 + $0x64] ss:$12 sps:$4 sm:$0xff]   ;;  %v2236_v10 = vld [vmem:[#allocation2 + $0x60] ss:$12 sps:$4 sm:$0xff]  }
  0x73   :  { %289 = vmatprep.subr.bf16.mxu0 %v2225_v3  ;;  %v2237_v11 = vld [vmem:[#allocation2 + $0x7c] ss:$12 sps:$4 sm:$0xff]   ;;  %v2239_v12 = vld [vmem:[#allocation2 + $0x78] ss:$12 sps:$4 sm:$0xff]   ;;  %v2240_v13 = vld [vmem:[#allocation2 + $0x94] ss:$12 sps:$4 sm:$0xff]  }
  0x74   :  { %v2242_v14 = vld [vmem:[#allocation2 + $0x90] ss:$12 sps:$4 sm:$0xff]   ;;  %v2243_v15 = vld [vmem:[#allocation2 + $0xac] ss:$12 sps:$4 sm:$0xff]   ;;  %v2245_v16 = vld [vmem:[#allocation2 + $0xa8] ss:$12 sps:$4 sm:$0xff]  }
  0x75   :  { %v2614_v17 = vld [vmem:[%s3530_s0] sm:$0xf]  ;;  %v2617_v19 = vshrl.u32 %v144_v18, 7  ;;  %s2467_s0 = smov 16   ;;  %s2468_s21 = smov 32   ;;  %vm390_vm0 = vcmask 130048  }
  0x76   :  { %290 = vmatpush1.bf16.msra.mxu0 %v2227_v4  ;;  %v142_v21 = vld [vmem:[#allocation4] sm:$0x7]  ;;  %s2469_s22 = smov 96   ;;  %s2470_s24 = smov 80   ;;  %vm392_vm1 = vcmask 261120   ;;  %vm394_vm2 = vcmask 392192  }
  0x77   :  { %291 = vmatprep.subr.bf16.mxu0 %v2228_v5  ;;  %v150_v20 = vsub.s32 1, %v2617_v19  ;;  %s2471_s5 = smov 112   ;;  %v146_v30 = vsub.s32 0, %v2617_v19  ;;  %vm396_vm3 = vcmask 523264   ;;  %vm398_vm4 = vcmask 654336  }
  0x78   :  { %vm400_vm5 = vcmask 785408   ;;  %vm402_vm6 = vcmask 916480   ;;  %vm451_vm7 = vcmask 7168   ;;  %vm453_vm8 = vcmask 15360  }
  0x79   :  { %v151_v22 = vrot.slane %v142_v21, %v150_v20  ;;  %v147_v37 = vrot.slane %v142_v21, %v146_v30  ;;  %vm455_vm9 = vcmask 23552   ;;  %vm457_vm10 = vcmask 31744  }
  0x7a   :  { %292 = vmatpush1.bf16.msra.mxu0 %v2230_v6  ;;  %vm459_vm11 = vcmask 39936   ;;  %vm461_vm12 = vcmask 48128   ;;  %vm463_vm13 = vcmask 56320   ;;  %vm465_vm14 = vcmask 64512  }
  0x7b   :  { %293 = vmatprep.subr.bf16.mxu0 %v2231_v7  ;;  %vm2473_vm15 = vmmov 0  }
  0x7e   :  { %294 = vmatpush1.bf16.msra.mxu0 %v2233_v8 }
  0x7f   :  { %295 = vmatprep.subr.bf16.mxu0 %v2234_v9 }
  0x82   :  { %296 = vmatpush1.bf16.msra.mxu0 %v2236_v10 }
  0x83   :  { %297 = vmatprep.subr.bf16.mxu0 %v2237_v11 }
  0x86   :  { %298 = vmatpush1.bf16.msra.mxu0 %v2239_v12 }
  0x87   :  { %299 = vmatprep.subr.bf16.mxu0 %v2240_v13 }
  0x8a   :  { %300 = vmatpush1.bf16.msra.mxu0 %v2242_v14 }
  0x8b   :  { %301 = vmatprep.subr.bf16.mxu0 %v2243_v15 }
  0x8e   :  { %302 = vmatpush1.bf16.msra.mxu0 %v2245_v16 }
  0x91   :  { %320 = vmatmul.mubr.bf16.vlgmr.msra.gmra.mrb[0].mxu0 %v2614_v17 }
 0x164   :  { %v321_v23 = vpop.f32.mrb[0].mxu0 }
 0x165   :  { %v323_v24 = vpop.f32.mrb[1].mxu0  ;;  %v2660_v41 = vadd.f32 %v321_v23, %v147_v37 }
 0x166   :  { %v2620_v25 = vadd.f32 %v323_v24, %v151_v22  ;;  %v325_v26 = vpop.f32.mrb[2].mxu0 }
 0x167   :  { %v326_v27 = vpop.f32.mrb[3].mxu0 }
 0x168   :  { %375 = vrot.lane.b32.xlu1 %v2620_v25, %s2466_s20  ;;  %369 = vrot.lane.b32.xlu0 %v2620_v25, %s2467_s0 }
 0x16c   :  { %378 = vrot.lane.b32.xlu1 %v2620_v25, %s2458_s10  ;;  %372 = vrot.lane.b32.xlu0 %v2620_v25, %s2468_s21 }
 0x170   :  { %384 = vrot.lane.b32.xlu1 %v2620_v25, %s2469_s22  ;;  %381 = vrot.lane.b32.xlu0 %v2620_v25, %s2470_s24 }
 0x174   :  { %387 = vrot.lane.b32.xlu0 %v2620_v25, %s2471_s5 }
 0x1da   :  { %v2636_v28 = vpop.permute.xlu1 %375  ;;  %v2638_v29 = vpop.permute.xlu0 %369 }
 0x1db   :  { %v391_v31 = vsel %vm390_vm0, %v2620_v25, %v2638_v29 }
 0x1de   :  { %v2644_v32 = vpop.permute.xlu1 %378  ;;  %v2646_v33 = vpop.permute.xlu0 %372 }
 0x1df   :  { %v393_v34 = vsel %vm392_vm1, %v391_v31, %v2646_v33 }
 0x1e0   :  { %v395_v35 = vsel %vm394_vm2, %v393_v34, %v2636_v28 }
 0x1e1   :  { %v397_v36 = vsel %vm396_vm3, %v395_v35, %v2644_v32 }
 0x1e2   :  { %v2654_v38 = vpop.permute.xlu0 %381  ;;  %v2656_v39 = vpop.permute.xlu1 %384 }
 0x1e3   :  { %v399_v40 = vsel %vm398_vm4, %v397_v36, %v2654_v38  ;;  %v849_v62 = vsel %vm390_vm0, %v2654_v38, %v2656_v39 }
 0x1e4   :  { %v401_v42 = vsel %vm400_vm5, %v399_v40, %v2656_v39 }
 0x1e6   :  { %v2664_v43 = vpop.permute.xlu0 %387 }
 0x1e7   :  { %v403_v44 = vsel %vm402_vm6, %v401_v42, %v2664_v43  ;;  %v553_v45 = vsel %vm390_vm0, %v2664_v43, %v2620_v25  ;;  %v701_v46 = vsel %vm390_vm0, %v2656_v39, %v2664_v43  ;;  %v850_v63 = vsel %vm392_vm1, %v849_v62, %v2664_v43 }
 0x1e8   :  { %v404_v47 = vmul.f32 %v403_v44, %v2660_v41  ;;  %v554_v48 = vsel %vm392_vm1, %v553_v45, %v2638_v29  ;;  %v702_v49 = vsel %vm392_vm1, %v701_v46, %v2620_v25  ;;  %v851_v1 = vsel %vm394_vm2, %v850_v63, %v2620_v25 }
 0x1e9   :  { %v555_v50 = vsel %vm394_vm2, %v554_v48, %v2646_v33  ;;  %v703_v51 = vsel %vm394_vm2, %v702_v49, %v2638_v29  ;;  %v852_v2 = vsel %vm396_vm3, %v851_v1, %v2638_v29 }
 0x1ea   :  { %v556_v52 = vsel %vm396_vm3, %v555_v50, %v2636_v28  ;;  %415 = vrot.lane.b32.xlu1 %v404_v47, %s2469_s22  ;;  %409 = vrot.lane.b32.xlu0 %v404_v47, %s2471_s5  ;;  %v704_v54 = vsel %vm396_vm3, %v703_v51, %v2646_v33  ;;  %v853_v3 = vsel %vm398_vm4, %v852_v2, %v2646_v33  ;;  %v405_v5 = vsel %vm390_vm0, %v404_v47, 0.0 }
 0x1eb   :  { %v557_v53 = vsel %vm398_vm4, %v556_v52, %v2644_v32  ;;  %v705_v57 = vsel %vm398_vm4, %v704_v54, %v2636_v28  ;;  %v854_v4 = vsel %vm400_vm5, %v853_v3, %v2636_v28 }
 0x1ec   :  { %v558_v55 = vsel %vm400_vm5, %v557_v53, %v2654_v38  ;;  %v706_v59 = vsel %vm400_vm5, %v705_v57, %v2644_v32  ;;  %v855_v6 = vsel %vm402_vm6, %v854_v4, %v2644_v32 }
 0x1ed   :  { %v559_v56 = vsel %vm402_vm6, %v558_v55, %v2656_v39  ;;  %v707_v60 = vsel %vm402_vm6, %v706_v59, %v2654_v38  ;;  %v2739_v7 = vmul.f32 %v855_v6, %v2660_v41 }
 0x1ee   :  { %433 = vrot.lane.b32.xlu1 %v404_v47, %s2466_s20  ;;  %421 = vrot.lane.b32.xlu0 %v404_v47, %s2470_s24  ;;  %v560_v58 = vmul.f32 %v559_v56, %v2660_v41  ;;  %v708_v61 = vmul.f32 %v707_v60, %v2660_v41 }
 0x1ef   :  { %v857_v10 = vsel %vm390_vm0, %v2739_v7, 0.0 }
 0x1f0   :  { %v561_v8 = vsel %vm390_vm0, %v560_v58, 0.0  ;;  %v709_v9 = vsel %vm390_vm0, %v708_v61, 0.0 }
 0x1f2   :  { %571 = vrot.lane.b32.xlu1 %v560_v58, %s2469_s22  ;;  %427 = vrot.lane.b32.xlu0 %v404_v47, %s2458_s10 }
 0x1f6   :  { %589 = vrot.lane.b32.xlu1 %v560_v58, %s2466_s20  ;;  %439 = vrot.lane.b32.xlu0 %v404_v47, %s2468_s21 }
 0x1fa   :  { %719 = vrot.lane.b32.xlu1 %v708_v61, %s2469_s22  ;;  %445 = vrot.lane.b32.xlu0 %v404_v47, %s2467_s0 }
 0x1fe   :  { %737 = vrot.lane.b32.xlu1 %v708_v61, %s2466_s20  ;;  %565 = vrot.lane.b32.xlu0 %v560_v58, %s2471_s5 }
 0x202   :  { %577 = vrot.lane.b32.xlu0 %v560_v58, %s2470_s24 }
 0x206   :  { %583 = vrot.lane.b32.xlu0 %v560_v58, %s2458_s10 }
 0x20a   :  { %595 = vrot.lane.b32.xlu0 %v560_v58, %s2468_s21 }
 0x20e   :  { %601 = vrot.lane.b32.xlu0 %v560_v58, %s2467_s0 }
 0x212   :  { %713 = vrot.lane.b32.xlu0 %v708_v61, %s2471_s5 }
 0x216   :  { %725 = vrot.lane.b32.xlu0 %v708_v61, %s2470_s24 }
 0x21a   :  { %731 = vrot.lane.b32.xlu0 %v708_v61, %s2458_s10 }
 0x21e   :  { %743 = vrot.lane.b32.xlu0 %v708_v61, %s2468_s21 }
 0x222   :  { %406 = vadd.xlane.f32.xlu1 %v405_v5  ;;  %749 = vrot.lane.b32.xlu0 %v708_v61, %s2467_s0 }
 0x226   :  { %562 = vadd.xlane.f32.xlu1 %v561_v8  ;;  %861 = vrot.lane.b32.xlu0 %v2739_v7, %s2471_s5 }
 0x22a   :  { %710 = vadd.xlane.f32.xlu1 %v709_v9 }
 0x22e   :  { %858 = vadd.xlane.f32.xlu1 %v857_v10 }
 0x25c   :  { %v410_v11 = vpop.permute.xlu0 %409  ;;  %v416_v13 = vpop.permute.xlu1 %415 }
 0x25d   :  { %v412_v12 = vsel %vm390_vm0, %v410_v11, 0.0  ;;  %v418_v15 = vsel %vm390_vm0, %v416_v13, 0.0 }
 0x25e   :  { %413 = vadd.xlane.f32.xlu0 %v412_v12 }
 0x260   :  { %v422_v14 = vpop.permute.xlu0 %421  ;;  %v434_v21 = vpop.permute.xlu1 %433 }
 0x261   :  { %v424_v16 = vsel %vm390_vm0, %v422_v14, 0.0  ;;  %v436_v23 = vsel %vm390_vm0, %v434_v21, 0.0 }
 0x262   :  { %419 = vadd.xlane.f32.xlu0 %v418_v15  ;;  %425 = vadd.xlane.f32.xlu1 %v424_v16 }
 0x264   :  { %v428_v18 = vpop.permute.xlu0 %427  ;;  %v572_v34 = vpop.permute.xlu1 %571 }
 0x265   :  { %v430_v20 = vsel %vm390_vm0, %v428_v18, 0.0  ;;  %v574_v36 = vsel %vm390_vm0, %v572_v34, 0.0 }
 0x266   :  { %431 = vadd.xlane.f32.xlu0 %v430_v20 }
 0x268   :  { %v440_v22 = vpop.permute.xlu0 %439  ;;  %v590_v44 = vpop.permute.xlu1 %589 }
 0x269   :  { %v442_v24 = vsel %vm390_vm0, %v440_v22, 0.0  ;;  %v592_v46 = vsel %vm390_vm0, %v590_v44, 0.0 }
 0x26a   :  { %437 = vadd.xlane.f32.xlu0 %v436_v23  ;;  %443 = vadd.xlane.f32.xlu1 %v442_v24 }
 0x26c   :  { %v446_v26 = vpop.permute.xlu0 %445  ;;  %v720_v52 = vpop.permute.xlu1 %719 }
 0x26d   :  { %v448_v27 = vsel %vm390_vm0, %v446_v26, 0.0  ;;  %v722_v54 = vsel %vm390_vm0, %v720_v52, 0.0 }
 0x26e   :  { %449 = vadd.xlane.f32.xlu0 %v448_v27 }
 0x270   :  { %v566_v30 = vpop.permute.xlu0 %565  ;;  %v738_v58 = vpop.permute.xlu1 %737 }
 0x271   :  { %v568_v31 = vsel %vm390_vm0, %v566_v30, 0.0  ;;  %v740_v60 = vsel %vm390_vm0, %v738_v58, 0.0 }
 0x272   :  { %569 = vadd.xlane.f32.xlu0 %v568_v31 }
 0x274   :  { %v578_v35 = vpop.permute.xlu0 %577 }
 0x275   :  { %v580_v37 = vsel %vm390_vm0, %v578_v35, 0.0 }
 0x276   :  { %575 = vadd.xlane.f32.xlu0 %v574_v36  ;;  %581 = vadd.xlane.f32.xlu1 %v580_v37 }
 0x278   :  { %v584_v40 = vpop.permute.xlu0 %583 }
 0x279   :  { %v586_v42 = vsel %vm390_vm0, %v584_v40, 0.0 }
 0x27a   :  { %587 = vadd.xlane.f32.xlu0 %v586_v42 }
 0x27c   :  { %v596_v45 = vpop.permute.xlu0 %595 }
 0x27d   :  { %v598_v47 = vsel %vm390_vm0, %v596_v45, 0.0 }
 0x27e   :  { %593 = vadd.xlane.f32.xlu0 %v592_v46  ;;  %599 = vadd.xlane.f32.xlu1 %v598_v47 }
 0x280   :  { %v602_v48 = vpop.permute.xlu0 %601 }
 0x281   :  { %v604_v49 = vsel %vm390_vm0, %v602_v48, 0.0 }
 0x282   :  { %605 = vadd.xlane.f32.xlu0 %v604_v49 }
 0x284   :  { %v714_v50 = vpop.permute.xlu0 %713 }
 0x285   :  { %v716_v51 = vsel %vm390_vm0, %v714_v50, 0.0 }
 0x286   :  { %717 = vadd.xlane.f32.xlu0 %v716_v51  ;;  %v997_v51 = vsel %vm390_vm0, %v2644_v32, %v2654_v38 }
 0x287   :  { %v998_v52 = vsel %vm392_vm1, %v997_v51, %v2656_v39  ;;  %v1441_v51 = vsel %vm390_vm0, %v2638_v29, %v2646_v33 }
 0x288   :  { %v726_v53 = vpop.permute.xlu0 %725 }
 0x289   :  { %v728_v55 = vsel %vm390_vm0, %v726_v53, 0.0  ;;  %v999_v53 = vsel %vm394_vm2, %v998_v52, %v2664_v43  ;;  %v1442_v52 = vsel %vm392_vm1, %v1441_v51, %v2636_v28 }
 0x28a   :  { %723 = vadd.xlane.f32.xlu0 %v722_v54  ;;  %729 = vadd.xlane.f32.xlu1 %v728_v55  ;;  %v1000_v54 = vsel %vm396_vm3, %v999_v53, %v2620_v25  ;;  %v1145_v55 = vsel %vm390_vm0, %v2636_v28, %v2644_v32  ;;  %v1443_v53 = vsel %vm394_vm2, %v1442_v52, %v2644_v32 }
 0x28c   :  { %v732_v56 = vpop.permute.xlu0 %731 }
 0x28d   :  { %v734_v57 = vsel %vm390_vm0, %v732_v56, 0.0  ;;  %v1001_v56 = vsel %vm398_vm4, %v1000_v54, %v2638_v29  ;;  %v1444_v54 = vsel %vm396_vm3, %v1443_v53, %v2654_v38 }
 0x28e   :  { %735 = vadd.xlane.f32.xlu0 %v734_v57  ;;  %v1146_v57 = vsel %vm392_vm1, %v1145_v55, %v2654_v38  ;;  %v1002_v58 = vsel %vm400_vm5, %v1001_v56, %v2646_v33  ;;  %v1445_v55 = vsel %vm398_vm4, %v1444_v54, %v2656_v39 }
 0x290   :  { %v744_v59 = vpop.permute.xlu0 %743 }
 0x291   :  { %v746_v61 = vsel %vm390_vm0, %v744_v59, 0.0  ;;  %v1147_v59 = vsel %vm394_vm2, %v1146_v57, %v2656_v39 }
 0x292   :  { %741 = vadd.xlane.f32.xlu0 %v740_v60  ;;  %747 = vadd.xlane.f32.xlu1 %v746_v61  ;;  %v1148_v60 = vsel %vm396_vm3, %v1147_v59, %v2664_v43  ;;  %v1003_v61 = vsel %vm402_vm6, %v1002_v58, %v2636_v28 }
 0x294   :  { %v750_v62 = vpop.permute.xlu0 %749 }
 0x295   :  { %v752_v63 = vsel %vm390_vm0, %v750_v62, 0.0  ;;  %v1293_v62 = vsel %vm390_vm0, %v2646_v33, %v2636_v28 }
 0x296   :  { %753 = vadd.xlane.f32.xlu0 %v752_v63  ;;  %v1149_v63 = vsel %vm398_vm4, %v1148_v60, %v2620_v25 }
 0x298   :  { %v862_v1 = vpop.permute.xlu0 %861 }
 0x299   :  { %v864_v2 = vsel %vm390_vm0, %v862_v1, 0.0  ;;  %v1004_v1 = vmul.f32 %v1003_v61, %v2660_v41 }
 0x29a   :  { %865 = vadd.xlane.f32.xlu0 %v864_v2  ;;  %v1294_v2 = vsel %vm392_vm1, %v1293_v62, %v2644_v32 }
 0x2a3   :  { %867 = vrot.lane.b32.xlu1 %v2739_v7, %s2469_s22 }
 0x2af   :  { %v2771_v3 = vpop.xlane.xlu1 %406 }
 0x2b3   :  { %v2773_v4 = vpop.xlane.xlu1 %562 }
 0x2b7   :  { %v2775_v5 = vpop.xlane.xlu1 %710 }
 0x2bb   :  { %v2777_v6 = vpop.xlane.xlu1 %858 }
 0x2eb   :  { %v2796_v16 = vpop.xlane.xlu0 %413 }
 0x2ec   :  { %v452_v62 = vsel %vm451_vm7, %v2771_v3, %v2796_v16 }
 0x2ef   :  { %v2779_v8 = vpop.xlane.xlu1 %425  ;;  %v2798_v18 = vpop.xlane.xlu0 %419 }
 0x2f3   :  { %v2800_v20 = vpop.xlane.xlu0 %431 }
 0x2f7   :  { %v2781_v9 = vpop.xlane.xlu1 %443  ;;  %v2802_v21 = vpop.xlane.xlu0 %437 }
 0x2fb   :  { %v2804_v22 = vpop.xlane.xlu0 %449 }
 0x2ff   :  { %v2806_v23 = vpop.xlane.xlu0 %569 }
 0x303   :  { %v2783_v10 = vpop.xlane.xlu1 %581  ;;  %v2808_v24 = vpop.xlane.xlu0 %575 }
 0x307   :  { %v2810_v26 = vpop.xlane.xlu0 %587 }
 0x30b   :  { %v2785_v11 = vpop.xlane.xlu1 %599  ;;  %v2812_v27 = vpop.xlane.xlu0 %593 }
 0x30f   :  { %v2814_v30 = vpop.xlane.xlu0 %605 }
 0x313   :  { %v2816_v31 = vpop.xlane.xlu0 %717 }
 0x317   :  { %v2787_v12 = vpop.xlane.xlu1 %729  ;;  %v2818_v34 = vpop.xlane.xlu0 %723 }
 0x31b   :  { %v2820_v35 = vpop.xlane.xlu0 %735 }
 0x31f   :  { %v2789_v13 = vpop.xlane.xlu1 %747  ;;  %v2822_v36 = vpop.xlane.xlu0 %741 }
 0x323   :  { %v868_v14 = vpop.permute.xlu1 %867  ;;  %v2824_v37 = vpop.xlane.xlu0 %753 }
 0x324   :  { %v870_v15 = vsel %vm390_vm0, %v868_v14, 0.0  ;;  %v1150_v14 = vsel %vm400_vm5, %v1149_v63, %v2638_v29  ;;  %v454_v63 = vsel %vm453_vm8, %v452_v62, %v2798_v18 }
 0x325   :  { %871 = vadd.xlane.f32.xlu0 %v870_v15  ;;  %v1151_v15 = vsel %vm402_vm6, %v1150_v14, %v2646_v33  ;;  %v1005_v33 = vsel %vm390_vm0, %v1004_v1, 0.0 }
 0x327   :  { %v2826_v40 = vpop.xlane.xlu0 %865 }
 0x33b   :  { %873 = vrot.lane.b32.xlu0 %v2739_v7, %s2470_s24 }
 0x33f   :  { %879 = vrot.lane.b32.xlu0 %v2739_v7, %s2458_s10 }
 0x3b2   :  { %v2828_v42 = vpop.xlane.xlu0 %871 }
 0x3b6   :  { %v874_v44 = vpop.permute.xlu0 %873 }
 0x3b7   :  { %v876_v45 = vsel %vm390_vm0, %v874_v44, 0.0 }
 0x3b8   :  { %877 = vadd.xlane.f32.xlu1 %v876_v45 }
 0x3ba   :  { %v880_v46 = vpop.permute.xlu0 %879 }
 0x3bb   :  { %v882_v47 = vsel %vm390_vm0, %v880_v46, 0.0  ;;  %v1152_v46 = vmul.f32 %v1151_v15, %v2660_v41 }
 0x3bc   :  { %883 = vadd.xlane.f32.xlu0 %v882_v47 }
 0x3bd   :  { %v1153_v59 = vsel %vm390_vm0, %v1152_v46, 0.0 }
 0x3c9   :  { %885 = vrot.lane.b32.xlu1 %v2739_v7, %s2466_s20 }
 0x445   :  { %v2834_v48 = vpop.xlane.xlu1 %877 }
 0x449   :  { %v886_v49 = vpop.permute.xlu1 %885 }
 0x44a   :  { %v888_v50 = vsel %vm390_vm0, %v886_v49, 0.0 }
 0x44b   :  { %889 = vadd.xlane.f32.xlu0 %v888_v50 }
 0x461   :  { %891 = vrot.lane.b32.xlu0 %v2739_v7, %s2468_s21 }
 0x465   :  { %897 = vrot.lane.b32.xlu0 %v2739_v7, %s2467_s0  ;;  %v1295_v7 = vsel %vm394_vm2, %v1294_v2, %v2654_v38  ;;  %v2934_v38 = vpop.xlane.xlu0 %883  ;;  %v607_v2 = vsel %vm451_vm7, %v2773_v4, %v2806_v23 }
 0x466   :  { %v1296_v44 = vsel %vm396_vm3, %v1295_v7, %v2656_v39  ;;  %v608_v7 = vsel %vm453_vm8, %v607_v2, %v2808_v24 }
 0x467   :  { %v1297_v45 = vsel %vm398_vm4, %v1296_v44, %v2664_v43  ;;  %v609_v16 = vsel %vm455_vm9, %v608_v7, %v2783_v10 }
 0x468   :  { %v1298_v47 = vsel %vm400_vm5, %v1297_v45, %v2620_v25  ;;  %v610_v18 = vsel %vm457_vm10, %v609_v16, %v2810_v26 }
 0x469   :  { %1009 = vrot.lane.b32.xlu0 %v1004_v1, %s2471_s5  ;;  %v1299_v49 = vsel %vm402_vm6, %v1298_v47, %v2638_v29  ;;  %v1446_v29 = vsel %vm400_vm5, %v1445_v55, %v2664_v43 }
 0x46a   :  { %v2893_v50 = vmul.f32 %v1299_v49, %v2660_v41  ;;  %v1447_v28 = vsel %vm402_vm6, %v1446_v29, %v2620_v25 }
 0x46b   :  { %v2927_v32 = vmul.f32 %v1447_v28, %v2660_v41 }
 0x46c   :  { %v1301_v44 = vsel %vm390_vm0, %v2893_v50, 0.0 }
 0x46d   :  { %1015 = vrot.lane.b32.xlu0 %v1004_v1, %s2469_s22 }
 0x471   :  { %1157 = vrot.lane.b32.xlu0 %v1152_v46, %s2471_s5 }
 0x475   :  { %1021 = vrot.lane.b32.xlu0 %v1004_v1, %s2470_s24 }
 0x479   :  { %1305 = vrot.lane.b32.xlu0 %v2893_v50, %s2471_s5 }
 0x47d   :  { %1027 = vrot.lane.b32.xlu0 %v1004_v1, %s2458_s10 }
 0x481   :  { %1169 = vrot.lane.b32.xlu0 %v1152_v46, %s2470_s24 }
 0x485   :  { %1311 = vrot.lane.b32.xlu0 %v2893_v50, %s2469_s22 }
 0x489   :  { %1033 = vrot.lane.b32.xlu0 %v1004_v1, %s2466_s20 }
 0x48d   :  { %1317 = vrot.lane.b32.xlu0 %v2893_v50, %s2470_s24 }
 0x491   :  { %1039 = vrot.lane.b32.xlu0 %v1004_v1, %s2468_s21 }
 0x495   :  { %1323 = vrot.lane.b32.xlu0 %v2893_v50, %s2458_s10 }
 0x499   :  { %1045 = vrot.lane.b32.xlu0 %v1004_v1, %s2467_s0  ;;  %v456_v1 = vsel %vm455_vm9, %v454_v63, %v2779_v8  ;;  %v755_v8 = vsel %vm451_vm7, %v2775_v5, %v2816_v31 }
 0x49a   :  { %v458_v14 = vsel %vm457_vm10, %v456_v1, %v2800_v20  ;;  %v756_v20 = vsel %vm453_vm8, %v755_v8, %v2818_v34 }
 0x49b   :  { %v460_v3 = vsel %vm459_vm11, %v458_v14, %v2802_v21  ;;  %v611_v21 = vsel %vm459_vm11, %v610_v18, %v2812_v27  ;;  %v757_v5 = vsel %vm455_vm9, %v756_v20, %v2787_v12 }
 0x49c   :  { %v462_v4 = vsel %vm461_vm12, %v460_v3, %v2781_v9  ;;  %v612_v9 = vsel %vm461_vm12, %v611_v21, %v2785_v11  ;;  %v758_v10 = vsel %vm457_vm10, %v757_v5, %v2820_v35 }
 0x49d   :  { %1329 = vrot.lane.b32.xlu0 %v2893_v50, %s2466_s20  ;;  %v2993_v23 = vsel %vm463_vm13, %v462_v4, %v2804_v22  ;;  %v759_v26 = vsel %vm459_vm11, %v758_v10, %v2822_v36  ;;  %v3007_v22 = vsel %vm463_vm13, %v612_v9, %v2814_v30 }
 0x49e   :  { %v466_v24 = vsel %vm465_vm14, %v2993_v23, -inf  ;;  %v760_v12 = vsel %vm461_vm12, %v759_v26, %v2789_v13  ;;  %v614_v11 = vsel %vm465_vm14, %v3007_v22, -inf }
 0x49f   :  { %v3015_v31 = vsel %vm463_vm13, %v760_v12, %v2824_v37 }
 0x4a0   :  { %v762_v35 = vsel %vm465_vm14, %v3015_v31, -inf }
 0x4a1   :  { %1193 = vrot.lane.b32.xlu0 %v1152_v46, %s2467_s0 }
 0x4a5   :  { %1477 = vrot.lane.b32.xlu0 %v2927_v32, %s2466_s20 }
 0x4a9   :  { %1483 = vrot.lane.b32.xlu0 %v2927_v32, %s2468_s21 }
 0x4c8   :  { %1006 = vadd.xlane.f32.xlu0 %v1005_v33 }
 0x4d8   :  { %v2936_v39 = vpop.xlane.xlu0 %889 }
 0x4dc   :  { %v892_v43 = vpop.permute.xlu0 %891 }
 0x4dd   :  { %v894_v25 = vsel %vm390_vm0, %v892_v43, 0.0 }
 0x4de   :  { %895 = vadd.xlane.f32.xlu1 %v894_v25 }
 0x4e0   :  { %v2939_v56 = vpop.permute.xlu0 %897 }
 0x4e4   :  { %v1010_v41 = vpop.permute.xlu0 %1009 }
 0x4e5   :  { %v1012_v36 = vsel %vm390_vm0, %v1010_v41, 0.0 }
 0x4e8   :  { %v1016_v57 = vpop.permute.xlu0 %1015 }
 0x4e9   :  { %v1018_v58 = vsel %vm390_vm0, %v1016_v57, 0.0  ;;  %v1449_v57 = vsel %vm390_vm0, %v2927_v32, 0.0 }
 0x4ea   :  { %1019 = vadd.xlane.f32.xlu0 %v1018_v58 }
 0x4ec   :  { %v1158_v60 = vpop.permute.xlu0 %1157 }
 0x4ed   :  { %v1160_v61 = vsel %vm390_vm0, %v1158_v60, 0.0 }
 0x4ee   :  { %1154 = vadd.xlane.f32.xlu0 %v1153_v59 }
 0x4ef   :  { %1163 = vrot.lane.b32.xlu1 %v1152_v46, %s2469_s22 }
 0x4f0   :  { %v1022_v27 = vpop.permute.xlu0 %1021 }
 0x4f1   :  { %v1024_v15 = vsel %vm390_vm0, %v1022_v27, 0.0 }
 0x4f2   :  { %1161 = vadd.xlane.f32.xlu0 %v1160_v61 }
 0x4f3   :  { %1453 = vrot.lane.b32.xlu1 %v2927_v32, %s2471_s5 }
 0x4f4   :  { %v1306_v34 = vpop.permute.xlu0 %1305 }
 0x4f7   :  { %1175 = vrot.lane.b32.xlu1 %v1152_v46, %s2458_s10 }
 0x4f8   :  { %v1028_v30 = vpop.permute.xlu0 %1027 }
 0x4f9   :  { %v1030_v37 = vsel %vm390_vm0, %v1028_v30, 0.0  ;;  %v2246_v30 = vld [vmem:[#allocation2 + $0x8] ss:$12 sps:$4 sm:$0xff]  }
 0x4fb   :  { %1459 = vrot.lane.b32.xlu1 %v2927_v32, %s2469_s22 }
 0x4fc   :  { %v1170_v13 = vpop.permute.xlu0 %1169 }
 0x4fd   :  { %v1172_v43 = vsel %vm390_vm0, %v1170_v13, 0.0  ;;  %v2247_v13 = vld [vmem:[#allocation2 + $0x20] ss:$12 sps:$4 sm:$0xff]  }
 0x4ff   :  { %1181 = vrot.lane.b32.xlu1 %v1152_v46, %s2466_s20 }
 0x500   :  { %v1312_v45 = vpop.permute.xlu0 %1311 }
 0x503   :  { %1465 = vrot.lane.b32.xlu1 %v2927_v32, %s2470_s24 }
 0x504   :  { %v1034_v47 = vpop.permute.xlu0 %1033 }
 0x505   :  { %v1036_v61 = vsel %vm390_vm0, %v1034_v47, 0.0 }
 0x507   :  { %1187 = vrot.lane.b32.xlu1 %v1152_v46, %s2468_s21  ;;  %v1314_v46 = vsel %vm390_vm0, %v1312_v45, 0.0  ;;  %v2250_v45 = vld [vmem:[#allocation2 + $0x68] ss:$12 sps:$4 sm:$0xff]  }
 0x508   :  { %v1318_v49 = vpop.permute.xlu0 %1317 }
 0x509   :  { %v1320_v2 = vsel %vm390_vm0, %v1318_v49, 0.0  ;;  %v2252_v49 = vld [vmem:[#allocation2 + $0x98] ss:$12 sps:$4 sm:$0xff]  }
 0x50b   :  { %1471 = vrot.lane.b32.xlu1 %v2927_v32, %s2458_s10 }
 0x50c   :  { %v1040_v54 = vpop.permute.xlu0 %1039 }
 0x50d   :  { %v1042_v62 = vsel %vm390_vm0, %v1040_v54, 0.0 }
 0x50f   :  { %1335 = vrot.lane.b32.xlu1 %v2893_v50, %s2468_s21 }
 0x510   :  { %v1324_v28 = vpop.permute.xlu0 %1323 }
 0x511   :  { %v1326_v14 = vsel %vm390_vm0, %v1324_v28, 0.0 }
 0x513   :  { %1341 = vrot.lane.b32.xlu1 %v2893_v50, %s2467_s0  ;;  %v1308_v50 = vsel %vm390_vm0, %v1306_v34, 0.0 }
 0x514   :  { %v1046_v59 = vpop.permute.xlu0 %1045 }
 0x515   :  { %v1048_v7 = vsel %vm390_vm0, %v1046_v59, 0.0 }
 0x517   :  { %1489 = vrot.lane.b32.xlu1 %v2927_v32, %s2467_s0  ;;  %v900_v32 = vsel %vm390_vm0, %v2939_v56, 0.0 }
 0x518   :  { %v1330_v63 = vpop.permute.xlu0 %1329 }
 0x519   :  { %v1332_v4 = vsel %vm390_vm0, %v1330_v63, 0.0 }
 0x51c   :  { %v1194_v3 = vpop.permute.xlu0 %1193 }
 0x51d   :  { %v1196_v5 = vsel %vm390_vm0, %v1194_v3, 0.0 }
 0x520   :  { %v1478_v18 = vpop.permute.xlu0 %1477 }
 0x521   :  { %v1480_v9 = vsel %vm390_vm0, %v1478_v18, 0.0 }
 0x524   :  { %v1484_v10 = vpop.permute.xlu0 %1483 }
 0x525   :  { %v1486_v27 = vsel %vm390_vm0, %v1484_v10, 0.0 }
 0x53b   :  { %467 = vmax.xlane.f32.xlu1 %v466_v24 }
 0x53f   :  { %615 = vmax.xlane.f32.xlu1 %v614_v11 }
 0x543   :  { %763 = vmax.xlane.f32.xlu1 %v762_v35 }
 0x547   :  { %1013 = vadd.xlane.f32.xlu1 %v1012_v36 }
 0x54b   :  { %1025 = vadd.xlane.f32.xlu1 %v1024_v15  ;;  %v2472_v15 = vmov 0.0  }
 0x54c   :  { %2064 = vmatprep.subr.bf16.mxu1 %v2472_v15  ;;  %2080 = vmatprep.mubr.msk.bf16.mxu1 %vm2473_vm15, %v2472_v15 }
 0x54d   :  { %2065 = vmatpush3.bf16.msra.mxu1 %v2246_v30  ;;  %2084 = vmatprep.subr.bf16.mxu0 %v2472_v15 }
 0x54e   :  { %2066 = vmatprep.subr.bf16.mxu1 %v2472_v15  ;;  %2100 = vmatprep.mubr.msk.bf16.mxu0 %vm2473_vm15, %v2472_v15 }
 0x54f   :  { %1302 = vadd.xlane.f32.xlu1 %v1301_v44  ;;  %v2248_v44 = vld [vmem:[#allocation2 + $0x38] ss:$12 sps:$4 sm:$0xff]  }
 0x551   :  { %2067 = vmatpush3.bf16.msra.mxu1 %v2247_v13 }
 0x552   :  { %2068 = vmatprep.subr.bf16.mxu1 %v2472_v15 }
 0x553   :  { %1031 = vadd.xlane.f32.xlu1 %v1030_v37  ;;  %v2249_v37 = vld [vmem:[#allocation2 + $0x50] ss:$12 sps:$4 sm:$0xff]  }
 0x555   :  { %2069 = vmatpush3.bf16.msra.mxu1 %v2248_v44 }
 0x556   :  { %2070 = vmatprep.subr.bf16.mxu1 %v2472_v15 }
 0x557   :  { %1315 = vadd.xlane.f32.xlu1 %v1314_v46  ;;  %v2251_v46 = vld [vmem:[#allocation2 + $0x80] ss:$12 sps:$4 sm:$0xff]  }
 0x559   :  { %2071 = vmatpush3.bf16.msra.mxu1 %v2249_v37 }
 0x55a   :  { %2072 = vmatprep.subr.bf16.mxu1 %v2472_v15 }
 0x55d   :  { %2073 = vmatpush3.bf16.msra.mxu1 %v2250_v45 }
 0x55e   :  { %2074 = vmatprep.subr.bf16.mxu1 %v2472_v15 }
 0x561   :  { %2075 = vmatpush3.bf16.msra.mxu1 %v2251_v46 }
 0x562   :  { %2076 = vmatprep.subr.bf16.mxu1 %v2472_v15 }
 0x565   :  { %2077 = vmatpush3.bf16.msra.mxu1 %v2252_v49 }
 0x566   :  { %2078 = vmatprep.subr.bf16.mxu1 %v2472_v15 }
 0x56b   :  { %v3025_v51 = vpop.xlane.xlu1 %895 }
 0x56f   :  { %v1164_v52 = vpop.permute.xlu1 %1163 }
 0x570   :  { %v1166_v53 = vsel %vm390_vm0, %v1164_v52, 0.0 }
 0x571   :  { %1167 = vadd.xlane.f32.xlu0 %v1166_v53  ;;  %v2253_v53 = vld [vmem:[#allocation2 + $0xb0] ss:$12 sps:$4 sm:$0xff]  }
 0x572   :  { %2079 = vmatpush3.bf16.msra.mxu1 %v2253_v53 }
 0x573   :  { %v1454_v55 = vpop.permute.xlu1 %1453  ;;  %2104 = vmatprep.subr.bf16.mxu1 %v2472_v15 }
 0x574   :  { %v1456_v29 = vsel %vm390_vm0, %v1454_v55, 0.0 }
 0x575   :  { %1309 = vadd.xlane.f32.xlu0 %v1308_v50  ;;  %1457 = vadd.xlane.f32.xlu1 %v1456_v29  ;;  %v1007_v50 = vpop.xlane.xlu0 %1006 }
 0x576   :  { %2081 = vmatmul.mubr.bf16.vlgmr.msra.gmra.mrb[0].mxu1 %v2614_v17 }
 0x577   :  { %v1176_v33 = vpop.permute.xlu1 %1175  ;;  %2120 = vmatprep.mubr.msk.bf16.mxu1 %vm2473_vm15, %v2472_v15 }
 0x578   :  { %v1178_v25 = vsel %vm390_vm0, %v1176_v33, 0.0 }
 0x579   :  { %1173 = vadd.xlane.f32.xlu0 %v1172_v43  ;;  %1179 = vadd.xlane.f32.xlu1 %v1178_v25  ;;  %v1020_v28 = vpop.xlane.xlu0 %1019 }
 0x57b   :  { %v1460_v41 = vpop.permute.xlu1 %1459 }
 0x57c   :  { %v1462_v58 = vsel %vm390_vm0, %v1460_v41, 0.0 }
 0x57d   :  { %1450 = vadd.xlane.f32.xlu0 %v1449_v57  ;;  %1463 = vadd.xlane.f32.xlu1 %v1462_v58  ;;  %v1155_v43 = vpop.xlane.xlu0 %1154 }
 0x57f   :  { %v1182_v60 = vpop.permute.xlu1 %1181 }
 0x580   :  { %v1184_v8 = vsel %vm390_vm0, %v1182_v60, 0.0 }
 0x581   :  { %1037 = vadd.xlane.f32.xlu0 %v1036_v61  ;;  %1043 = vadd.xlane.f32.xlu1 %v1042_v62  ;;  %v1162_v41 = vpop.xlane.xlu0 %1161 }
 0x583   :  { %v1466_v1 = vpop.permute.xlu1 %1465 }
 0x584   :  { %v1468_v21 = vsel %vm390_vm0, %v1466_v1, 0.0 }
 0x585   :  { %1321 = vadd.xlane.f32.xlu0 %v1320_v2  ;;  %1327 = vadd.xlane.f32.xlu1 %v1326_v14 }
 0x587   :  { %v1188_v16 = vpop.permute.xlu1 %1187 }
 0x588   :  { %v1190_v56 = vsel %vm390_vm0, %v1188_v16, 0.0 }
 0x589   :  { %901 = vadd.xlane.f32.xlu0 %v900_v32  ;;  %1049 = vadd.xlane.f32.xlu1 %v1048_v7  ;;  %v903_v7 = vsel %vm451_vm7, %v2777_v6, %v2826_v40 }
 0x58a   :  { %v904_v16 = vsel %vm453_vm8, %v903_v7, %v2828_v42 }
 0x58b   :  { %v1472_v20 = vpop.permute.xlu1 %1471 }
 0x58c   :  { %v1474_v26 = vsel %vm390_vm0, %v1472_v20, 0.0  ;;  %v905_v20 = vsel %vm455_vm9, %v904_v16, %v2834_v48 }
 0x58d   :  { %1185 = vadd.xlane.f32.xlu0 %v1184_v8  ;;  %1333 = vadd.xlane.f32.xlu1 %v1332_v4 }
 0x58f   :  { %v1336_v24 = vpop.permute.xlu1 %1335 }
 0x590   :  { %v1338_v11 = vsel %vm390_vm0, %v1336_v24, 0.0 }
 0x591   :  { %1469 = vadd.xlane.f32.xlu0 %v1468_v21  ;;  %1197 = vadd.xlane.f32.xlu1 %v1196_v5  ;;  %v906_v5 = vsel %vm457_vm10, %v905_v20, %v2934_v38 }
 0x592   :  { %v907_v6 = vsel %vm459_vm11, %v906_v5, %v2936_v39 }
 0x593   :  { %v1342_v12 = vpop.permute.xlu1 %1341  ;;  %v908_v40 = vsel %vm461_vm12, %v907_v6, %v3025_v51  ;;  %v1199_v51 = vsel %vm451_vm7, %v1155_v43, %v1162_v41 }
 0x594   :  { %v1344_v34 = vsel %vm390_vm0, %v1342_v12, 0.0 }
 0x595   :  { %1191 = vadd.xlane.f32.xlu0 %v1190_v56  ;;  %1481 = vadd.xlane.f32.xlu1 %v1480_v9 }
 0x597   :  { %v1490_v35 = vpop.permute.xlu1 %1489 }
 0x598   :  { %v1492_v36 = vsel %vm390_vm0, %v1490_v35, 0.0 }
 0x599   :  { %1475 = vadd.xlane.f32.xlu0 %v1474_v26  ;;  %1487 = vadd.xlane.f32.xlu1 %v1486_v27 }
 0x59d   :  { %1339 = vadd.xlane.f32.xlu0 %v1338_v11 }
 0x5a1   :  { %1345 = vadd.xlane.f32.xlu0 %v1344_v34 }
 0x5a5   :  { %1493 = vadd.xlane.f32.xlu0 %v1492_v36 }
 0x5c8   :  { %v3063_v47 = vpop.xlane.xlu1 %467 }
 0x5c9   :  { %v469_v30 = vsub.f32 %v2993_v23, %v3063_v47 }
 0x5cb   :  { %v470_v53 = vmul.f32 1.442695, %v469_v30 }
 0x5cc   :  { %v3067_v52 = vpop.xlane.xlu1 %615 }
 0x5cd   :  { %2278 = vpow2.f32 %v470_v53 }
 0x5d0   :  { %v3070_v54 = vpop.xlane.xlu1 %763 }
 0x5d4   :  { %v1014_v55 = vpop.xlane.xlu1 %1013 }
 0x5d5   :  { %v1051_v17 = vsel %vm451_vm7, %v1007_v50, %v1014_v55  ;;  %v617_v55 = vsub.f32 %v3007_v22, %v3067_v52 }
 0x5d6   :  { %v1052_v32 = vsel %vm453_vm8, %v1051_v17, %v1020_v28 }
 0x5d7   :  { %v618_v43 = vmul.f32 1.442695, %v617_v55 }
 0x5d8   :  { %v1026_v29 = vpop.xlane.xlu1 %1025 }
 0x5d9   :  { %v1053_v3 = vsel %vm455_vm9, %v1052_v32, %v1026_v29  ;;  %2280 = vpow2.f32 %v618_v43  ;;  %v2477_v43 = vmov 4  }
 0x5dc   :  { %v1303_v33 = vpop.xlane.xlu1 %1302 }
 0x5e0   :  { %v1032_v25 = vpop.xlane.xlu1 %1031 }
 0x5e1   :  { %v1054_v8 = vsel %vm457_vm10, %v1053_v3, %v1032_v25 }
 0x5e4   :  { %v1316_v57 = vpop.xlane.xlu1 %1315 }
 0x5fe   :  { %v1168_v58 = vpop.xlane.xlu0 %1167 }
 0x5ff   :  { %v1200_v26 = vsel %vm453_vm8, %v1199_v51, %v1168_v58 }
 0x602   :  { %v1458_v59 = vpop.xlane.xlu1 %1457  ;;  %v1310_v60 = vpop.xlane.xlu0 %1309 }
 0x603   :  { %v1347_v45 = vsel %vm451_vm7, %v1303_v33, %v1310_v60  ;;  %v765_v33 = vsub.f32 %v3015_v31, %v3070_v54 }
 0x604   :  { %v1348_v29 = vsel %vm453_vm8, %v1347_v45, %v1316_v57 }
 0x605   :  { %v766_v60 = vmul.f32 1.442695, %v765_v33 }
 0x606   :  { %v1180_v61 = vpop.xlane.xlu1 %1179  ;;  %v1174_v62 = vpop.xlane.xlu0 %1173 }
 0x607   :  { %v1201_v12 = vsel %vm455_vm9, %v1200_v26, %v1174_v62  ;;  %2282 = vpow2.f32 %v766_v60 }
 0x608   :  { %v1202_v34 = vsel %vm457_vm10, %v1201_v12, %v1180_v61 }
 0x60a   :  { %v1464_v63 = vpop.xlane.xlu1 %1463  ;;  %v1451_v1 = vpop.xlane.xlu0 %1450 }
 0x60b   :  { %v1495_v50 = vsel %vm451_vm7, %v1451_v1, %v1458_v59 }
 0x60c   :  { %v1496_v47 = vsel %vm453_vm8, %v1495_v50, %v1464_v63 }
 0x60e   :  { %v1044_v2 = vpop.xlane.xlu1 %1043  ;;  %v1038_v14 = vpop.xlane.xlu0 %1037 }
 0x60f   :  { %v1055_v21 = vsel %vm459_vm11, %v1054_v8, %v1038_v14  ;;  %v2279_v14 = vpop.eup %2278 }
 0x610   :  { %v1056_v42 = vsel %vm461_vm12, %v1055_v21, %v1044_v2  ;;  %v472_v32 = vsel %vm465_vm14, %v2279_v14, 0.0  ;;  %v3136_v7 = vpop.eup %2280 }
 0x611   :  { %v620_v3 = vsel %vm465_vm14, %v3136_v7, 0.0  ;;  %v3140_v16 = vpop.eup %2282 }
 0x612   :  { %v1328_v4 = vpop.xlane.xlu1 %1327  ;;  %v1322_v18 = vpop.xlane.xlu0 %1321  ;;  %v768_v8 = vsel %vm465_vm14, %v3140_v16, 0.0 }
 0x613   :  { %v1349_v23 = vsel %vm455_vm9, %v1348_v29, %v1322_v18 }
 0x614   :  { %v1350_v58 = vsel %vm457_vm10, %v1349_v23, %v1328_v4  ;;  %v2474_v4 = vmov 1   ;;  %v2475_v23 = vmov 2  }
 0x615   :  { %2171 = vset.pattern.permute.xlu0 %v2474_v4 }
 0x616   :  { %v1050_v56 = vpop.xlane.xlu1 %1049  ;;  %v902_v9 = vpop.xlane.xlu0 %901 }
 0x617   :  { %v3096_v10 = vsel %vm463_vm13, %v1056_v42, %v1050_v56  ;;  %v3099_v48 = vsel %vm463_vm13, %v908_v40, %v902_v9 }
 0x618   :  { %v1058_v24 = vsel %vm465_vm14, %v3096_v10, -inf  ;;  %v910_v38 = vsel %vm465_vm14, %v3099_v48, -inf }
 0x619   :  { %1059 = vmax.xlane.f32.xlu0 %v1058_v24  ;;  %911 = vmax.xlane.f32.xlu1 %v910_v38 }
 0x61a   :  { %v1186_v39 = vpop.xlane.xlu0 %1185  ;;  %v1334_v27 = vpop.xlane.xlu1 %1333 }
 0x61b   :  { %v1203_v35 = vsel %vm459_vm11, %v1202_v34, %v1186_v39  ;;  %v1351_v52 = vsel %vm459_vm11, %v1350_v58, %v1334_v27 }
 0x61e   :  { %v1470_v11 = vpop.xlane.xlu0 %1469  ;;  %v1198_v13 = vpop.xlane.xlu1 %1197 }
 0x61f   :  { %v1497_v25 = vsel %vm455_vm9, %v1496_v47, %v1470_v11  ;;  %v2476_v47 = vmov 3  }
 0x622   :  { %v1192_v36 = vpop.xlane.xlu0 %1191  ;;  %v1482_v41 = vpop.xlane.xlu1 %1481 }
 0x623   :  { %v1204_v44 = vsel %vm461_vm12, %v1203_v35, %v1192_v36 }
 0x624   :  { %v1205_v37 = vsel %vm463_vm13, %v1204_v44, %v1198_v13 }
 0x625   :  { %v1206_v46 = vsel %vm465_vm14, %v1205_v37, -inf }
 0x626   :  { %1207 = vmax.xlane.f32.xlu1 %v1206_v46  ;;  %v1476_v49 = vpop.xlane.xlu0 %1475  ;;  %v1488_v54 = vpop.xlane.xlu1 %1487 }
 0x627   :  { %v1498_v22 = vsel %vm457_vm10, %v1497_v25, %v1476_v49  ;;  %v2478_v25 = vmov 5  }
 0x628   :  { %v1499_v61 = vsel %vm459_vm11, %v1498_v22, %v1482_v41  ;;  %v2479_v22 = vmov 6  }
 0x629   :  { %v1500_v63 = vsel %vm461_vm12, %v1499_v61, %v1488_v54 }
 0x62a   :  { %v1340_v28 = vpop.xlane.xlu0 %1339 }
 0x62b   :  { %v1352_v57 = vsel %vm461_vm12, %v1351_v52, %v1340_v28 }
 0x62e   :  { %v1346_v59 = vpop.xlane.xlu0 %1345 }
 0x62f   :  { %v1353_v62 = vsel %vm463_vm13, %v1352_v57, %v1346_v59  ;;  %v2480_v57 = vmov 7  }
 0x630   :  { %v1354_v31 = vsel %vm465_vm14, %v1353_v62, -inf }
 0x631   :  { %1355 = vmax.xlane.f32.xlu0 %v1354_v31 }
 0x632   :  { %v1494_v1 = vpop.xlane.xlu0 %1493 }
 0x633   :  { %v1501_v17 = vsel %vm463_vm13, %v1500_v63, %v1494_v1 }
 0x634   :  { %v1502_v2 = vsel %vm465_vm14, %v1501_v17, -inf }
 0x635   :  { %1503 = vmax.xlane.f32.xlu1 %v1502_v2 }
 0x639   :  { %473 = vadd.xlane.f32.xlu1 %v472_v32 }
 0x63d   :  { %621 = vadd.xlane.f32.xlu1 %v620_v3 }
 0x641   :  { %769 = vadd.xlane.f32.xlu1 %v768_v8  ;;  %v154_v8 = vsub.s32 2, %v2617_v19 }
 0x6a6   :  { %v912_v18 = vpop.xlane.xlu1 %911  ;;  %v1060_v20 = vpop.xlane.xlu0 %1059 }
 0x6a7   :  { %v913_v21 = vsub.f32 %v3099_v48, %v912_v18  ;;  %v1061_v5 = vsub.f32 %v3096_v10, %v1060_v20 }
 0x6a9   :  { %v914_v6 = vmul.f32 1.442695, %v913_v21  ;;  %v1062_v40 = vmul.f32 1.442695, %v1061_v5  ;;  %v2314_v5 = vld [vmem:[#allocation4] sm:$0x7] }
 0x6ab   :  { %2284 = vpow2.f32 %v914_v6  ;;  %v155_v6 = vrot.slane %v2314_v5, %v154_v8 }
 0x6ac   :  { %2286 = vpow2.f32 %v1062_v40 }
 0x6b3   :  { %v1208_v56 = vpop.xlane.xlu1 %1207 }
 0x6b4   :  { %v1209_v42 = vsub.f32 %v1205_v37, %v1208_v56  ;;  %v3165_v37 = vpop.f32.mrb[0].mxu1 }
 0x6b5   :  { %v3147_v9 = vpop.eup %2284  ;;  %v2082_v49 = vpop.f32.mrb[1].mxu1  ;;  %v3229_v19 = vadd.f32 %v3165_v37, %v155_v6 }
 0x6b6   :  { %v3149_v24 = vpop.eup %2286  ;;  %v1210_v38 = vmul.f32 1.442695, %v1209_v42  ;;  %v916_v39 = vsel %vm465_vm14, %v3147_v9, 0.0  ;;  %v365_v55 = vpop.f32.mrb[2].mxu1 }
 0x6b7   :  { %917 = vadd.xlane.f32.xlu0 %v916_v39  ;;  %v1064_v48 = vsel %vm465_vm14, %v3149_v24, 0.0  ;;  %v2083_v50 = vpop.f32.mrb[3].mxu1 }
 0x6b8   :  { %2288 = vpow2.f32 %v1210_v38  ;;  %1065 = vadd.xlane.f32.xlu1 %v1064_v48 }
 0x6be   :  { %v1356_v10 = vpop.xlane.xlu0 %1355 }
 0x6bf   :  { %v1357_v51 = vsub.f32 %v1353_v62, %v1356_v10 }
 0x6c1   :  { %v1358_v26 = vmul.f32 1.442695, %v1357_v51 }
 0x6c2   :  { %v3155_v27 = vpop.eup %2288  ;;  %v1504_v12 = vpop.xlane.xlu1 %1503 }
 0x6c3   :  { %2290 = vpow2.f32 %v1358_v26  ;;  %v1505_v11 = vsub.f32 %v1501_v17, %v1504_v12  ;;  %v1212_v34 = vsel %vm465_vm14, %v3155_v27, 0.0 }
 0x6c4   :  { %1213 = vadd.xlane.f32.xlu0 %v1212_v34 }
 0x6c5   :  { %v1506_v35 = vmul.f32 1.442695, %v1505_v11 }
 0x6c6   :  { %v474_v36 = vpop.xlane.xlu1 %473 }
 0x6c7   :  { %2292 = vpow2.f32 %v1506_v35 }
 0x6c8   :  { %2294 = vrcp.f32 %v474_v36 }
 0x6ca   :  { %v622_v29 = vpop.xlane.xlu1 %621 }
 0x6cb   :  { %2296 = vrcp.f32 %v622_v29 }
 0x6cd   :  { %v3159_v30 = vpop.eup %2290 }
 0x6ce   :  { %v1360_v13 = vsel %vm465_vm14, %v3159_v30, 0.0  ;;  %v770_v28 = vpop.xlane.xlu1 %769 }
 0x6cf   :  { %1361 = vadd.xlane.f32.xlu0 %v1360_v13  ;;  %2298 = vrcp.f32 %v770_v28 }
 0x6d1   :  { %v3163_v44 = vpop.eup %2292 }
 0x6d2   :  { %v2295_v45 = vpop.eup %2294  ;;  %v1508_v46 = vsel %vm465_vm14, %v3163_v44, 0.0 }
 0x6d3   :  { %v476_v53 = vmul.f32 %v2295_v45, %v2279_v14  ;;  %1509 = vadd.xlane.f32.xlu0 %v1508_v46 }
 0x6d5   :  { %479 = vperm.xlu1 %2170, %v476_v53   ;;  %v2297_v33 = vpop.eup %2296 }
 0x6d6   :  { %v624_v41 = vmul.f32 %v2297_v33, %v3136_v7 }
 0x6d9   :  { %2172 = vset.pattern.permute.xlu1 %v2475_v23  ;;  %v2299_v58 = vpop.eup %2298 }
 0x6da   :  { %494 = vperm.xlu1 %2172, %v476_v53   ;;  %v772_v52 = vmul.f32 %v2299_v58, %v3140_v16 }
 0x6de   :  { %2173 = vset.pattern.permute.xlu1 %v2476_v47 }
 0x6df   :  { %504 = vperm.xlu1 %2173, %v476_v53  }
 0x6e3   :  { %2174 = vset.pattern.permute.xlu1 %v2477_v43 }
 0x6e4   :  { %514 = vperm.xlu1 %2174, %v476_v53  }
 0x6e8   :  { %2175 = vset.pattern.permute.xlu1 %v2478_v25 }
 0x6e9   :  { %524 = vperm.xlu1 %2175, %v476_v53   ;;  %484 = vperm.xlu0 %2171, %v476_v53  }
 0x6ed   :  { %2176 = vset.pattern.permute.xlu1 %v2479_v22  ;;  %632 = vperm.xlu0 %2171, %v624_v41  }
 0x6ee   :  { %534 = vperm.xlu1 %2176, %v476_v53  }
 0x6f1   :  { %780 = vperm.xlu0 %2171, %v772_v52  }
 0x6f2   :  { %2177 = vset.pattern.permute.xlu1 %v2480_v57 }
 0x6f3   :  { %544 = vperm.xlu1 %2177, %v476_v53  }
 0x6f7   :  { %2178 = vset.pattern.permute.xlu1 %v2465_v0 }
 0x6f8   :  { %627 = vperm.xlu1 %2178, %v624_v41  }
 0x6fc   :  { %2179 = vset.pattern.permute.xlu1 %v2475_v23 }
 0x6fd   :  { %642 = vperm.xlu1 %2179, %v624_v41  }
 0x701   :  { %2180 = vset.pattern.permute.xlu1 %v2476_v47 }
 0x702   :  { %652 = vperm.xlu1 %2180, %v624_v41  }
 0x706   :  { %2181 = vset.pattern.permute.xlu1 %v2477_v43 }
 0x707   :  { %662 = vperm.xlu1 %2181, %v624_v41  }
 0x70b   :  { %2182 = vset.pattern.permute.xlu1 %v2478_v25 }
 0x70c   :  { %672 = vperm.xlu1 %2182, %v624_v41  }
 0x710   :  { %2183 = vset.pattern.permute.xlu1 %v2479_v22 }
 0x711   :  { %682 = vperm.xlu1 %2183, %v624_v41  }
 0x715   :  { %2184 = vset.pattern.permute.xlu1 %v2480_v57 }
 0x716   :  { %692 = vperm.xlu1 %2184, %v624_v41  }
 0x71a   :  { %2185 = vset.pattern.permute.xlu1 %v2465_v0 }
 0x71b   :  { %775 = vperm.xlu1 %2185, %v772_v52  }
 0x71f   :  { %2186 = vset.pattern.permute.xlu1 %v2475_v23 }
 0x720   :  { %790 = vperm.xlu1 %2186, %v772_v52  }
 0x724   :  { %2187 = vset.pattern.permute.xlu1 %v2476_v47 }
 0x725   :  { %800 = vperm.xlu1 %2187, %v772_v52  }
 0x729   :  { %2188 = vset.pattern.permute.xlu1 %v2477_v43 }
 0x72a   :  { %810 = vperm.xlu1 %2188, %v772_v52  }
 0x72e   :  { %2189 = vset.pattern.permute.xlu1 %v2478_v25 }
 0x72f   :  { %820 = vperm.xlu1 %2189, %v772_v52  }
 0x733   :  { %2190 = vset.pattern.permute.xlu1 %v2479_v22 }
 0x734   :  { %830 = vperm.xlu1 %2190, %v772_v52  }
 0x738   :  { %2191 = vset.pattern.permute.xlu1 %v2480_v57 }
 0x739   :  { %840 = vperm.xlu1 %2191, %v772_v52  }
 0x73d   :  { %2192 = vset.pattern.permute.xlu1 %v2465_v0 }
 0x744   :  { %v918_v59 = vpop.xlane.xlu0 %917 }
 0x745   :  { %2300 = vrcp.f32 %v918_v59  ;;  %v1066_v60 = vpop.xlane.xlu1 %1065 }
 0x746   :  { %2302 = vrcp.f32 %v1066_v60 }
 0x74f   :  { %v2301_v61 = vpop.eup %2300 }
 0x750   :  { %v920_v62 = vmul.f32 %v2301_v61, %v3147_v9  ;;  %v2303_v63 = vpop.eup %2302 }
 0x751   :  { %v1214_v31 = vpop.xlane.xlu0 %1213  ;;  %v3200_v17 = vmul.f32 %v2303_v63, %v3149_v24 }
 0x752   :  { %2304 = vrcp.f32 %v1214_v31  ;;  %928 = vperm.xlu0 %2171, %v920_v62   ;;  %923 = vperm.xlu1 %2192, %v920_v62  }
 0x754   :  { %v3193_v54 = vpop.permute.xlu1 %479 }
 0x756   :  { %2194 = vset.pattern.permute.xlu0 %v2476_v47  ;;  %2193 = vset.pattern.permute.xlu1 %v2475_v23 }
 0x757   :  { %948 = vperm.xlu0 %2194, %v920_v62   ;;  %938 = vperm.xlu1 %2193, %v920_v62  }
 0x759   :  { %v3197_v1 = vpop.permute.xlu1 %494 }
 0x75a   :  { %v497_v55 = vmul.f32 %v3197_v1, %v3229_v19 }
 0x75b   :  { %2200 = vset.pattern.permute.xlu0 %v2474_v4  ;;  %2195 = vset.pattern.permute.xlu1 %v2477_v43 }
 0x75c   :  { %v2305_v2 = vpop.eup %2304  ;;  %1076 = vperm.xlu0 %2200, %v3200_v17   ;;  %958 = vperm.xlu1 %2195, %v920_v62   ;;  %v1362_v14 = vpop.xlane.xlu0 %1361 }
 0x75d   :  { %v3206_v32 = vmul.f32 %v2305_v2, %v3155_v27  ;;  %2306 = vrcp.f32 %v1362_v14 }
 0x75e   :  { %v3208_v7 = vpop.permute.xlu1 %504 }
 0x75f   :  { %v507_v29 = vmul.f32 %v3208_v7, %v3229_v19 }
 0x760   :  { %2196 = vset.pattern.permute.xlu1 %v2478_v25  ;;  %1224 = vperm.xlu0 %2200, %v3206_v32   ;;  %v1510_v3 = vpop.xlane.xlu0 %1509 }
 0x761   :  { %2308 = vrcp.f32 %v1510_v3  ;;  %968 = vperm.xlu1 %2196, %v920_v62  }
 0x763   :  { %v3212_v16 = vpop.permute.xlu1 %514 }
 0x764   :  { %2208 = vset.pattern.permute.xlu0 %v2475_v23 }
 0x765   :  { %2197 = vset.pattern.permute.xlu1 %v2479_v22  ;;  %1234 = vperm.xlu0 %2208, %v3206_v32  }
 0x766   :  { %978 = vperm.xlu1 %2197, %v920_v62  }
 0x767   :  { %v2307_v18 = vpop.eup %2306 }
 0x768   :  { %v3219_v20 = vmul.f32 %v2307_v18, %v3159_v30  ;;  %v3221_v21 = vpop.permute.xlu1 %524  ;;  %v485_v37 = vpop.permute.xlu0 %484 }
 0x769   :  { %v527_v41 = vmul.f32 %v3221_v21, %v3229_v19 }
 0x76a   :  { %2198 = vset.pattern.permute.xlu1 %v2480_v57  ;;  %1382 = vperm.xlu0 %2208, %v3219_v20  }
 0x76b   :  { %v2309_v40 = vpop.eup %2308  ;;  %988 = vperm.xlu1 %2198, %v920_v62  }
 0x76c   :  { %v3226_v56 = vmul.f32 %v2309_v40, %v3163_v44  ;;  %v633_v58 = vpop.permute.xlu0 %632 }
 0x76d   :  { %v535_v42 = vpop.permute.xlu1 %534  ;;  %v635_v60 = vmul.f32 %v633_v58, %v3229_v19 }
 0x76e   :  { %1530 = vperm.xlu0 %2208, %v3226_v56   ;;  %v537_v9 = vmul.f32 %v535_v42, %v3229_v19 }
 0x76f   :  { %2199 = vset.pattern.permute.xlu1 %v2465_v0 }
 0x770   :  { %1071 = vperm.xlu1 %2199, %v3200_v17   ;;  %v781_v62 = vpop.permute.xlu0 %780 }
 0x771   :  { %v783_v31 = vmul.f32 %v781_v62, %v3229_v19 }
 0x772   :  { %v545_v24 = vpop.permute.xlu1 %544  ;;  %539 = vrot.lane.b32.xlu0 %v537_v9, %s2468_s21 }
 0x773   :  { %2211 = vset.pattern.permute.xlu0 %v2477_v43  ;;  %v547_v38 = vmul.f32 %v545_v24, %v3229_v19 }
 0x774   :  { %2201 = vset.pattern.permute.xlu1 %v2475_v23 }
 0x775   :  { %1086 = vperm.xlu1 %2201, %v3200_v17  }
 0x776   :  { %549 = vrot.lane.b32.xlu0 %v547_v38, %s2467_s0 }
 0x777   :  { %v3241_v39 = vpop.permute.xlu1 %627 }
 0x779   :  { %2202 = vset.pattern.permute.xlu1 %v2476_v47 }
 0x77a   :  { %1096 = vperm.xlu1 %2202, %v3200_v17  }
 0x77c   :  { %v3245_v48 = vpop.permute.xlu1 %642 }
 0x77d   :  { %v645_v61 = vmul.f32 %v3245_v48, %v3229_v19 }
 0x77e   :  { %2203 = vset.pattern.permute.xlu1 %v2477_v43 }
 0x77f   :  { %1106 = vperm.xlu1 %2203, %v3200_v17  }
 0x781   :  { %v653_v10 = vpop.permute.xlu1 %652 }
 0x782   :  { %v655_v51 = vmul.f32 %v653_v10, %v3229_v19 }
 0x783   :  { %2204 = vset.pattern.permute.xlu1 %v2478_v25 }
 0x784   :  { %657 = vrot.lane.b32.xlu0 %v655_v51, %s2470_s24  ;;  %1116 = vperm.xlu1 %2204, %v3200_v17  }
 0x786   :  { %v663_v26 = vpop.permute.xlu1 %662 }
 0x787   :  { %v665_v27 = vmul.f32 %v663_v26, %v3229_v19 }
 0x788   :  { %2205 = vset.pattern.permute.xlu1 %v2479_v22 }
 0x789   :  { %667 = vrot.lane.b32.xlu0 %v665_v27, %s2458_s10  ;;  %1126 = vperm.xlu1 %2205, %v3200_v17  }
 0x78b   :  { %v673_v12 = vpop.permute.xlu1 %672 }
 0x78c   :  { %v675_v11 = vmul.f32 %v673_v12, %v3229_v19 }
 0x78d   :  { %2206 = vset.pattern.permute.xlu1 %v2480_v57 }
 0x78e   :  { %677 = vrot.lane.b32.xlu0 %v675_v11, %s2466_s20  ;;  %1136 = vperm.xlu1 %2206, %v3200_v17  }
 0x790   :  { %v683_v34 = vpop.permute.xlu1 %682 }
 0x791   :  { %v685_v35 = vmul.f32 %v683_v34, %v3229_v19 }
 0x792   :  { %2207 = vset.pattern.permute.xlu1 %v2465_v0 }
 0x793   :  { %687 = vrot.lane.b32.xlu0 %v685_v35, %s2468_s21  ;;  %1219 = vperm.xlu1 %2207, %v3206_v32  }
 0x795   :  { %v693_v36 = vpop.permute.xlu1 %692 }
 0x796   :  { %v695_v30 = vmul.f32 %v693_v36, %v3229_v19 }
 0x797   :  { %2209 = vset.pattern.permute.xlu1 %v2474_v4  ;;  %v487_v4 = vmul.f32 %v485_v37, %v3229_v19 }
 0x798   :  { %697 = vrot.lane.b32.xlu0 %v695_v30, %s2467_s0  ;;  %1372 = vperm.xlu1 %2209, %v3219_v20  }
 0x79a   :  { %v3269_v13 = vpop.permute.xlu1 %775 }
 0x79c   :  { %1520 = vperm.xlu1 %2209, %v3226_v56  }
 0x79f   :  { %v791_v44 = vpop.permute.xlu1 %790 }
 0x7a0   :  { %2210 = vset.pattern.permute.xlu1 %v2476_v47  ;;  %v517_v47 = vmul.f32 %v3212_v16, %v3229_v19  ;;  %v793_v63 = vmul.f32 %v791_v44, %v3229_v19 }
 0x7a1   :  { %1244 = vperm.xlu1 %2210, %v3206_v32  }
 0x7a4   :  { %v801_v45 = vpop.permute.xlu1 %800 }
 0x7a5   :  { %v803_v46 = vmul.f32 %v801_v45, %v3229_v19  ;;  %1392 = vperm.xlu1 %2210, %v3219_v20  }
 0x7a7   :  { %805 = vrot.lane.b32.xlu0 %v803_v46, %s2470_s24 }
 0x7a9   :  { %v811_v49 = vpop.permute.xlu1 %810  ;;  %489 = vrot.lane.b32.xlu1 %v487_v4, %s2471_s5 }
 0x7aa   :  { %v813_v53 = vmul.f32 %v811_v49, %v3229_v19 }
 0x7ac   :  { %815 = vrot.lane.b32.xlu0 %v813_v53, %s2458_s10 }
 0x7ad   :  { %499 = vrot.lane.b32.xlu1 %v497_v55, %s2469_s22 }
 0x7ae   :  { %v821_v50 = vpop.permute.xlu1 %820 }
 0x7af   :  { %v823_v23 = vmul.f32 %v821_v50, %v3229_v19 }
 0x7b1   :  { %825 = vrot.lane.b32.xlu0 %v823_v23, %s2466_s20  ;;  %509 = vrot.lane.b32.xlu1 %v507_v29, %s2470_s24 }
 0x7b3   :  { %v831_v28 = vpop.permute.xlu1 %830 }
 0x7b4   :  { %v833_v33 = vmul.f32 %v831_v28, %v3229_v19 }
 0x7b5   :  { %519 = vrot.lane.b32.xlu1 %v517_v47, %s2458_s10 }
 0x7b6   :  { %835 = vrot.lane.b32.xlu0 %v833_v33, %s2468_s21 }
 0x7b8   :  { %v841_v52 = vpop.permute.xlu1 %840 }
 0x7b9   :  { %v843_v59 = vmul.f32 %v841_v52, %v3229_v19  ;;  %529 = vrot.lane.b32.xlu1 %v527_v41, %s2466_s20 }
 0x7bb   :  { %845 = vrot.lane.b32.xlu0 %v843_v59, %s2467_s0 }
 0x7bd   :  { %637 = vrot.lane.b32.xlu1 %v635_v60, %s2471_s5 }
 0x7c1   :  { %647 = vrot.lane.b32.xlu1 %v645_v61, %s2469_s22 }
 0x7c5   :  { %785 = vrot.lane.b32.xlu1 %v783_v31, %s2471_s5 }
 0x7c9   :  { %795 = vrot.lane.b32.xlu1 %v793_v63, %s2469_s22 }
 0x7d1   :  { %v3308_v1 = vpop.permute.xlu1 %923  ;;  %v929_v17 = vpop.permute.xlu0 %928 }
 0x7d2   :  { %v931_v2 = vmul.f32 %v929_v17, %v3229_v19 }
 0x7d4   :  { %933 = vrot.lane.b32.xlu1 %v931_v2, %s2471_s5 }
 0x7d6   :  { %v939_v14 = vpop.permute.xlu1 %938  ;;  %v949_v7 = vpop.permute.xlu0 %948 }
 0x7d7   :  { %v941_v3 = vmul.f32 %v939_v14, %v3229_v19  ;;  %v951_v16 = vmul.f32 %v949_v7, %v3229_v19 }
 0x7d9   :  { %943 = vrot.lane.b32.xlu1 %v941_v3, %s2469_s22 }
 0x7db   :  { %v959_v8 = vpop.permute.xlu1 %958  ;;  %v1077_v21 = vpop.permute.xlu0 %1076 }
 0x7dc   :  { %v961_v18 = vmul.f32 %v959_v8, %v3229_v19  ;;  %v1079_v5 = vmul.f32 %v1077_v21, %v3229_v19 }
 0x7dd   :  { %953 = vrot.lane.b32.xlu1 %v951_v16, %s2470_s24  ;;  %v630_v16 = vmul.f32 %v3241_v39, %v3229_v19 }
 0x7de   :  { %963 = vrot.lane.b32.xlu0 %v961_v18, %s2458_s10 }
 0x7df   :  { %v1225_v34 = vpop.permute.xlu0 %1224 }
 0x7e0   :  { %v969_v6 = vpop.permute.xlu1 %968  ;;  %v1227_v30 = vmul.f32 %v1225_v34, %v3229_v19 }
 0x7e1   :  { %v971_v40 = vmul.f32 %v969_v6, %v3229_v19  ;;  %1081 = vrot.lane.b32.xlu1 %v1079_v5, %s2471_s5 }
 0x7e3   :  { %973 = vrot.lane.b32.xlu0 %v971_v40, %s2466_s20 }
 0x7e4   :  { %v1235_v44 = vpop.permute.xlu0 %1234 }
 0x7e5   :  { %v979_v42 = vpop.permute.xlu1 %978 }
 0x7e6   :  { %v981_v9 = vmul.f32 %v979_v42, %v3229_v19 }
 0x7e8   :  { %983 = vrot.lane.b32.xlu0 %v981_v9, %s2468_s21  ;;  %v778_v9 = vmul.f32 %v3269_v13, %v3229_v19 }
 0x7e9   :  { %v1383_v4 = vpop.permute.xlu0 %1382 }
 0x7ea   :  { %v989_v24 = vpop.permute.xlu1 %988  ;;  %v1385_v17 = vmul.f32 %v1383_v4, %v3229_v19 }
 0x7eb   :  { %v991_v38 = vmul.f32 %v989_v24, %v3229_v19 }
 0x7ed   :  { %993 = vrot.lane.b32.xlu0 %v991_v38, %s2467_s0  ;;  %v1531_v55 = vpop.permute.xlu0 %1530 }
 0x7ee   :  { %v1533_v7 = vmul.f32 %v1531_v55, %v3229_v19 }
 0x7ef   :  { %v3326_v48 = vpop.permute.xlu1 %1071 }
 0x7f1   :  { %v3353_v50 = vpop.permute.xlu0 %539 }
 0x7f4   :  { %v1087_v10 = vpop.permute.xlu1 %1086 }
 0x7f5   :  { %v1089_v51 = vmul.f32 %v1087_v10, %v3229_v19  ;;  %v3360_v23 = vpop.permute.xlu0 %549 }
 0x7f7   :  { %1091 = vrot.lane.b32.xlu1 %v1089_v51, %s2469_s22 }
 0x7f9   :  { %v1097_v26 = vpop.permute.xlu1 %1096  ;;  %v658_v28 = vpop.permute.xlu0 %657 }
 0x7fa   :  { %v1099_v27 = vmul.f32 %v1097_v26, %v3229_v19 }
 0x7fc   :  { %1101 = vrot.lane.b32.xlu1 %v1099_v27, %s2470_s24 }
 0x7fd   :  { %v668_v58 = vpop.permute.xlu0 %667 }
 0x7fe   :  { %v1107_v12 = vpop.permute.xlu1 %1106 }
 0x7ff   :  { %v1109_v11 = vmul.f32 %v1107_v12, %v3229_v19 }
 0x801   :  { %1111 = vrot.lane.b32.xlu1 %v1109_v11, %s2458_s10  ;;  %v678_v62 = vpop.permute.xlu0 %677 }
 0x803   :  { %v1117_v35 = vpop.permute.xlu1 %1116 }
 0x804   :  { %v1119_v36 = vmul.f32 %v1117_v35, %v3229_v19 }
 0x805   :  { %1540 = vperm.xlu1 %2210, %v3226_v56   ;;  %v688_v2 = vpop.permute.xlu0 %687 }
 0x806   :  { %1121 = vrot.lane.b32.xlu0 %v1119_v36, %s2466_s20 }
 0x808   :  { %v1127_v37 = vpop.permute.xlu1 %1126 }
 0x809   :  { %v1129_v45 = vmul.f32 %v1127_v37, %v3229_v19  ;;  %1229 = vrot.lane.b32.xlu1 %v1227_v30, %s2471_s5 }
 0x80a   :  { %2212 = vset.pattern.permute.xlu1 %v2477_v43  ;;  %v698_v8 = vpop.permute.xlu0 %697 }
 0x80b   :  { %1131 = vrot.lane.b32.xlu0 %v1129_v45, %s2468_s21 }
 0x80d   :  { %v1137_v46 = vpop.permute.xlu1 %1136  ;;  %1402 = vperm.xlu1 %2212, %v3219_v20  }
 0x80e   :  { %v1139_v49 = vmul.f32 %v1137_v46, %v3229_v19 }
 0x810   :  { %1141 = vrot.lane.b32.xlu0 %v1139_v49, %s2467_s0 }
 0x811   :  { %1550 = vperm.xlu1 %2212, %v3226_v56  }
 0x812   :  { %v3346_v53 = vpop.permute.xlu1 %1219 }
 0x814   :  { %1254 = vperm.xlu0 %2211, %v3206_v32  }
 0x815   :  { %2214 = vset.pattern.permute.xlu1 %v2478_v25 }
 0x816   :  { %1412 = vperm.xlu1 %2214, %v3219_v20  }
 0x817   :  { %v1373_v43 = vpop.permute.xlu1 %1372 }
 0x818   :  { %2213 = vset.pattern.permute.xlu0 %v2478_v25  ;;  %v1375_v60 = vmul.f32 %v1373_v43, %v3229_v19 }
 0x819   :  { %1264 = vperm.xlu0 %2213, %v3206_v32   ;;  %v806_v6 = vpop.permute.xlu0 %805 }
 0x81a   :  { %1560 = vperm.xlu1 %2214, %v3226_v56  }
 0x81b   :  { %v1521_v29 = vpop.permute.xlu1 %1520 }
 0x81c   :  { %v1523_v59 = vmul.f32 %v1521_v29, %v3229_v19 }
 0x81d   :  { %2215 = vset.pattern.permute.xlu0 %v2479_v22 }
 0x81e   :  { %1274 = vperm.xlu0 %2215, %v3206_v32   ;;  %2216 = vset.pattern.permute.xlu1 %v2479_v22  ;;  %v482_v22 = vmul.f32 %v3193_v54, %v3229_v19  ;;  %v816_v51 = vpop.permute.xlu0 %815 }
 0x81f   :  { %1422 = vperm.xlu1 %2216, %v3219_v20  }
 0x820   :  { %v1245_v47 = vpop.permute.xlu1 %1244 }
 0x822   :  { %2217 = vset.pattern.permute.xlu0 %v2480_v57 }
 0x823   :  { %1284 = vperm.xlu0 %2217, %v3206_v32   ;;  %1570 = vperm.xlu1 %2216, %v3226_v56   ;;  %v826_v35 = vpop.permute.xlu0 %825 }
 0x824   :  { %v1393_v25 = vpop.permute.xlu1 %1392 }
 0x825   :  { %v1395_v63 = vmul.f32 %v1393_v25, %v3229_v19 }
 0x827   :  { %1580 = vperm.xlu0 %2217, %v3226_v56   ;;  %2218 = vset.pattern.permute.xlu1 %v2480_v57 }
 0x828   :  { %v490_v33 = vpop.permute.xlu1 %489  ;;  %1432 = vperm.xlu1 %2218, %v3219_v20  }
 0x829   :  { %v492_v41 = vadd.f32 %v490_v33, %v482_v22 }
 0x82b   :  { %2220 = vset.pattern.permute.xlu0 %v2465_v0 }
 0x82c   :  { %1515 = vperm.xlu0 %2220, %v3226_v56   ;;  %v500_v32 = vpop.permute.xlu1 %499  ;;  %2219 = vset.pattern.permute.xlu1 %v2465_v0  ;;  %v1247_v56 = vmul.f32 %v1245_v47, %v3229_v19  ;;  %v1237_v0 = vmul.f32 %v1235_v44, %v3229_v19  ;;  %v3399_v44 = vpop.permute.xlu0 %835 }
 0x82d   :  { %v502_v52 = vadd.f32 %v500_v32, %v492_v41  ;;  %1367 = vperm.xlu1 %2219, %v3219_v20   ;;  %v1222_v41 = vmul.f32 %v3346_v53, %v3229_v19 }
 0x830   :  { %1525 = vrot.lane.b32.xlu0 %v1523_v59, %s2471_s5  ;;  %v510_v61 = vpop.permute.xlu1 %509  ;;  %v3401_v45 = vpop.permute.xlu0 %845 }
 0x831   :  { %v512_v54 = vadd.f32 %v510_v61, %v502_v52  ;;  %1377 = vrot.lane.b32.xlu1 %v1375_v60, %s2471_s5  ;;  %2221 = vset.pattern.permute.xlu0 %v2480_v57 }
 0x834   :  { %1249 = vrot.lane.b32.xlu0 %v1247_v56, %s2470_s24  ;;  %v520_v20 = vpop.permute.xlu1 %519 }
 0x835   :  { %v522_v31 = vadd.f32 %v520_v20, %v512_v54  ;;  %1239 = vrot.lane.b32.xlu1 %v1237_v0, %s2469_s22 }
 0x838   :  { %1397 = vrot.lane.b32.xlu0 %v1395_v63, %s2470_s24  ;;  %v530_v14 = vpop.permute.xlu1 %529 }
 0x839   :  { %v3386_v57 = vadd.f32 %v530_v14, %v522_v31  ;;  %1387 = vrot.lane.b32.xlu1 %v1385_v17, %s2469_s22  ;;  %v926_v17 = vmul.f32 %v3308_v1, %v3229_v19 }
 0x83c   :  { %v638_v3 = vpop.permute.xlu1 %637 }
 0x83d   :  { %1535 = vrot.lane.b32.xlu1 %v1533_v7, %s2469_s22  ;;  %v640_v18 = vadd.f32 %v638_v3, %v630_v16 }
 0x840   :  { %v648_v21 = vpop.permute.xlu1 %647 }
 0x841   :  { %v650_v5 = vadd.f32 %v648_v21, %v640_v18 }
 0x843   :  { %v660_v40 = vadd.f32 %v658_v28, %v650_v5 }
 0x844   :  { %v786_v42 = vpop.permute.xlu1 %785 }
 0x845   :  { %v670_v24 = vadd.f32 %v668_v58, %v660_v40  ;;  %v788_v10 = vadd.f32 %v786_v42, %v778_v9  ;;  %v1074_v42 = vmul.f32 %v3326_v48, %v3229_v19  ;;  %v2255_v48 = vld [vmem:[#allocation6 + $0x8] sm:$0xff]  }
 0x847   :  { %v680_v38 = vadd.f32 %v678_v62, %v670_v24 }
 0x848   :  { %v796_v26 = vpop.permute.xlu1 %795 }
 0x849   :  { %v690_v27 = vadd.f32 %v688_v2, %v680_v38  ;;  %v798_v12 = vadd.f32 %v796_v26, %v788_v10 }
 0x84b   :  { %v808_v39 = vadd.f32 %v806_v6, %v798_v12  ;;  %v3395_v11 = vadd.f32 %v698_v8, %v690_v27  ;;  %v2254_v27 = vld [vmem:[#allocation6] sm:$0xff]  }
 0x84c   :  { %v934_v30 = vpop.permute.xlu1 %933  ;;  %2085 = vmatpush3.bf16.msra.mxu0 %v2254_v27 }
 0x84d   :  { %v818_v34 = vadd.f32 %v816_v51, %v808_v39  ;;  %v936_v3 = vadd.f32 %v934_v30, %v926_v17  ;;  %2086 = vmatprep.subr.bf16.mxu0 %v2472_v15 }
 0x84f   :  { %v3397_v36 = vadd.f32 %v826_v35, %v818_v34 }
 0x850   :  { %v944_v37 = vpop.permute.xlu1 %943  ;;  %v964_v46 = vpop.permute.xlu0 %963  ;;  %2087 = vmatpush3.bf16.msra.mxu0 %v2255_v48 }
 0x851   :  { %v946_v8 = vadd.f32 %v944_v37, %v936_v3  ;;  %v838_v34 = vadd.f32 %v3399_v44, %v3397_v36  ;;  %2088 = vmatprep.subr.bf16.mxu0 %v2472_v15 }
 0x854   :  { %v954_v13 = vpop.permute.xlu1 %953 }
 0x855   :  { %v974_v49 = vpop.permute.xlu0 %973  ;;  %v956_v6 = vadd.f32 %v954_v13, %v946_v8 }
 0x857   :  { %v966_v9 = vadd.f32 %v964_v46, %v956_v6  ;;  %v2256_v46 = vld [vmem:[#allocation6 + $0x10] sm:$0xff]  }
 0x858   :  { %v1082_v4 = vpop.permute.xlu1 %1081  ;;  %2089 = vmatpush3.bf16.msra.mxu0 %v2256_v46 }
 0x859   :  { %v1084_v38 = vadd.f32 %v1082_v4, %v1074_v42  ;;  %v976_v39 = vadd.f32 %v974_v49, %v966_v9  ;;  %v848_v49 = vadd.f32 %v3401_v45, %v838_v34  ;;  %2090 = vmatprep.subr.bf16.mxu0 %v2472_v15  ;;  %v2258_v45 = vld [vmem:[#allocation6 + $0x20] sm:$0xff]   ;;  %v2264_v34 = vld [vmem:[#allocation7 + $0x10] sm:$0xff]  }
 0x85a   :  { %v3403_v43 = vpop.permute.xlu0 %983  ;;  %v2262_v9 = vld [vmem:[#allocation7] sm:$0xff]  }
 0x85b   :  { %v986_v13 = vadd.f32 %v3403_v43, %v976_v39  ;;  %v2259_v43 = vld [vmem:[#allocation6 + $0x28] sm:$0xff]   ;;  %2105 = vmatpush3.bf16.msra.mxu1 %v2262_v9 }
 0x85c   :  { %2106 = vmatprep.subr.bf16.mxu1 %v2472_v15 }
 0x85f   :  { %v3405_v47 = vpop.permute.xlu0 %993 }
 0x860   :  { %v996_v36 = vadd.f32 %v3405_v47, %v986_v13  ;;  %v542_v13 = vadd.f32 %v3353_v50, %v3386_v57 }
 0x869   :  { %v1092_v55 = vpop.permute.xlu1 %1091 }
 0x86a   :  { %v1094_v12 = vadd.f32 %v1092_v55, %v1084_v38  ;;  %v2257_v55 = vld [vmem:[#allocation6 + $0x18] sm:$0xff]  }
 0x86b   :  { %2091 = vmatpush3.bf16.msra.mxu0 %v2257_v55 }
 0x86c   :  { %2092 = vmatprep.subr.bf16.mxu0 %v2472_v15 }
 0x86e   :  { %v1102_v29 = vpop.permute.xlu1 %1101 }
 0x86f   :  { %v1104_v35 = vadd.f32 %v1102_v29, %v1094_v12  ;;  %2093 = vmatpush3.bf16.msra.mxu0 %v2258_v45 }
 0x870   :  { %2094 = vmatprep.subr.bf16.mxu0 %v2472_v15 }
 0x873   :  { %v1112_v25 = vpop.permute.xlu1 %1111  ;;  %2095 = vmatpush3.bf16.msra.mxu0 %v2259_v43 }
 0x874   :  { %v1114_v37 = vadd.f32 %v1112_v25, %v1104_v35  ;;  %2096 = vmatprep.subr.bf16.mxu0 %v2472_v15 }
 0x878   :  { %v3407_v28 = vpop.permute.xlu0 %1121 }
 0x879   :  { %v1124_v4 = vadd.f32 %v3407_v28, %v1114_v37 }
 0x87d   :  { %v3413_v32 = vpop.permute.xlu0 %1131 }
 0x87e   :  { %v1134_v44 = vadd.f32 %v3413_v32, %v1124_v4  ;;  %v552_v4 = vadd.f32 %v3360_v23, %v542_v13 }
 0x882   :  { %v3417_v60 = vpop.permute.xlu0 %1141 }
 0x884   :  { %v1541_v33 = vpop.permute.xlu1 %1540 }
 0x885   :  { %v1543_v22 = vmul.f32 %v1541_v33, %v3229_v19 }
 0x887   :  { %1545 = vrot.lane.b32.xlu0 %v1543_v22, %s2470_s24 }
 0x888   :  { %v1230_v58 = vpop.permute.xlu1 %1229 }
 0x889   :  { %v3415_v52 = vadd.f32 %v1230_v58, %v1222_v41 }
 0x88c   :  { %v1403_v59 = vpop.permute.xlu1 %1402 }
 0x88d   :  { %v1405_v0 = vmul.f32 %v1403_v59, %v3229_v19 }
 0x890   :  { %v1551_v61 = vpop.permute.xlu1 %1550 }
 0x891   :  { %v1553_v63 = vmul.f32 %v1551_v61, %v3229_v19 }
 0x893   :  { %v1255_v54 = vpop.permute.xlu0 %1254 }
 0x894   :  { %v1257_v62 = vmul.f32 %v1255_v54, %v3229_v19 }
 0x895   :  { %v1413_v56 = vpop.permute.xlu1 %1412 }
 0x896   :  { %1259 = vrot.lane.b32.xlu1 %v1257_v62, %s2458_s10  ;;  %v1415_v2 = vmul.f32 %v1413_v56, %v3229_v19 }
 0x898   :  { %v1265_v53 = vpop.permute.xlu0 %1264 }
 0x899   :  { %v1267_v20 = vmul.f32 %v1265_v53, %v3229_v19  ;;  %v1561_v31 = vpop.permute.xlu1 %1560 }
 0x89a   :  { %1407 = vrot.lane.b32.xlu1 %v1405_v0, %s2458_s10  ;;  %v1563_v18 = vmul.f32 %v1561_v31, %v3229_v19  ;;  %v2260_v0 = vld [vmem:[#allocation6 + $0x30] sm:$0xff]  }
 0x89b   :  { %1269 = vrot.lane.b32.xlu0 %v1267_v20, %s2466_s20  ;;  %2097 = vmatpush3.bf16.msra.mxu0 %v2260_v0 }
 0x89c   :  { %2098 = vmatprep.subr.bf16.mxu0 %v2472_v15 }
 0x89d   :  { %v1275_v14 = vpop.permute.xlu0 %1274 }
 0x89e   :  { %v1423_v7 = vpop.permute.xlu1 %1422  ;;  %1555 = vrot.lane.b32.xlu1 %v1553_v63, %s2458_s10  ;;  %v1277_v16 = vmul.f32 %v1275_v14, %v3229_v19 }
 0x89f   :  { %1417 = vrot.lane.b32.xlu0 %v1415_v2, %s2466_s20  ;;  %v1425_v1 = vmul.f32 %v1423_v7, %v3229_v19 }
 0x8a2   :  { %v1571_v21 = vpop.permute.xlu1 %1570  ;;  %1279 = vrot.lane.b32.xlu1 %v1277_v16, %s2468_s21  ;;  %v1285_v5 = vpop.permute.xlu0 %1284 }
 0x8a3   :  { %1565 = vrot.lane.b32.xlu0 %v1563_v18, %s2466_s20  ;;  %v1287_v40 = vmul.f32 %v1285_v5, %v3229_v19  ;;  %v1573_v10 = vmul.f32 %v1571_v21, %v3229_v19  ;;  %v2261_v5 = vld [vmem:[#allocation6 + $0x38] sm:$0xff]  }
 0x8a4   :  { %2099 = vmatpush3.bf16.msra.mxu0 %v2261_v5 }
 0x8a5   :  { %2124 = vmatprep.subr.bf16.mxu0 %v2472_v15 }
 0x8a6   :  { %1427 = vrot.lane.b32.xlu1 %v1425_v1, %s2468_s21  ;;  %v1581_v26 = vpop.permute.xlu0 %1580 }
 0x8a7   :  { %v1433_v24 = vpop.permute.xlu1 %1432  ;;  %1289 = vrot.lane.b32.xlu0 %v1287_v40, %s2467_s0  ;;  %v1583_v30 = vmul.f32 %v1581_v26, %v3229_v19 }
 0x8a8   :  { %v1435_v51 = vmul.f32 %v1433_v24, %v3229_v19 }
 0x8aa   :  { %1575 = vrot.lane.b32.xlu1 %v1573_v10, %s2468_s21  ;;  %v2263_v10 = vld [vmem:[#allocation7 + $0x8] sm:$0xff]  }
 0x8ab   :  { %1437 = vrot.lane.b32.xlu0 %v1435_v51, %s2467_s0  ;;  %v1516_v25 = vpop.permute.xlu0 %1515  ;;  %2107 = vmatpush3.bf16.msra.mxu1 %v2263_v10 }
 0x8ac   :  { %v1368_v29 = vpop.permute.xlu1 %1367  ;;  %v1518_v2 = vmul.f32 %v1516_v25, %v3229_v19  ;;  %2108 = vmatprep.subr.bf16.mxu1 %v2472_v15 }
 0x8ad   :  { %v1370_v62 = vmul.f32 %v1368_v29, %v3229_v19 }
 0x8ae   :  { %1585 = vrot.lane.b32.xlu1 %v1583_v30, %s2467_s0 }
 0x8af   :  { %1590 = vrot.lane.b32.xlu0 %v3395_v11, %s2467_s0  ;;  %v1144_v11 = vadd.f32 %v3417_v60, %v1134_v44  ;;  %v1526_v33 = vpop.permute.xlu0 %1525  ;;  %2109 = vmatpush3.bf16.msra.mxu1 %v2264_v34 }
 0x8b0   :  { %v1378_v47 = vpop.permute.xlu1 %1377  ;;  %v1528_v3 = vadd.f32 %v1526_v33, %v1518_v2  ;;  %2110 = vmatprep.subr.bf16.mxu1 %v2472_v15  ;;  %v2266_v33 = vld [vmem:[#allocation7 + $0x20] sm:$0xff]  }
 0x8b1   :  { %v1380_v53 = vadd.f32 %v1378_v47, %v1370_v62 }
 0x8b2   :  { %1594 = vrot.lane.b32.xlu1 %v848_v49, %s2468_s21 }
 0x8b3   :  { %1598 = vrot.lane.b32.xlu0 %v996_v36, %s2466_s20  ;;  %v1250_v41 = vpop.permute.xlu0 %1249 }
 0x8b4   :  { %v1240_v28 = vpop.permute.xlu1 %1239 }
 0x8b5   :  { %v1242_v56 = vadd.f32 %v1240_v28, %v3415_v52  ;;  %v2265_v28 = vld [vmem:[#allocation7 + $0x18] sm:$0xff]  }
 0x8b6   :  { %1602 = vrot.lane.b32.xlu1 %v1144_v11, %s2458_s10  ;;  %2111 = vmatpush3.bf16.msra.mxu1 %v2265_v28 }
 0x8b7   :  { %v1398_v32 = vpop.permute.xlu0 %1397  ;;  %v1252_v17 = vadd.f32 %v1250_v41, %v1242_v56  ;;  %2112 = vmatprep.subr.bf16.mxu1 %v2472_v15  ;;  %v2268_v41 = vld [vmem:[#allocation7 + $0x30] sm:$0xff]  }
 0x8b8   :  { %v1388_v22 = vpop.permute.xlu1 %1387 }
 0x8b9   :  { %v1390_v63 = vadd.f32 %v1388_v22, %v1380_v53  ;;  %v2267_v22 = vld [vmem:[#allocation7 + $0x28] sm:$0xff]  }
 0x8ba   :  { %2113 = vmatpush3.bf16.msra.mxu1 %v2266_v33 }
 0x8bb   :  { %v1400_v8 = vadd.f32 %v1398_v32, %v1390_v63  ;;  %2114 = vmatprep.subr.bf16.mxu1 %v2472_v15  ;;  %v2270_v32 = vld [vmem:[%s3537_s7] sm:$0xff]  }
 0x8bc   :  { %v1536_v58 = vpop.permute.xlu1 %1535 }
 0x8bd   :  { %v1538_v21 = vadd.f32 %v1536_v58, %v1528_v3  ;;  %v2269_v58 = vld [vmem:[#allocation7 + $0x38] sm:$0xff]   ;;  %v2275_v3 = vld [vmem:[%s3537_s7 + $0x28] sm:$0xff]  }
 0x8be   :  { %2115 = vmatpush3.bf16.msra.mxu1 %v2267_v22 }
 0x8bf   :  { %2116 = vmatprep.subr.bf16.mxu1 %v2472_v15 }
 0x8c2   :  { %2117 = vmatpush3.bf16.msra.mxu1 %v2268_v41 }
 0x8c3   :  { %2118 = vmatprep.subr.bf16.mxu1 %v2472_v15 }
 0x8c6   :  { %2119 = vmatpush3.bf16.msra.mxu1 %v2269_v58 }
 0x8f9   :  { %v1546_v60 = vpop.permute.xlu0 %1545 }
 0x8fa   :  { %v1548_v40 = vadd.f32 %v1546_v60, %v1538_v21  ;;  %v2272_v60 = vld [vmem:[%s3537_s7 + $0x10] sm:$0xff]  }
 0x908   :  { %v1260_v59 = vpop.permute.xlu1 %1259 }
 0x909   :  { %v1262_v14 = vadd.f32 %v1260_v59, %v1252_v17  ;;  %v2271_v59 = vld [vmem:[%s3537_s7 + $0x8] sm:$0xff]  }
 0x90c   :  { %v1408_v61 = vpop.permute.xlu1 %1407 }
 0x90d   :  { %v1270_v54 = vpop.permute.xlu0 %1269  ;;  %v1410_v52 = vadd.f32 %v1408_v61, %v1400_v8  ;;  %v2001_v61 = vld [vmem:[%s3534_s4] ss:$0 sm:$0xff]  ;;  %v2277_v8 = vld [vmem:[%s3537_s7 + $0x38] sm:$0xff]  }
 0x90e   :  { %v1272_v18 = vadd.f32 %v1270_v54, %v1262_v14  ;;  %v2273_v14 = vld [vmem:[%s3537_s7 + $0x18] sm:$0xff]  }
 0x910   :  { %v1556_v20 = vpop.permute.xlu1 %1555 }
 0x911   :  { %v1418_v31 = vpop.permute.xlu0 %1417  ;;  %v1558_v19 = vadd.f32 %v1556_v20, %v1548_v40 }
 0x912   :  { %v1420_v24 = vadd.f32 %v1418_v31, %v1410_v52 }
 0x914   :  { %v1280_v7 = vpop.permute.xlu1 %1279 }
 0x915   :  { %v1566_v16 = vpop.permute.xlu0 %1565  ;;  %v1282_v6 = vadd.f32 %v1280_v7, %v1272_v18  ;;  %v2274_v7 = vld [vmem:[%s3537_s7 + $0x20] sm:$0xff]  }
 0x916   :  { %v1568_v27 = vadd.f32 %v1566_v16, %v1558_v19  ;;  %v2276_v16 = vld [vmem:[%s3537_s7 + $0x30] sm:$0xff]   ;;  %v2010_v18 = vld [vmem:[#allocation9] ss:$0 sm:$0xff]  ;;  %v2019_v19 = vld [vmem:[#allocation10] ss:$0 sm:$0xff] }
 0x918   :  { %v1428_v1 = vpop.permute.xlu1 %1427 }
 0x919   :  { %v1290_v42 = vpop.permute.xlu0 %1289  ;;  %v1430_v51 = vadd.f32 %v1428_v1, %v1420_v24 }
 0x91a   :  { %v1292_v38 = vadd.f32 %v1290_v42, %v1282_v6 }
 0x91c   :  { %v1576_v26 = vpop.permute.xlu1 %1575  ;;  %1606 = vrot.lane.b32.xlu0 %v1292_v38, %s2470_s24 }
 0x91d   :  { %v1438_v12 = vpop.permute.xlu0 %1437  ;;  %v1578_v48 = vadd.f32 %v1576_v26, %v1568_v27 }
 0x91e   :  { %v1440_v39 = vadd.f32 %v1438_v12, %v1430_v51 }
 0x920   :  { %v1586_v35 = vpop.permute.xlu1 %1585  ;;  %1610 = vrot.lane.b32.xlu1 %v1440_v39, %s2469_s22 }
 0x921   :  { %v1588_v30 = vadd.f32 %v1586_v35, %v1578_v48  ;;  %v1591_v37 = vpop.permute.xlu0 %1590 }
 0x922   :  { %v1617_v36 = vsel %vm390_vm0, %v552_v4, %v1591_v37 }
 0x923   :  { %1614 = vrot.lane.b32.xlu0 %v1588_v30, %s2471_s5 }
 0x924   :  { %v1595_v46 = vpop.permute.xlu1 %1594 }
 0x925   :  { %v1599_v49 = vpop.permute.xlu0 %1598  ;;  %v1618_v55 = vsel %vm392_vm1, %v1617_v36, %v1595_v46 }
 0x926   :  { %v1619_v45 = vsel %vm394_vm2, %v1618_v55, %v1599_v49 }
 0x928   :  { %v1603_v44 = vpop.permute.xlu1 %1602 }
 0x929   :  { %v1620_v29 = vsel %vm396_vm3, %v1619_v45, %v1603_v44 }
 0x98e   :  { %v1607_v11 = vpop.permute.xlu0 %1606 }
 0x98f   :  { %v1621_v47 = vsel %vm398_vm4, %v1620_v29, %v1607_v11 }
 0x992   :  { %v1611_v43 = vpop.permute.xlu1 %1610 }
 0x993   :  { %v1622_v25 = vsel %vm400_vm5, %v1621_v47, %v1611_v43 }
 0x995   :  { %v1615_v50 = vpop.permute.xlu0 %1614 }
 0x996   :  { %v1623_v57 = vsel %vm402_vm6, %v1622_v25, %v1615_v50 }
 0x997   :  { %v1624_v23 = vpack.c.bf16 %v1623_v57, %v1623_v57 }
 0x999   :  { %2101 = vmatmul.mubr.bf16.vlgmr.msra.gmra.mrb[4].mxu0 %v1624_v23 }
 0x99a   :  { %2140 = vmatprep.mubr.msk.bf16.mxu0 %vm2473_vm15, %v2472_v15  ;;  %2125 = vmatpush3.bf16.msra.mxu0 %v2270_v32 }
 0x99b   :  { %2126 = vmatprep.subr.bf16.mxu0 %v2472_v15 }
 0x99e   :  { %2127 = vmatpush3.bf16.msra.mxu0 %v2271_v59 }
 0x99f   :  { %2128 = vmatprep.subr.bf16.mxu0 %v2472_v15 }
 0x9a2   :  { %2129 = vmatpush3.bf16.msra.mxu0 %v2272_v60 }
 0x9a3   :  { %2130 = vmatprep.subr.bf16.mxu0 %v2472_v15 }
 0x9a6   :  { %2131 = vmatpush3.bf16.msra.mxu0 %v2273_v14 }
 0x9a7   :  { %2132 = vmatprep.subr.bf16.mxu0 %v2472_v15 }
 0x9aa   :  { %2133 = vmatpush3.bf16.msra.mxu0 %v2274_v7 }
 0x9ab   :  { %2134 = vmatprep.subr.bf16.mxu0 %v2472_v15 }
 0x9ae   :  { %2135 = vmatpush3.bf16.msra.mxu0 %v2275_v3 }
 0x9af   :  { %2136 = vmatprep.subr.bf16.mxu0 %v2472_v15 }
 0x9b2   :  { %2137 = vmatpush3.bf16.msra.mxu0 %v2276_v16 }
 0x9b3   :  { %2138 = vmatprep.subr.bf16.mxu0 %v2472_v15 }
 0x9b6   :  { %2139 = vmatpush3.bf16.msra.mxu0 %v2277_v8 }
 0xa6c   :  { %v1730_v54 = vpop.f32.mrb[4].mxu0 }
 0xa6d   :  { %v1731_v62 = vadd.f32 %v2001_v61, %v1730_v54  ;;  %v2102_v56 = vpop.f32.mrb[5].mxu0 }
 0xa6e   :  { %v1733_v0 = vpop.f32.mrb[6].mxu0 }
 0xa6f   :  { %v1736_v53 = vmul.f32 0.5, %v1731_v62  ;;  %v2103_v20 = vpop.f32.mrb[7].mxu0 }
 0xa71   :  { %2310 = vtanh.f32 %v1736_v53 }
 0xa7b   :  { %v2311_v31 = vpop.eup %2310 }
 0xa7c   :  { %v1738_v63 = vmul.f32 0.5, %v2311_v31 }
 0xa7e   :  { %v1739_v17 = vadd.f32 0.5, %v1738_v63 }
 0xa80   :  { %v1740_v2 = vpack.c.bf16 %v1739_v17, %v1739_v17 }
 0xa82   :  { %2121 = vmatmul.mubr.bf16.vlgmr.msra.gmra.mrb[4].mxu1 %v1740_v2 }
 0xb55   :  { %v1846_v21 = vpop.f32.mrb[4].mxu1 }
 0xb56   :  { %v1847_v5 = vadd.f32 %v2010_v18, %v1846_v21  ;;  %v2122_v52 = vpop.f32.mrb[5].mxu1 }
 0xb57   :  { %v1849_v6 = vpop.f32.mrb[6].mxu1 }
 0xb58   :  { %v1852_v1 = vmul.f32 0.5, %v1847_v5  ;;  %v2123_v40 = vpop.f32.mrb[7].mxu1 }
 0xb5a   :  { %2312 = vtanh.f32 %v1852_v1 }
 0xb64   :  { %v2313_v42 = vpop.eup %2312 }
 0xb65   :  { %v1854_v9 = vmul.f32 0.5, %v2313_v42 }
 0xb67   :  { %v1855_v24 = vadd.f32 0.5, %v1854_v9 }
 0xb69   :  { %v1856_v38 = vpack.c.bf16 %v1855_v24, %v1855_v24 }
 0xb6b   :  { %2141 = vmatmul.mubr.bf16.vlgmr.msra.gmra.mrb[8].mxu0 %v1856_v38 }
 0xc3e   :  { %v1962_v10 = vpop.f32.mrb[8].mxu0 }
 0xc3f   :  { %v1963_v51 = vadd.f32 %v2019_v19, %v1962_v10  ;;  %v2142_v26 = vpop.f32.mrb[9].mxu0 }
 0xc40   :  { %v1965_v27 = vpop.f32.mrb[10].mxu0 }
 0xc41   :  { %1968 = vst [vmem:[%s3539_s9] sm:$0xff] %v1963_v51  ;;  %v2143_v15 = vpop.f32.mrb[11].mxu0 }
 0xc42   :  { %1973 = vsyncpa [#allocation3], 1 }
 0xc43   :  { %1974 = vsyncpa [#allocation5], 1 }
 0xc44   :  { %1975 = vsyncpa [#allocation8], 1 }
 0xc45   :  { %1976 = vsyncpa [#allocation11], 1 }

</bundles_post_ra>
